<compile_context>
chip_gen: v5e
topology: v5e:2x2
jax: 0.10.0
libtpu: 0.0.40
codegen_flags: <defaults>
</compile_context>

<pallas_src>
import functools
import math

import jax
import jax.numpy as jnp
from jax import lax
from jax.experimental import pallas as pl

# ------------------------- small synthetic BERT config -------------------------
VOCAB = 100
MAX_POS = 32
TYPE_VOCAB = 2
HIDDEN = 32
NUM_LAYERS = 2
NUM_HEADS = 4
HEAD_DIM = HIDDEN // NUM_HEADS
FFN = 64
LABELS = 5
LN_EPS = 1e-12


# ------------------------------ in-kernel helpers -------------------------------
def _gelu(x):
    # tanh-approx GELU (EUP-friendly). TODO(synk): HF BERT default is exact erf GELU.
    return 0.5 * x * (1.0 + jnp.tanh(0.7978845608028654 * (x + 0.044715 * x * x * x)))


def _ln(x, g, b):
    mu = jnp.mean(x, axis=-1, keepdims=True)
    var = jnp.mean((x - mu) ** 2, axis=-1, keepdims=True)
    return (x - mu) * lax.rsqrt(var + LN_EPS) * g + b


# --------------------- the single fused forward kernel --------------------------
def _fused_forward_kernel(emb_ref, mask_ref, misc_ref, wqk_ref, wvo_ref,
                          w1_ref, w2_ref, bias_ref, clsw_ref, trans_ref, out_ref,
                          *, batch, seq, hidden, heads, layers, labels, ffn):
    hid = hidden
    hd = hid // heads

    # ---- embedding LayerNorm (fused; no standalone launch / HBM round-trip) ----
    x = _ln(emb_ref[...], misc_ref[0:1, 0:hid], misc_ref[1:2, 0:hid])     # (B*S, H)

    # Additive key mask kept at (B,1,S); broadcast happens inside the score add.
    mask_f = mask_ref[...]                                                # (B, S)
    neg = ((1.0 - mask_f) * -10000.0).reshape(batch, 1, seq)              # (B, 1, S)
    # lengths = attention_mask.sum(axis=1), computed in-kernel (f32 compare is fine)
    lengths = jnp.sum(mask_f, axis=1, keepdims=True)                      # (B, 1)

    # ---- encoder layers, unrolled in one kernel body ----
    for l in range(layers):
        xb = x.astype(jnp.bfloat16)
        # Q|K projection (scale already folded into the Q half of wqk and bias).
        qk = (jnp.dot(xb, wqk_ref[l], preferred_element_type=jnp.float32)
              + bias_ref[l, 0:1, 0:2 * hid])                              # (B*S, 2H)

        acc = None
        for h in range(heads):
            q = qk[:, h * hd:(h + 1) * hd].reshape(batch, seq, hd)
            k = qk[:, hid + h * hd:hid + (h + 1) * hd].reshape(batch, seq, hd)
            s = jnp.einsum("bqd,bkd->bqk", q, k,
                           preferred_element_type=jnp.float32)            # (B, S, S)
            s = s + neg                                                   # bcast (B,1,S)
            s = s - jnp.max(s, axis=-1, keepdims=True)
            p = jnp.exp(s)
            p = p * pl.reciprocal(jnp.sum(p, axis=-1, keepdims=True), approx=True)
            # V@O folded at init: one (H,H) matmul per head, no lane slice of V/wo.
            v = jnp.dot(xb, wvo_ref[l, h],
                        preferred_element_type=jnp.float32).reshape(batch, seq, hid)
            part = jnp.einsum("bqk,bkd->bqd", p, v,
                              preferred_element_type=jnp.float32)         # (B, S, H)
            acc = part if acc is None else acc + part

        attn = acc.reshape(batch * seq, hid) + bias_ref[l, 1:2, 0:hid]

        # dropout (eval mode) = identity
        x1 = _ln(attn + x, bias_ref[l, 2:3, 0:hid], bias_ref[l, 3:4, 0:hid])
        ff = _gelu(jnp.dot(x1.astype(jnp.bfloat16), w1_ref[l],
                           preferred_element_type=jnp.float32)
                   + bias_ref[l, 4:5, 0:ffn])
        ff = (jnp.dot(ff.astype(jnp.bfloat16), w2_ref[l],
                      preferred_element_type=jnp.float32)
              + bias_ref[l, 5:6, 0:hid])
        x = _ln(ff + x1, bias_ref[l, 6:7, 0:hid], bias_ref[l, 7:8, 0:hid])

    # ---- classification head + CRF Viterbi decode (all in-register) ----
    logits = (jnp.dot(x, clsw_ref[...], preferred_element_type=jnp.float32)
              + misc_ref[2:3, 0:labels])                                  # (B*S, L)
    emis = logits.reshape(batch, seq, labels)                             # (B, S, L)
    trans_t = trans_ref[...]                                              # (L_to, L_from)

    iota_bl = lax.broadcasted_iota(jnp.int32, (batch, labels), 1)
    iota_from = lax.broadcasted_iota(jnp.int32, (batch, labels, labels), 2)

    # Forward recursion, fully unrolled (seq static & tiny). Padded steps
    # (t >= length) keep the score and use identity backpointers.
    score = emis[:, 0, :]                                                 # (B, L)
    bps = [None] * seq
    for t in range(1, seq):
        cand = score[:, None, :] + trans_t[None, :, :]                    # (B, L_to, L_from)
        best = jnp.max(cand, axis=-1)                                     # (B, L_to)
        bp = jnp.min(jnp.where(cand == best[:, :, None], iota_from, labels),
                     axis=-1)                                             # (B, L) int32
        valid = lengths > t                                               # (B, 1) bool
        score = jnp.where(valid, best + emis[:, t, :], score)
        bps[t] = jnp.where(valid, bp, iota_bl)

    # Backtrace with int32 indices (no float one-hot round trips).
    m = jnp.max(score, axis=-1, keepdims=True)
    idx = jnp.min(jnp.where(score == m, iota_bl, labels),
                  axis=-1, keepdims=True)                                 # (B, 1) int32
    tag_cols = [None] * seq
    tag_cols[seq - 1] = idx
    for t in range(seq - 1, 0, -1):
        idx = jnp.sum(jnp.where(iota_bl == idx, bps[t], 0),
                      axis=-1, keepdims=True)                             # (B, 1) int32
        tag_cols[t - 1] = idx

    # Assemble the (B, S) int32 path with lane selects (single small store).
    lane = lax.broadcasted_iota(jnp.int32, (batch, seq), 1)
    tags = jnp.zeros((batch, seq), jnp.int32)
    for t in range(seq):
        tags = jnp.where(lane == t, tag_cols[t], tags)
    out_ref[...] = tags


def fused_bert_crf(emb2d, mask_f, params, *, batch, seq):
    kernel = functools.partial(_fused_forward_kernel, batch=batch, seq=seq,
                               hidden=HIDDEN, heads=NUM_HEADS, layers=NUM_LAYERS,
                               labels=LABELS, ffn=FFN)
    return pl.pallas_call(
        kernel,
        out_shape=jax.ShapeDtypeStruct((batch, seq), jnp.int32),
    )(emb2d, mask_f, params["misc"], params["wqk"], params["wvo"],
      params["w1"], params["w2"], params["bias"], params["cls_w"],
      params["crf_trans_t"])


# ----------------------------- model glue (plain JAX) ---------------------------
def bert_crf_forward(params, input_ids, attention_mask, token_type_ids):
    b, s = input_ids.shape
    # BertModel embeddings: table gathers stay in XLA glue (dynamic int gather);
    # the summed embedding fuses with the gather, LayerNorm happens in-kernel.
    emb = (params["word_emb"][input_ids]
           + params["pos_emb"][:s][None, :, :]
           + params["type_emb"][token_type_ids])                          # (B, S, H)
    best_paths = fused_bert_crf(emb.reshape(b * s, HIDDEN),
                                attention_mask.astype(jnp.float32),
                                params, batch=b, seq=s)
    # pooler_output of BertModel is never consumed by the CRF head -> dropped.
    # TODO(synk): labels/loss branch (CRF NLL, cross-entropy, focal loss) not implemented.
    # TODO(synk): CRF start/end transition scores not modeled (transition matrix only).
    return best_paths


def init_params(key):
    def norm(k, shape):
        return 0.02 * jax.random.normal(k, shape, jnp.float32)

    ks = iter(jax.random.split(key, 64))
    H, hd, scale = HIDDEN, HEAD_DIM, 1.0 / math.sqrt(HEAD_DIM)

    emb_ln_g = jnp.ones((H,), jnp.float32)
    emb_ln_b = jnp.zeros((H,), jnp.float32)
    cls_b = jnp.zeros((LABELS,), jnp.float32)
    misc = (jnp.zeros((8, 128), jnp.float32)
            .at[0, :H].set(emb_ln_g)
            .at[1, :H].set(emb_ln_b)
            .at[2, :LABELS].set(cls_b))

    params = {
        "word_emb": norm(next(ks), (VOCAB, HIDDEN)),
        "pos_emb": norm(next(ks), (MAX_POS, HIDDEN)),
        "type_emb": norm(next(ks), (TYPE_VOCAB, HIDDEN)),
        "misc": misc,
        "cls_w": norm(next(ks), (HIDDEN, LABELS)),
        # transitions stored pre-transposed: crf_trans_t[j, i] = score(i -> j)
        "crf_trans_t": jnp.transpose(norm(next(ks), (LABELS, LABELS))),
    }

    wqk_l, wvo_l, w1_l, w2_l, bias_l = [], [], [], [], []
    for _ in range(NUM_LAYERS):
        wq = norm(next(ks), (H, H))
        wk = norm(next(ks), (H, H))
        wv = norm(next(ks), (H, H))
        wo = norm(next(ks), (H, H))
        bq = jnp.zeros((H,), jnp.float32)
        bk = jnp.zeros((H,), jnp.float32)
        bv = jnp.zeros((H,), jnp.float32)
        bo = jnp.zeros((H,), jnp.float32)
        ln1_g, ln1_b = jnp.ones((H,), jnp.float32), jnp.zeros((H,), jnp.float32)
        w1 = norm(next(ks), (H, FFN))
        b1 = jnp.zeros((FFN,), jnp.float32)
        w2 = norm(next(ks), (FFN, H))
        b2 = jnp.zeros((H,), jnp.float32)
        ln2_g, ln2_b = jnp.ones((H,), jnp.float32), jnp.zeros((H,), jnp.float32)

        # Q|K projection with the attention scale folded into the Q half.
        wqk_l.append(jnp.concatenate([wq * scale, wk], axis=1))            # (H, 2H)
        # V@O algebraic fusion per head: Wvo_h = Wv[:, h] @ Wo[h, :]  -> (heads, H, H)
        wvo_l.append(jnp.stack(
            [wv[:, h * hd:(h + 1) * hd] @ wo[h * hd:(h + 1) * hd, :]
             for h in range(NUM_HEADS)], axis=0))
        # Folded attention-output bias (rows of softmax sum to 1): bo + sum_h bv_h @ Wo_h
        b_attn = bo + sum(bv[h * hd:(h + 1) * hd] @ wo[h * hd:(h + 1) * hd, :]
                          for h in range(NUM_HEADS))
        w1_l.append(w1)
        w2_l.append(w2)
        bias_l.append(jnp.zeros((8, 128), jnp.float32)
                      .at[0, :2 * H].set(jnp.concatenate([bq * scale, bk]))
                      .at[1, :H].set(b_attn)
                      .at[2, :H].set(ln1_g).at[3, :H].set(ln1_b)
                      .at[4, :FFN].set(b1)
                      .at[5, :H].set(b2)
                      .at[6, :H].set(ln2_g).at[7, :H].set(ln2_b))

    # Large weights stored bf16 (MXU-native on v6e/v7x, halves weight DMA bytes);
    # all accumulation / elementwise math stays f32 in-kernel (v5e-safe).
    params["wqk"] = jnp.stack(wqk_l).astype(jnp.bfloat16)                  # (L, H, 2H)
    params["wvo"] = jnp.stack(wvo_l).astype(jnp.bfloat16)                  # (L, heads, H, H)
    params["w1"] = jnp.stack(w1_l).astype(jnp.bfloat16)                    # (L, H, FFN)
    params["w2"] = jnp.stack(w2_l).astype(jnp.bfloat16)                    # (L, FFN, H)
    params["bias"] = jnp.stack(bias_l)                                     # (L, 8, 128) f32
    return params


if __name__ == "__main__":
    key = jax.random.PRNGKey(0)
    params = init_params(key)

    B, S = 2, 8
    ids_key = jax.random.fold_in(key, 123)
    input_ids = jax.random.randint(ids_key, (B, S), 0, VOCAB, dtype=jnp.int32)
    token_type_ids = jnp.zeros((B, S), jnp.int32)
    attention_mask = jnp.array([[1, 1, 1, 1, 1, 1, 1, 1],
                                [1, 1, 1, 1, 1, 1, 0, 0]], jnp.int32)

    fwd = jax.jit(bert_crf_forward)
    best_paths = jax.block_until_ready(
        fwd(params, input_ids, attention_mask, token_type_ids))
    assert best_paths.shape == (B, S)
    assert best_paths.dtype == jnp.int32
    print("KERNEL_OK")
</pallas_src>

<mosaic_0001>
module attributes {stable_mosaic.version = 11 : i64} {
  func.func @_fused_forward_kernel(%arg0: memref<16x32xf32, #tpu.memory_space<vmem>>, %arg1: memref<2x8xf32, #tpu.memory_space<vmem>>, %arg2: memref<8x128xf32, #tpu.memory_space<vmem>>, %arg3: memref<2x32x64xbf16, #tpu.memory_space<vmem>>, %arg4: memref<2x4x32x32xbf16, #tpu.memory_space<vmem>>, %arg5: memref<2x32x64xbf16, #tpu.memory_space<vmem>>, %arg6: memref<2x64x32xbf16, #tpu.memory_space<vmem>>, %arg7: memref<2x8x128xf32, #tpu.memory_space<vmem>>, %arg8: memref<32x5xf32, #tpu.memory_space<vmem>>, %arg9: memref<5x5xf32, #tpu.memory_space<vmem>>, %arg10: memref<2x8xi32, #tpu.memory_space<vmem>>) attributes {dimension_semantics = [], scalar_prefetch = 0 : i64, scratch_operands = 0 : i64, tpu.core_type = #tpu.core_type<tc>} {
    %c0 = arith.constant 0 : index
    %c0_0 = arith.constant 0 : index
    %0 = vector.load %arg0[%c0, %c0_0] : memref<16x32xf32, #tpu.memory_space<vmem>>, vector<16x32xf32>
    %c0_1 = arith.constant 0 : index
    %c0_2 = arith.constant 0 : index
    %1 = vector.load %arg2[%c0_1, %c0_2] : memref<8x128xf32, #tpu.memory_space<vmem>>, vector<1x32xf32>
    %c1 = arith.constant 1 : index
    %c0_3 = arith.constant 0 : index
    %2 = vector.load %arg2[%c1, %c0_3] : memref<8x128xf32, #tpu.memory_space<vmem>>, vector<1x32xf32>
    %cst = arith.constant dense<0.000000e+00> : vector<16xf32>
    %3 = vector.multi_reduction <add>, %0, %cst [1] : vector<16x32xf32> to vector<16xf32>
    %4 = vector.shape_cast %3 : vector<16xf32> to vector<16x1xf32>
    %cst_4 = arith.constant 3.200000e+01 : f32
    %5 = vector.broadcast %cst_4 : f32 to vector<16x1xf32>
    %6 = arith.divf %4, %5 : vector<16x1xf32>
    %7 = vector.broadcast %6 : vector<16x1xf32> to vector<16x32xf32>
    %8 = arith.subf %0, %7 : vector<16x32xf32>
    %9 = arith.mulf %8, %8 : vector<16x32xf32>
    %cst_5 = arith.constant dense<0.000000e+00> : vector<16xf32>
    %10 = vector.multi_reduction <add>, %9, %cst_5 [1] : vector<16x32xf32> to vector<16xf32>
    %11 = vector.shape_cast %10 : vector<16xf32> to vector<16x1xf32>
    %cst_6 = arith.constant 3.200000e+01 : f32
    %12 = vector.broadcast %cst_6 : f32 to vector<16x1xf32>
    %13 = arith.divf %11, %12 : vector<16x1xf32>
    %14 = vector.broadcast %6 : vector<16x1xf32> to vector<16x32xf32>
    %15 = arith.subf %0, %14 : vector<16x32xf32>
    %cst_7 = arith.constant 9.99999996E-13 : f32
    %16 = vector.broadcast %cst_7 : f32 to vector<16x1xf32>
    %17 = arith.addf %13, %16 : vector<16x1xf32>
    %18 = math.rsqrt %17 : vector<16x1xf32>
    %19 = vector.broadcast %18 : vector<16x1xf32> to vector<16x32xf32>
    %20 = arith.mulf %15, %19 : vector<16x32xf32>
    %21 = vector.broadcast %1 : vector<1x32xf32> to vector<16x32xf32>
    %22 = arith.mulf %20, %21 : vector<16x32xf32>
    %23 = vector.broadcast %2 : vector<1x32xf32> to vector<16x32xf32>
    %24 = arith.addf %22, %23 : vector<16x32xf32>
    %c0_8 = arith.constant 0 : index
    %c0_9 = arith.constant 0 : index
    %25 = vector.load %arg1[%c0_8, %c0_9] : memref<2x8xf32, #tpu.memory_space<vmem>>, vector<2x8xf32>
    %cst_10 = arith.constant 1.000000e+00 : f32
    %26 = vector.broadcast %cst_10 : f32 to vector<2x8xf32>
    %27 = arith.subf %26, %25 : vector<2x8xf32>
    %cst_11 = arith.constant -1.000000e+04 : f32
    %28 = vector.broadcast %cst_11 : f32 to vector<2x8xf32>
    %29 = arith.mulf %27, %28 : vector<2x8xf32>
    %30 = vector.shape_cast %29 : vector<2x8xf32> to vector<2x1x8xf32>
    %cst_12 = arith.constant dense<0.000000e+00> : vector<2xf32>
    %31 = vector.multi_reduction <add>, %25, %cst_12 [1] : vector<2x8xf32> to vector<2xf32>
    %32 = vector.shape_cast %31 : vector<2xf32> to vector<2x1xf32>
    %33 = arith.truncf %24 : vector<16x32xf32> to vector<16x32xbf16>
    %c0_13 = arith.constant 0 : index
    %c0_14 = arith.constant 0 : index
    %c0_15 = arith.constant 0 : index
    %34 = vector.load %arg3[%c0_13, %c0_14, %c0_15] : memref<2x32x64xbf16, #tpu.memory_space<vmem>>, vector<1x32x64xbf16>
    %35 = vector.shape_cast %34 : vector<1x32x64xbf16> to vector<32x64xbf16>
    %cst_16 = arith.constant dense<0.000000e+00> : vector<16x64xf32>
    %36 = tpu.matmul %33, %35, %cst_16 {dimension_numbers = #tpu.dot_dimension_numbers<[1], [0], [0], [1], [0, 0, 1, 1], [], []>} : vector<16x32xbf16>, vector<32x64xbf16>, vector<16x64xf32> -> vector<16x64xf32>
    %c0_17 = arith.constant 0 : index
    %c0_18 = arith.constant 0 : index
    %c0_19 = arith.constant 0 : index
    %37 = vector.load %arg7[%c0_17, %c0_18, %c0_19] : memref<2x8x128xf32, #tpu.memory_space<vmem>>, vector<1x1x64xf32>
    %38 = vector.shape_cast %37 : vector<1x1x64xf32> to vector<1x64xf32>
    %39 = vector.broadcast %38 : vector<1x64xf32> to vector<16x64xf32>
    %40 = arith.addf %36, %39 : vector<16x64xf32>
    %41 = vector.extract_strided_slice %40 {offsets = [0, 0], sizes = [16, 8], strides = [1, 1]} : vector<16x64xf32> to vector<16x8xf32>
    %42 = vector.shape_cast %41 : vector<16x8xf32> to vector<2x8x8xf32>
    %43 = vector.extract_strided_slice %40 {offsets = [0, 32], sizes = [16, 8], strides = [1, 1]} : vector<16x64xf32> to vector<16x8xf32>
    %44 = vector.shape_cast %43 : vector<16x8xf32> to vector<2x8x8xf32>
    "tpu.trace_start"() <{level = 10 : i32, message = "bqd,bkd->bqk"}> : () -> ()
    %cst_20 = arith.constant dense<0.000000e+00> : vector<2x8x8xf32>
    %45 = tpu.matmul %42, %44, %cst_20 {dimension_numbers = #tpu.dot_dimension_numbers<[2], [2], [1], [1], [0, 0, 0, 1, 1, 1], [0], [0]>} : vector<2x8x8xf32>, vector<2x8x8xf32>, vector<2x8x8xf32> -> vector<2x8x8xf32>
    "tpu.trace_stop"() : () -> ()
    %46 = vector.broadcast %30 : vector<2x1x8xf32> to vector<2x8x8xf32>
    %47 = arith.addf %45, %46 : vector<2x8x8xf32>
    %cst_21 = arith.constant dense<0xFF800000> : vector<2x8xf32>
    %48 = vector.multi_reduction <maximumf>, %47, %cst_21 [2] : vector<2x8x8xf32> to vector<2x8xf32>
    %49 = vector.shape_cast %48 : vector<2x8xf32> to vector<2x8x1xf32>
    %50 = vector.broadcast %49 : vector<2x8x1xf32> to vector<2x8x8xf32>
    %51 = arith.subf %47, %50 : vector<2x8x8xf32>
    %52 = math.exp %51 : vector<2x8x8xf32>
    %cst_22 = arith.constant dense<0.000000e+00> : vector<2x8xf32>
    %53 = vector.multi_reduction <add>, %52, %cst_22 [2] : vector<2x8x8xf32> to vector<2x8xf32>
    %54 = vector.shape_cast %53 : vector<2x8xf32> to vector<2x8x1xf32>
    %55 = tpu.reciprocal %54 {approx = true} : vector<2x8x1xf32> -> vector<2x8x1xf32>
    %56 = vector.broadcast %55 : vector<2x8x1xf32> to vector<2x8x8xf32>
    %57 = arith.mulf %52, %56 : vector<2x8x8xf32>
    %c0_23 = arith.constant 0 : index
    %c0_24 = arith.constant 0 : index
    %c0_25 = arith.constant 0 : index
    %c0_26 = arith.constant 0 : index
    %58 = vector.load %arg4[%c0_23, %c0_24, %c0_25, %c0_26] : memref<2x4x32x32xbf16, #tpu.memory_space<vmem>>, vector<1x1x32x32xbf16>
    %59 = vector.shape_cast %58 : vector<1x1x32x32xbf16> to vector<32x32xbf16>
    %cst_27 = arith.constant dense<0.000000e+00> : vector<16x32xf32>
    %60 = tpu.matmul %33, %59, %cst_27 {dimension_numbers = #tpu.dot_dimension_numbers<[1], [0], [0], [1], [0, 0, 1, 1], [], []>} : vector<16x32xbf16>, vector<32x32xbf16>, vector<16x32xf32> -> vector<16x32xf32>
    %61 = vector.shape_cast %60 : vector<16x32xf32> to vector<2x8x32xf32>
    "tpu.trace_start"() <{level = 10 : i32, message = "bqk,bkd->bqd"}> : () -> ()
    %cst_28 = arith.constant dense<0.000000e+00> : vector<2x8x32xf32>
    %62 = tpu.matmul %57, %61, %cst_28 {dimension_numbers = #tpu.dot_dimension_numbers<[2], [1], [1], [2], [0, 0, 0, 1, 1, 2], [0], [0]>} : vector<2x8x8xf32>, vector<2x8x32xf32>, vector<2x8x32xf32> -> vector<2x8x32xf32>
    "tpu.trace_stop"() : () -> ()
    %63 = vector.extract_strided_slice %40 {offsets = [0, 8], sizes = [16, 8], strides = [1, 1]} : vector<16x64xf32> to vector<16x8xf32>
    %64 = vector.shape_cast %63 : vector<16x8xf32> to vector<2x8x8xf32>
    %65 = vector.extract_strided_slice %40 {offsets = [0, 40], sizes = [16, 8], strides = [1, 1]} : vector<16x64xf32> to vector<16x8xf32>
    %66 = vector.shape_cast %65 : vector<16x8xf32> to vector<2x8x8xf32>
    "tpu.trace_start"() <{level = 10 : i32, message = "bqd,bkd->bqk"}> : () -> ()
    %cst_29 = arith.constant dense<0.000000e+00> : vector<2x8x8xf32>
    %67 = tpu.matmul %64, %66, %cst_29 {dimension_numbers = #tpu.dot_dimension_numbers<[2], [2], [1], [1], [0, 0, 0, 1, 1, 1], [0], [0]>} : vector<2x8x8xf32>, vector<2x8x8xf32>, vector<2x8x8xf32> -> vector<2x8x8xf32>
    "tpu.trace_stop"() : () -> ()
    %68 = vector.broadcast %30 : vector<2x1x8xf32> to vector<2x8x8xf32>
    %69 = arith.addf %67, %68 : vector<2x8x8xf32>
    %cst_30 = arith.constant dense<0xFF800000> : vector<2x8xf32>
    %70 = vector.multi_reduction <maximumf>, %69, %cst_30 [2] : vector<2x8x8xf32> to vector<2x8xf32>
    %71 = vector.shape_cast %70 : vector<2x8xf32> to vector<2x8x1xf32>
    %72 = vector.broadcast %71 : vector<2x8x1xf32> to vector<2x8x8xf32>
    %73 = arith.subf %69, %72 : vector<2x8x8xf32>
    %74 = math.exp %73 : vector<2x8x8xf32>
    %cst_31 = arith.constant dense<0.000000e+00> : vector<2x8xf32>
    %75 = vector.multi_reduction <add>, %74, %cst_31 [2] : vector<2x8x8xf32> to vector<2x8xf32>
    %76 = vector.shape_cast %75 : vector<2x8xf32> to vector<2x8x1xf32>
    %77 = tpu.reciprocal %76 {approx = true} : vector<2x8x1xf32> -> vector<2x8x1xf32>
    %78 = vector.broadcast %77 : vector<2x8x1xf32> to vector<2x8x8xf32>
    %79 = arith.mulf %74, %78 : vector<2x8x8xf32>
    %c0_32 = arith.constant 0 : index
    %c1_33 = arith.constant 1 : index
    %c0_34 = arith.constant 0 : index
    %c0_35 = arith.constant 0 : index
    %80 = vector.load %arg4[%c0_32, %c1_33, %c0_34, %c0_35] : memref<2x4x32x32xbf16, #tpu.memory_space<vmem>>, vector<1x1x32x32xbf16>
    %81 = vector.shape_cast %80 : vector<1x1x32x32xbf16> to vector<32x32xbf16>
    %cst_36 = arith.constant dense<0.000000e+00> : vector<16x32xf32>
    %82 = tpu.matmul %33, %81, %cst_36 {dimension_numbers = #tpu.dot_dimension_numbers<[1], [0], [0], [1], [0, 0, 1, 1], [], []>} : vector<16x32xbf16>, vector<32x32xbf16>, vector<16x32xf32> -> vector<16x32xf32>
    %83 = vector.shape_cast %82 : vector<16x32xf32> to vector<2x8x32xf32>
    "tpu.trace_start"() <{level = 10 : i32, message = "bqk,bkd->bqd"}> : () -> ()
    %cst_37 = arith.constant dense<0.000000e+00> : vector<2x8x32xf32>
    %84 = tpu.matmul %79, %83, %cst_37 {dimension_numbers = #tpu.dot_dimension_numbers<[2], [1], [1], [2], [0, 0, 0, 1, 1, 2], [0], [0]>} : vector<2x8x8xf32>, vector<2x8x32xf32>, vector<2x8x32xf32> -> vector<2x8x32xf32>
    "tpu.trace_stop"() : () -> ()
    %85 = arith.addf %62, %84 : vector<2x8x32xf32>
    %86 = vector.extract_strided_slice %40 {offsets = [0, 16], sizes = [16, 8], strides = [1, 1]} : vector<16x64xf32> to vector<16x8xf32>
    %87 = vector.shape_cast %86 : vector<16x8xf32> to vector<2x8x8xf32>
    %88 = vector.extract_strided_slice %40 {offsets = [0, 48], sizes = [16, 8], strides = [1, 1]} : vector<16x64xf32> to vector<16x8xf32>
    %89 = vector.shape_cast %88 : vector<16x8xf32> to vector<2x8x8xf32>
    "tpu.trace_start"() <{level = 10 : i32, message = "bqd,bkd->bqk"}> : () -> ()
    %cst_38 = arith.constant dense<0.000000e+00> : vector<2x8x8xf32>
    %90 = tpu.matmul %87, %89, %cst_38 {dimension_numbers = #tpu.dot_dimension_numbers<[2], [2], [1], [1], [0, 0, 0, 1, 1, 1], [0], [0]>} : vector<2x8x8xf32>, vector<2x8x8xf32>, vector<2x8x8xf32> -> vector<2x8x8xf32>
    "tpu.trace_stop"() : () -> ()
    %91 = vector.broadcast %30 : vector<2x1x8xf32> to vector<2x8x8xf32>
    %92 = arith.addf %90, %91 : vector<2x8x8xf32>
    %cst_39 = arith.constant dense<0xFF800000> : vector<2x8xf32>
    %93 = vector.multi_reduction <maximumf>, %92, %cst_39 [2] : vector<2x8x8xf32> to vector<2x8xf32>
    %94 = vector.shape_cast %93 : vector<2x8xf32> to vector<2x8x1xf32>
    %95 = vector.broadcast %94 : vector<2x8x1xf32> to vector<2x8x8xf32>
    %96 = arith.subf %92, %95 : vector<2x8x8xf32>
    %97 = math.exp %96 : vector<2x8x8xf32>
    %cst_40 = arith.constant dense<0.000000e+00> : vector<2x8xf32>
    %98 = vector.multi_reduction <add>, %97, %cst_40 [2] : vector<2x8x8xf32> to vector<2x8xf32>
    %99 = vector.shape_cast %98 : vector<2x8xf32> to vector<2x8x1xf32>
    %100 = tpu.reciprocal %99 {approx = true} : vector<2x8x1xf32> -> vector<2x8x1xf32>
    %101 = vector.broadcast %100 : vector<2x8x1xf32> to vector<2x8x8xf32>
    %102 = arith.mulf %97, %101 : vector<2x8x8xf32>
    %c0_41 = arith.constant 0 : index
    %c2 = arith.constant 2 : index
    %c0_42 = arith.constant 0 : index
    %c0_43 = arith.constant 0 : index
    %103 = vector.load %arg4[%c0_41, %c2, %c0_42, %c0_43] : memref<2x4x32x32xbf16, #tpu.memory_space<vmem>>, vector<1x1x32x32xbf16>
    %104 = vector.shape_cast %103 : vector<1x1x32x32xbf16> to vector<32x32xbf16>
    %cst_44 = arith.constant dense<0.000000e+00> : vector<16x32xf32>
    %105 = tpu.matmul %33, %104, %cst_44 {dimension_numbers = #tpu.dot_dimension_numbers<[1], [0], [0], [1], [0, 0, 1, 1], [], []>} : vector<16x32xbf16>, vector<32x32xbf16>, vector<16x32xf32> -> vector<16x32xf32>
    %106 = vector.shape_cast %105 : vector<16x32xf32> to vector<2x8x32xf32>
    "tpu.trace_start"() <{level = 10 : i32, message = "bqk,bkd->bqd"}> : () -> ()
    %cst_45 = arith.constant dense<0.000000e+00> : vector<2x8x32xf32>
    %107 = tpu.matmul %102, %106, %cst_45 {dimension_numbers = #tpu.dot_dimension_numbers<[2], [1], [1], [2], [0, 0, 0, 1, 1, 2], [0], [0]>} : vector<2x8x8xf32>, vector<2x8x32xf32>, vector<2x8x32xf32> -> vector<2x8x32xf32>
    "tpu.trace_stop"() : () -> ()
    %108 = arith.addf %85, %107 : vector<2x8x32xf32>
    %109 = vector.extract_strided_slice %40 {offsets = [0, 24], sizes = [16, 8], strides = [1, 1]} : vector<16x64xf32> to vector<16x8xf32>
    %110 = vector.shape_cast %109 : vector<16x8xf32> to vector<2x8x8xf32>
    %111 = vector.extract_strided_slice %40 {offsets = [0, 56], sizes = [16, 8], strides = [1, 1]} : vector<16x64xf32> to vector<16x8xf32>
    %112 = vector.shape_cast %111 : vector<16x8xf32> to vector<2x8x8xf32>
    "tpu.trace_start"() <{level = 10 : i32, message = "bqd,bkd->bqk"}> : () -> ()
    %cst_46 = arith.constant dense<0.000000e+00> : vector<2x8x8xf32>
    %113 = tpu.matmul %110, %112, %cst_46 {dimension_numbers = #tpu.dot_dimension_numbers<[2], [2], [1], [1], [0, 0, 0, 1, 1, 1], [0], [0]>} : vector<2x8x8xf32>, vector<2x8x8xf32>, vector<2x8x8xf32> -> vector<2x8x8xf32>
    "tpu.trace_stop"() : () -> ()
    %114 = vector.broadcast %30 : vector<2x1x8xf32> to vector<2x8x8xf32>
    %115 = arith.addf %113, %114 : vector<2x8x8xf32>
    %cst_47 = arith.constant dense<0xFF800000> : vector<2x8xf32>
    %116 = vector.multi_reduction <maximumf>, %115, %cst_47 [2] : vector<2x8x8xf32> to vector<2x8xf32>
    %117 = vector.shape_cast %116 : vector<2x8xf32> to vector<2x8x1xf32>
    %118 = vector.broadcast %117 : vector<2x8x1xf32> to vector<2x8x8xf32>
    %119 = arith.subf %115, %118 : vector<2x8x8xf32>
    %120 = math.exp %119 : vector<2x8x8xf32>
    %cst_48 = arith.constant dense<0.000000e+00> : vector<2x8xf32>
    %121 = vector.multi_reduction <add>, %120, %cst_48 [2] : vector<2x8x8xf32> to vector<2x8xf32>
    %122 = vector.shape_cast %121 : vector<2x8xf32> to vector<2x8x1xf32>
    %123 = tpu.reciprocal %122 {approx = true} : vector<2x8x1xf32> -> vector<2x8x1xf32>
    %124 = vector.broadcast %123 : vector<2x8x1xf32> to vector<2x8x8xf32>
    %125 = arith.mulf %120, %124 : vector<2x8x8xf32>
    %c0_49 = arith.constant 0 : index
    %c3 = arith.constant 3 : index
    %c0_50 = arith.constant 0 : index
    %c0_51 = arith.constant 0 : index
    %126 = vector.load %arg4[%c0_49, %c3, %c0_50, %c0_51] : memref<2x4x32x32xbf16, #tpu.memory_space<vmem>>, vector<1x1x32x32xbf16>
    %127 = vector.shape_cast %126 : vector<1x1x32x32xbf16> to vector<32x32xbf16>
    %cst_52 = arith.constant dense<0.000000e+00> : vector<16x32xf32>
    %128 = tpu.matmul %33, %127, %cst_52 {dimension_numbers = #tpu.dot_dimension_numbers<[1], [0], [0], [1], [0, 0, 1, 1], [], []>} : vector<16x32xbf16>, vector<32x32xbf16>, vector<16x32xf32> -> vector<16x32xf32>
    %129 = vector.shape_cast %128 : vector<16x32xf32> to vector<2x8x32xf32>
    "tpu.trace_start"() <{level = 10 : i32, message = "bqk,bkd->bqd"}> : () -> ()
    %cst_53 = arith.constant dense<0.000000e+00> : vector<2x8x32xf32>
    %130 = tpu.matmul %125, %129, %cst_53 {dimension_numbers = #tpu.dot_dimension_numbers<[2], [1], [1], [2], [0, 0, 0, 1, 1, 2], [0], [0]>} : vector<2x8x8xf32>, vector<2x8x32xf32>, vector<2x8x32xf32> -> vector<2x8x32xf32>
    "tpu.trace_stop"() : () -> ()
    %131 = arith.addf %108, %130 : vector<2x8x32xf32>
    %132 = vector.shape_cast %131 : vector<2x8x32xf32> to vector<16x32xf32>
    %c0_54 = arith.constant 0 : index
    %c1_55 = arith.constant 1 : index
    %c0_56 = arith.constant 0 : index
    %133 = vector.load %arg7[%c0_54, %c1_55, %c0_56] : memref<2x8x128xf32, #tpu.memory_space<vmem>>, vector<1x1x32xf32>
    %134 = vector.shape_cast %133 : vector<1x1x32xf32> to vector<1x32xf32>
    %135 = vector.broadcast %134 : vector<1x32xf32> to vector<16x32xf32>
    %136 = arith.addf %132, %135 : vector<16x32xf32>
    %137 = arith.addf %136, %24 : vector<16x32xf32>
    %c0_57 = arith.constant 0 : index
    %c2_58 = arith.constant 2 : index
    %c0_59 = arith.constant 0 : index
    %138 = vector.load %arg7[%c0_57, %c2_58, %c0_59] : memref<2x8x128xf32, #tpu.memory_space<vmem>>, vector<1x1x32xf32>
    %139 = vector.shape_cast %138 : vector<1x1x32xf32> to vector<1x32xf32>
    %c0_60 = arith.constant 0 : index
    %c3_61 = arith.constant 3 : index
    %c0_62 = arith.constant 0 : index
    %140 = vector.load %arg7[%c0_60, %c3_61, %c0_62] : memref<2x8x128xf32, #tpu.memory_space<vmem>>, vector<1x1x32xf32>
    %141 = vector.shape_cast %140 : vector<1x1x32xf32> to vector<1x32xf32>
    %cst_63 = arith.constant dense<0.000000e+00> : vector<16xf32>
    %142 = vector.multi_reduction <add>, %137, %cst_63 [1] : vector<16x32xf32> to vector<16xf32>
    %143 = vector.shape_cast %142 : vector<16xf32> to vector<16x1xf32>
    %cst_64 = arith.constant 3.200000e+01 : f32
    %144 = vector.broadcast %cst_64 : f32 to vector<16x1xf32>
    %145 = arith.divf %143, %144 : vector<16x1xf32>
    %146 = vector.broadcast %145 : vector<16x1xf32> to vector<16x32xf32>
    %147 = arith.subf %137, %146 : vector<16x32xf32>
    %148 = arith.mulf %147, %147 : vector<16x32xf32>
    %cst_65 = arith.constant dense<0.000000e+00> : vector<16xf32>
    %149 = vector.multi_reduction <add>, %148, %cst_65 [1] : vector<16x32xf32> to vector<16xf32>
    %150 = vector.shape_cast %149 : vector<16xf32> to vector<16x1xf32>
    %cst_66 = arith.constant 3.200000e+01 : f32
    %151 = vector.broadcast %cst_66 : f32 to vector<16x1xf32>
    %152 = arith.divf %150, %151 : vector<16x1xf32>
    %153 = vector.broadcast %145 : vector<16x1xf32> to vector<16x32xf32>
    %154 = arith.subf %137, %153 : vector<16x32xf32>
    %cst_67 = arith.constant 9.99999996E-13 : f32
    %155 = vector.broadcast %cst_67 : f32 to vector<16x1xf32>
    %156 = arith.addf %152, %155 : vector<16x1xf32>
    %157 = math.rsqrt %156 : vector<16x1xf32>
    %158 = vector.broadcast %157 : vector<16x1xf32> to vector<16x32xf32>
    %159 = arith.mulf %154, %158 : vector<16x32xf32>
    %160 = vector.broadcast %139 : vector<1x32xf32> to vector<16x32xf32>
    %161 = arith.mulf %159, %160 : vector<16x32xf32>
    %162 = vector.broadcast %141 : vector<1x32xf32> to vector<16x32xf32>
    %163 = arith.addf %161, %162 : vector<16x32xf32>
    %164 = arith.truncf %163 : vector<16x32xf32> to vector<16x32xbf16>
    %c0_68 = arith.constant 0 : index
    %c0_69 = arith.constant 0 : index
    %c0_70 = arith.constant 0 : index
    %165 = vector.load %arg5[%c0_68, %c0_69, %c0_70] : memref<2x32x64xbf16, #tpu.memory_space<vmem>>, vector<1x32x64xbf16>
    %166 = vector.shape_cast %165 : vector<1x32x64xbf16> to vector<32x64xbf16>
    %cst_71 = arith.constant dense<0.000000e+00> : vector<16x64xf32>
    %167 = tpu.matmul %164, %166, %cst_71 {dimension_numbers = #tpu.dot_dimension_numbers<[1], [0], [0], [1], [0, 0, 1, 1], [], []>} : vector<16x32xbf16>, vector<32x64xbf16>, vector<16x64xf32> -> vector<16x64xf32>
    %c0_72 = arith.constant 0 : index
    %c4 = arith.constant 4 : index
    %c0_73 = arith.constant 0 : index
    %168 = vector.load %arg7[%c0_72, %c4, %c0_73] : memref<2x8x128xf32, #tpu.memory_space<vmem>>, vector<1x1x64xf32>
    %169 = vector.shape_cast %168 : vector<1x1x64xf32> to vector<1x64xf32>
    %170 = vector.broadcast %169 : vector<1x64xf32> to vector<16x64xf32>
    %171 = arith.addf %167, %170 : vector<16x64xf32>
    %cst_74 = arith.constant 5.000000e-01 : f32
    %172 = vector.broadcast %cst_74 : f32 to vector<16x64xf32>
    %173 = arith.mulf %172, %171 : vector<16x64xf32>
    %cst_75 = arith.constant 4.471500e-02 : f32
    %174 = vector.broadcast %cst_75 : f32 to vector<16x64xf32>
    %175 = arith.mulf %174, %171 : vector<16x64xf32>
    %176 = arith.mulf %175, %171 : vector<16x64xf32>
    %177 = arith.mulf %176, %171 : vector<16x64xf32>
    %178 = arith.addf %171, %177 : vector<16x64xf32>
    %cst_76 = arith.constant 0.797884583 : f32
    %179 = vector.broadcast %cst_76 : f32 to vector<16x64xf32>
    %180 = arith.mulf %179, %178 : vector<16x64xf32>
    %181 = math.tanh %180 : vector<16x64xf32>
    %cst_77 = arith.constant 1.000000e+00 : f32
    %182 = vector.broadcast %cst_77 : f32 to vector<16x64xf32>
    %183 = arith.addf %182, %181 : vector<16x64xf32>
    %184 = arith.mulf %173, %183 : vector<16x64xf32>
    %185 = arith.truncf %184 : vector<16x64xf32> to vector<16x64xbf16>
    %c0_78 = arith.constant 0 : index
    %c0_79 = arith.constant 0 : index
    %c0_80 = arith.constant 0 : index
    %186 = vector.load %arg6[%c0_78, %c0_79, %c0_80] : memref<2x64x32xbf16, #tpu.memory_space<vmem>>, vector<1x64x32xbf16>
    %187 = vector.shape_cast %186 : vector<1x64x32xbf16> to vector<64x32xbf16>
    %cst_81 = arith.constant dense<0.000000e+00> : vector<16x32xf32>
    %188 = tpu.matmul %185, %187, %cst_81 {dimension_numbers = #tpu.dot_dimension_numbers<[1], [0], [0], [1], [0, 0, 1, 1], [], []>} : vector<16x64xbf16>, vector<64x32xbf16>, vector<16x32xf32> -> vector<16x32xf32>
    %c0_82 = arith.constant 0 : index
    %c5 = arith.constant 5 : index
    %c0_83 = arith.constant 0 : index
    %189 = vector.load %arg7[%c0_82, %c5, %c0_83] : memref<2x8x128xf32, #tpu.memory_space<vmem>>, vector<1x1x32xf32>
    %190 = vector.shape_cast %189 : vector<1x1x32xf32> to vector<1x32xf32>
    %191 = vector.broadcast %190 : vector<1x32xf32> to vector<16x32xf32>
    %192 = arith.addf %188, %191 : vector<16x32xf32>
    %193 = arith.addf %192, %163 : vector<16x32xf32>
    %c0_84 = arith.constant 0 : index
    %c6 = arith.constant 6 : index
    %c0_85 = arith.constant 0 : index
    %194 = vector.load %arg7[%c0_84, %c6, %c0_85] : memref<2x8x128xf32, #tpu.memory_space<vmem>>, vector<1x1x32xf32>
    %195 = vector.shape_cast %194 : vector<1x1x32xf32> to vector<1x32xf32>
    %c0_86 = arith.constant 0 : index
    %c7 = arith.constant 7 : index
    %c0_87 = arith.constant 0 : index
    %196 = vector.load %arg7[%c0_86, %c7, %c0_87] : memref<2x8x128xf32, #tpu.memory_space<vmem>>, vector<1x1x32xf32>
    %197 = vector.shape_cast %196 : vector<1x1x32xf32> to vector<1x32xf32>
    %cst_88 = arith.constant dense<0.000000e+00> : vector<16xf32>
    %198 = vector.multi_reduction <add>, %193, %cst_88 [1] : vector<16x32xf32> to vector<16xf32>
    %199 = vector.shape_cast %198 : vector<16xf32> to vector<16x1xf32>
    %cst_89 = arith.constant 3.200000e+01 : f32
    %200 = vector.broadcast %cst_89 : f32 to vector<16x1xf32>
    %201 = arith.divf %199, %200 : vector<16x1xf32>
    %202 = vector.broadcast %201 : vector<16x1xf32> to vector<16x32xf32>
    %203 = arith.subf %193, %202 : vector<16x32xf32>
    %204 = arith.mulf %203, %203 : vector<16x32xf32>
    %cst_90 = arith.constant dense<0.000000e+00> : vector<16xf32>
    %205 = vector.multi_reduction <add>, %204, %cst_90 [1] : vector<16x32xf32> to vector<16xf32>
    %206 = vector.shape_cast %205 : vector<16xf32> to vector<16x1xf32>
    %cst_91 = arith.constant 3.200000e+01 : f32
    %207 = vector.broadcast %cst_91 : f32 to vector<16x1xf32>
    %208 = arith.divf %206, %207 : vector<16x1xf32>
    %209 = vector.broadcast %201 : vector<16x1xf32> to vector<16x32xf32>
    %210 = arith.subf %193, %209 : vector<16x32xf32>
    %cst_92 = arith.constant 9.99999996E-13 : f32
    %211 = vector.broadcast %cst_92 : f32 to vector<16x1xf32>
    %212 = arith.addf %208, %211 : vector<16x1xf32>
    %213 = math.rsqrt %212 : vector<16x1xf32>
    %214 = vector.broadcast %213 : vector<16x1xf32> to vector<16x32xf32>
    %215 = arith.mulf %210, %214 : vector<16x32xf32>
    %216 = vector.broadcast %195 : vector<1x32xf32> to vector<16x32xf32>
    %217 = arith.mulf %215, %216 : vector<16x32xf32>
    %218 = vector.broadcast %197 : vector<1x32xf32> to vector<16x32xf32>
    %219 = arith.addf %217, %218 : vector<16x32xf32>
    %220 = arith.truncf %219 : vector<16x32xf32> to vector<16x32xbf16>
    %c1_93 = arith.constant 1 : index
    %c0_94 = arith.constant 0 : index
    %c0_95 = arith.constant 0 : index
    %221 = vector.load %arg3[%c1_93, %c0_94, %c0_95] : memref<2x32x64xbf16, #tpu.memory_space<vmem>>, vector<1x32x64xbf16>
    %222 = vector.shape_cast %221 : vector<1x32x64xbf16> to vector<32x64xbf16>
    %cst_96 = arith.constant dense<0.000000e+00> : vector<16x64xf32>
    %223 = tpu.matmul %220, %222, %cst_96 {dimension_numbers = #tpu.dot_dimension_numbers<[1], [0], [0], [1], [0, 0, 1, 1], [], []>} : vector<16x32xbf16>, vector<32x64xbf16>, vector<16x64xf32> -> vector<16x64xf32>
    %c1_97 = arith.constant 1 : index
    %c0_98 = arith.constant 0 : index
    %c0_99 = arith.constant 0 : index
    %224 = vector.load %arg7[%c1_97, %c0_98, %c0_99] : memref<2x8x128xf32, #tpu.memory_space<vmem>>, vector<1x1x64xf32>
    %225 = vector.shape_cast %224 : vector<1x1x64xf32> to vector<1x64xf32>
    %226 = vector.broadcast %225 : vector<1x64xf32> to vector<16x64xf32>
    %227 = arith.addf %223, %226 : vector<16x64xf32>
    %228 = vector.extract_strided_slice %227 {offsets = [0, 0], sizes = [16, 8], strides = [1, 1]} : vector<16x64xf32> to vector<16x8xf32>
    %229 = vector.shape_cast %228 : vector<16x8xf32> to vector<2x8x8xf32>
    %230 = vector.extract_strided_slice %227 {offsets = [0, 32], sizes = [16, 8], strides = [1, 1]} : vector<16x64xf32> to vector<16x8xf32>
    %231 = vector.shape_cast %230 : vector<16x8xf32> to vector<2x8x8xf32>
    "tpu.trace_start"() <{level = 10 : i32, message = "bqd,bkd->bqk"}> : () -> ()
    %cst_100 = arith.constant dense<0.000000e+00> : vector<2x8x8xf32>
    %232 = tpu.matmul %229, %231, %cst_100 {dimension_numbers = #tpu.dot_dimension_numbers<[2], [2], [1], [1], [0, 0, 0, 1, 1, 1], [0], [0]>} : vector<2x8x8xf32>, vector<2x8x8xf32>, vector<2x8x8xf32> -> vector<2x8x8xf32>
    "tpu.trace_stop"() : () -> ()
    %233 = vector.broadcast %30 : vector<2x1x8xf32> to vector<2x8x8xf32>
    %234 = arith.addf %232, %233 : vector<2x8x8xf32>
    %cst_101 = arith.constant dense<0xFF800000> : vector<2x8xf32>
    %235 = vector.multi_reduction <maximumf>, %234, %cst_101 [2] : vector<2x8x8xf32> to vector<2x8xf32>
    %236 = vector.shape_cast %235 : vector<2x8xf32> to vector<2x8x1xf32>
    %237 = vector.broadcast %236 : vector<2x8x1xf32> to vector<2x8x8xf32>
    %238 = arith.subf %234, %237 : vector<2x8x8xf32>
    %239 = math.exp %238 : vector<2x8x8xf32>
    %cst_102 = arith.constant dense<0.000000e+00> : vector<2x8xf32>
    %240 = vector.multi_reduction <add>, %239, %cst_102 [2] : vector<2x8x8xf32> to vector<2x8xf32>
    %241 = vector.shape_cast %240 : vector<2x8xf32> to vector<2x8x1xf32>
    %242 = tpu.reciprocal %241 {approx = true} : vector<2x8x1xf32> -> vector<2x8x1xf32>
    %243 = vector.broadcast %242 : vector<2x8x1xf32> to vector<2x8x8xf32>
    %244 = arith.mulf %239, %243 : vector<2x8x8xf32>
    %c1_103 = arith.constant 1 : index
    %c0_104 = arith.constant 0 : index
    %c0_105 = arith.constant 0 : index
    %c0_106 = arith.constant 0 : index
    %245 = vector.load %arg4[%c1_103, %c0_104, %c0_105, %c0_106] : memref<2x4x32x32xbf16, #tpu.memory_space<vmem>>, vector<1x1x32x32xbf16>
    %246 = vector.shape_cast %245 : vector<1x1x32x32xbf16> to vector<32x32xbf16>
    %cst_107 = arith.constant dense<0.000000e+00> : vector<16x32xf32>
    %247 = tpu.matmul %220, %246, %cst_107 {dimension_numbers = #tpu.dot_dimension_numbers<[1], [0], [0], [1], [0, 0, 1, 1], [], []>} : vector<16x32xbf16>, vector<32x32xbf16>, vector<16x32xf32> -> vector<16x32xf32>
    %248 = vector.shape_cast %247 : vector<16x32xf32> to vector<2x8x32xf32>
    "tpu.trace_start"() <{level = 10 : i32, message = "bqk,bkd->bqd"}> : () -> ()
    %cst_108 = arith.constant dense<0.000000e+00> : vector<2x8x32xf32>
    %249 = tpu.matmul %244, %248, %cst_108 {dimension_numbers = #tpu.dot_dimension_numbers<[2], [1], [1], [2], [0, 0, 0, 1, 1, 2], [0], [0]>} : vector<2x8x8xf32>, vector<2x8x32xf32>, vector<2x8x32xf32> -> vector<2x8x32xf32>
    "tpu.trace_stop"() : () -> ()
    %250 = vector.extract_strided_slice %227 {offsets = [0, 8], sizes = [16, 8], strides = [1, 1]} : vector<16x64xf32> to vector<16x8xf32>
    %251 = vector.shape_cast %250 : vector<16x8xf32> to vector<2x8x8xf32>
    %252 = vector.extract_strided_slice %227 {offsets = [0, 40], sizes = [16, 8], strides = [1, 1]} : vector<16x64xf32> to vector<16x8xf32>
    %253 = vector.shape_cast %252 : vector<16x8xf32> to vector<2x8x8xf32>
    "tpu.trace_start"() <{level = 10 : i32, message = "bqd,bkd->bqk"}> : () -> ()
    %cst_109 = arith.constant dense<0.000000e+00> : vector<2x8x8xf32>
    %254 = tpu.matmul %251, %253, %cst_109 {dimension_numbers = #tpu.dot_dimension_numbers<[2], [2], [1], [1], [0, 0, 0, 1, 1, 1], [0], [0]>} : vector<2x8x8xf32>, vector<2x8x8xf32>, vector<2x8x8xf32> -> vector<2x8x8xf32>
    "tpu.trace_stop"() : () -> ()
    %255 = vector.broadcast %30 : vector<2x1x8xf32> to vector<2x8x8xf32>
    %256 = arith.addf %254, %255 : vector<2x8x8xf32>
    %cst_110 = arith.constant dense<0xFF800000> : vector<2x8xf32>
    %257 = vector.multi_reduction <maximumf>, %256, %cst_110 [2] : vector<2x8x8xf32> to vector<2x8xf32>
    %258 = vector.shape_cast %257 : vector<2x8xf32> to vector<2x8x1xf32>
    %259 = vector.broadcast %258 : vector<2x8x1xf32> to vector<2x8x8xf32>
    %260 = arith.subf %256, %259 : vector<2x8x8xf32>
    %261 = math.exp %260 : vector<2x8x8xf32>
    %cst_111 = arith.constant dense<0.000000e+00> : vector<2x8xf32>
    %262 = vector.multi_reduction <add>, %261, %cst_111 [2] : vector<2x8x8xf32> to vector<2x8xf32>
    %263 = vector.shape_cast %262 : vector<2x8xf32> to vector<2x8x1xf32>
    %264 = tpu.reciprocal %263 {approx = true} : vector<2x8x1xf32> -> vector<2x8x1xf32>
    %265 = vector.broadcast %264 : vector<2x8x1xf32> to vector<2x8x8xf32>
    %266 = arith.mulf %261, %265 : vector<2x8x8xf32>
    %c1_112 = arith.constant 1 : index
    %c1_113 = arith.constant 1 : index
    %c0_114 = arith.constant 0 : index
    %c0_115 = arith.constant 0 : index
    %267 = vector.load %arg4[%c1_112, %c1_113, %c0_114, %c0_115] : memref<2x4x32x32xbf16, #tpu.memory_space<vmem>>, vector<1x1x32x32xbf16>
    %268 = vector.shape_cast %267 : vector<1x1x32x32xbf16> to vector<32x32xbf16>
    %cst_116 = arith.constant dense<0.000000e+00> : vector<16x32xf32>
    %269 = tpu.matmul %220, %268, %cst_116 {dimension_numbers = #tpu.dot_dimension_numbers<[1], [0], [0], [1], [0, 0, 1, 1], [], []>} : vector<16x32xbf16>, vector<32x32xbf16>, vector<16x32xf32> -> vector<16x32xf32>
    %270 = vector.shape_cast %269 : vector<16x32xf32> to vector<2x8x32xf32>
    "tpu.trace_start"() <{level = 10 : i32, message = "bqk,bkd->bqd"}> : () -> ()
    %cst_117 = arith.constant dense<0.000000e+00> : vector<2x8x32xf32>
    %271 = tpu.matmul %266, %270, %cst_117 {dimension_numbers = #tpu.dot_dimension_numbers<[2], [1], [1], [2], [0, 0, 0, 1, 1, 2], [0], [0]>} : vector<2x8x8xf32>, vector<2x8x32xf32>, vector<2x8x32xf32> -> vector<2x8x32xf32>
    "tpu.trace_stop"() : () -> ()
    %272 = arith.addf %249, %271 : vector<2x8x32xf32>
    %273 = vector.extract_strided_slice %227 {offsets = [0, 16], sizes = [16, 8], strides = [1, 1]} : vector<16x64xf32> to vector<16x8xf32>
    %274 = vector.shape_cast %273 : vector<16x8xf32> to vector<2x8x8xf32>
    %275 = vector.extract_strided_slice %227 {offsets = [0, 48], sizes = [16, 8], strides = [1, 1]} : vector<16x64xf32> to vector<16x8xf32>
    %276 = vector.shape_cast %275 : vector<16x8xf32> to vector<2x8x8xf32>
    "tpu.trace_start"() <{level = 10 : i32, message = "bqd,bkd->bqk"}> : () -> ()
    %cst_118 = arith.constant dense<0.000000e+00> : vector<2x8x8xf32>
    %277 = tpu.matmul %274, %276, %cst_118 {dimension_numbers = #tpu.dot_dimension_numbers<[2], [2], [1], [1], [0, 0, 0, 1, 1, 1], [0], [0]>} : vector<2x8x8xf32>, vector<2x8x8xf32>, vector<2x8x8xf32> -> vector<2x8x8xf32>
    "tpu.trace_stop"() : () -> ()
    %278 = vector.broadcast %30 : vector<2x1x8xf32> to vector<2x8x8xf32>
    %279 = arith.addf %277, %278 : vector<2x8x8xf32>
    %cst_119 = arith.constant dense<0xFF800000> : vector<2x8xf32>
    %280 = vector.multi_reduction <maximumf>, %279, %cst_119 [2] : vector<2x8x8xf32> to vector<2x8xf32>
    %281 = vector.shape_cast %280 : vector<2x8xf32> to vector<2x8x1xf32>
    %282 = vector.broadcast %281 : vector<2x8x1xf32> to vector<2x8x8xf32>
    %283 = arith.subf %279, %282 : vector<2x8x8xf32>
    %284 = math.exp %283 : vector<2x8x8xf32>
    %cst_120 = arith.constant dense<0.000000e+00> : vector<2x8xf32>
    %285 = vector.multi_reduction <add>, %284, %cst_120 [2] : vector<2x8x8xf32> to vector<2x8xf32>
    %286 = vector.shape_cast %285 : vector<2x8xf32> to vector<2x8x1xf32>
    %287 = tpu.reciprocal %286 {approx = true} : vector<2x8x1xf32> -> vector<2x8x1xf32>
    %288 = vector.broadcast %287 : vector<2x8x1xf32> to vector<2x8x8xf32>
    %289 = arith.mulf %284, %288 : vector<2x8x8xf32>
    %c1_121 = arith.constant 1 : index
    %c2_122 = arith.constant 2 : index
    %c0_123 = arith.constant 0 : index
    %c0_124 = arith.constant 0 : index
    %290 = vector.load %arg4[%c1_121, %c2_122, %c0_123, %c0_124] : memref<2x4x32x32xbf16, #tpu.memory_space<vmem>>, vector<1x1x32x32xbf16>
    %291 = vector.shape_cast %290 : vector<1x1x32x32xbf16> to vector<32x32xbf16>
    %cst_125 = arith.constant dense<0.000000e+00> : vector<16x32xf32>
    %292 = tpu.matmul %220, %291, %cst_125 {dimension_numbers = #tpu.dot_dimension_numbers<[1], [0], [0], [1], [0, 0, 1, 1], [], []>} : vector<16x32xbf16>, vector<32x32xbf16>, vector<16x32xf32> -> vector<16x32xf32>
    %293 = vector.shape_cast %292 : vector<16x32xf32> to vector<2x8x32xf32>
    "tpu.trace_start"() <{level = 10 : i32, message = "bqk,bkd->bqd"}> : () -> ()
    %cst_126 = arith.constant dense<0.000000e+00> : vector<2x8x32xf32>
    %294 = tpu.matmul %289, %293, %cst_126 {dimension_numbers = #tpu.dot_dimension_numbers<[2], [1], [1], [2], [0, 0, 0, 1, 1, 2], [0], [0]>} : vector<2x8x8xf32>, vector<2x8x32xf32>, vector<2x8x32xf32> -> vector<2x8x32xf32>
    "tpu.trace_stop"() : () -> ()
    %295 = arith.addf %272, %294 : vector<2x8x32xf32>
    %296 = vector.extract_strided_slice %227 {offsets = [0, 24], sizes = [16, 8], strides = [1, 1]} : vector<16x64xf32> to vector<16x8xf32>
    %297 = vector.shape_cast %296 : vector<16x8xf32> to vector<2x8x8xf32>
    %298 = vector.extract_strided_slice %227 {offsets = [0, 56], sizes = [16, 8], strides = [1, 1]} : vector<16x64xf32> to vector<16x8xf32>
    %299 = vector.shape_cast %298 : vector<16x8xf32> to vector<2x8x8xf32>
    "tpu.trace_start"() <{level = 10 : i32, message = "bqd,bkd->bqk"}> : () -> ()
    %cst_127 = arith.constant dense<0.000000e+00> : vector<2x8x8xf32>
    %300 = tpu.matmul %297, %299, %cst_127 {dimension_numbers = #tpu.dot_dimension_numbers<[2], [2], [1], [1], [0, 0, 0, 1, 1, 1], [0], [0]>} : vector<2x8x8xf32>, vector<2x8x8xf32>, vector<2x8x8xf32> -> vector<2x8x8xf32>
    "tpu.trace_stop"() : () -> ()
    %301 = vector.broadcast %30 : vector<2x1x8xf32> to vector<2x8x8xf32>
    %302 = arith.addf %300, %301 : vector<2x8x8xf32>
    %cst_128 = arith.constant dense<0xFF800000> : vector<2x8xf32>
    %303 = vector.multi_reduction <maximumf>, %302, %cst_128 [2] : vector<2x8x8xf32> to vector<2x8xf32>
    %304 = vector.shape_cast %303 : vector<2x8xf32> to vector<2x8x1xf32>
    %305 = vector.broadcast %304 : vector<2x8x1xf32> to vector<2x8x8xf32>
    %306 = arith.subf %302, %305 : vector<2x8x8xf32>
    %307 = math.exp %306 : vector<2x8x8xf32>
    %cst_129 = arith.constant dense<0.000000e+00> : vector<2x8xf32>
    %308 = vector.multi_reduction <add>, %307, %cst_129 [2] : vector<2x8x8xf32> to vector<2x8xf32>
    %309 = vector.shape_cast %308 : vector<2x8xf32> to vector<2x8x1xf32>
    %310 = tpu.reciprocal %309 {approx = true} : vector<2x8x1xf32> -> vector<2x8x1xf32>
    %311 = vector.broadcast %310 : vector<2x8x1xf32> to vector<2x8x8xf32>
    %312 = arith.mulf %307, %311 : vector<2x8x8xf32>
    %c1_130 = arith.constant 1 : index
    %c3_131 = arith.constant 3 : index
    %c0_132 = arith.constant 0 : index
    %c0_133 = arith.constant 0 : index
    %313 = vector.load %arg4[%c1_130, %c3_131, %c0_132, %c0_133] : memref<2x4x32x32xbf16, #tpu.memory_space<vmem>>, vector<1x1x32x32xbf16>
    %314 = vector.shape_cast %313 : vector<1x1x32x32xbf16> to vector<32x32xbf16>
    %cst_134 = arith.constant dense<0.000000e+00> : vector<16x32xf32>
    %315 = tpu.matmul %220, %314, %cst_134 {dimension_numbers = #tpu.dot_dimension_numbers<[1], [0], [0], [1], [0, 0, 1, 1], [], []>} : vector<16x32xbf16>, vector<32x32xbf16>, vector<16x32xf32> -> vector<16x32xf32>
    %316 = vector.shape_cast %315 : vector<16x32xf32> to vector<2x8x32xf32>
    "tpu.trace_start"() <{level = 10 : i32, message = "bqk,bkd->bqd"}> : () -> ()
    %cst_135 = arith.constant dense<0.000000e+00> : vector<2x8x32xf32>
    %317 = tpu.matmul %312, %316, %cst_135 {dimension_numbers = #tpu.dot_dimension_numbers<[2], [1], [1], [2], [0, 0, 0, 1, 1, 2], [0], [0]>} : vector<2x8x8xf32>, vector<2x8x32xf32>, vector<2x8x32xf32> -> vector<2x8x32xf32>
    "tpu.trace_stop"() : () -> ()
    %318 = arith.addf %295, %317 : vector<2x8x32xf32>
    %319 = vector.shape_cast %318 : vector<2x8x32xf32> to vector<16x32xf32>
    %c1_136 = arith.constant 1 : index
    %c1_137 = arith.constant 1 : index
    %c0_138 = arith.constant 0 : index
    %320 = vector.load %arg7[%c1_136, %c1_137, %c0_138] : memref<2x8x128xf32, #tpu.memory_space<vmem>>, vector<1x1x32xf32>
    %321 = vector.shape_cast %320 : vector<1x1x32xf32> to vector<1x32xf32>
    %322 = vector.broadcast %321 : vector<1x32xf32> to vector<16x32xf32>
    %323 = arith.addf %319, %322 : vector<16x32xf32>
    %324 = arith.addf %323, %219 : vector<16x32xf32>
    %c1_139 = arith.constant 1 : index
    %c2_140 = arith.constant 2 : index
    %c0_141 = arith.constant 0 : index
    %325 = vector.load %arg7[%c1_139, %c2_140, %c0_141] : memref<2x8x128xf32, #tpu.memory_space<vmem>>, vector<1x1x32xf32>
    %326 = vector.shape_cast %325 : vector<1x1x32xf32> to vector<1x32xf32>
    %c1_142 = arith.constant 1 : index
    %c3_143 = arith.constant 3 : index
    %c0_144 = arith.constant 0 : index
    %327 = vector.load %arg7[%c1_142, %c3_143, %c0_144] : memref<2x8x128xf32, #tpu.memory_space<vmem>>, vector<1x1x32xf32>
    %328 = vector.shape_cast %327 : vector<1x1x32xf32> to vector<1x32xf32>
    %cst_145 = arith.constant dense<0.000000e+00> : vector<16xf32>
    %329 = vector.multi_reduction <add>, %324, %cst_145 [1] : vector<16x32xf32> to vector<16xf32>
    %330 = vector.shape_cast %329 : vector<16xf32> to vector<16x1xf32>
    %cst_146 = arith.constant 3.200000e+01 : f32
    %331 = vector.broadcast %cst_146 : f32 to vector<16x1xf32>
    %332 = arith.divf %330, %331 : vector<16x1xf32>
    %333 = vector.broadcast %332 : vector<16x1xf32> to vector<16x32xf32>
    %334 = arith.subf %324, %333 : vector<16x32xf32>
    %335 = arith.mulf %334, %334 : vector<16x32xf32>
    %cst_147 = arith.constant dense<0.000000e+00> : vector<16xf32>
    %336 = vector.multi_reduction <add>, %335, %cst_147 [1] : vector<16x32xf32> to vector<16xf32>
    %337 = vector.shape_cast %336 : vector<16xf32> to vector<16x1xf32>
    %cst_148 = arith.constant 3.200000e+01 : f32
    %338 = vector.broadcast %cst_148 : f32 to vector<16x1xf32>
    %339 = arith.divf %337, %338 : vector<16x1xf32>
    %340 = vector.broadcast %332 : vector<16x1xf32> to vector<16x32xf32>
    %341 = arith.subf %324, %340 : vector<16x32xf32>
    %cst_149 = arith.constant 9.99999996E-13 : f32
    %342 = vector.broadcast %cst_149 : f32 to vector<16x1xf32>
    %343 = arith.addf %339, %342 : vector<16x1xf32>
    %344 = math.rsqrt %343 : vector<16x1xf32>
    %345 = vector.broadcast %344 : vector<16x1xf32> to vector<16x32xf32>
    %346 = arith.mulf %341, %345 : vector<16x32xf32>
    %347 = vector.broadcast %326 : vector<1x32xf32> to vector<16x32xf32>
    %348 = arith.mulf %346, %347 : vector<16x32xf32>
    %349 = vector.broadcast %328 : vector<1x32xf32> to vector<16x32xf32>
    %350 = arith.addf %348, %349 : vector<16x32xf32>
    %351 = arith.truncf %350 : vector<16x32xf32> to vector<16x32xbf16>
    %c1_150 = arith.constant 1 : index
    %c0_151 = arith.constant 0 : index
    %c0_152 = arith.constant 0 : index
    %352 = vector.load %arg5[%c1_150, %c0_151, %c0_152] : memref<2x32x64xbf16, #tpu.memory_space<vmem>>, vector<1x32x64xbf16>
    %353 = vector.shape_cast %352 : vector<1x32x64xbf16> to vector<32x64xbf16>
    %cst_153 = arith.constant dense<0.000000e+00> : vector<16x64xf32>
    %354 = tpu.matmul %351, %353, %cst_153 {dimension_numbers = #tpu.dot_dimension_numbers<[1], [0], [0], [1], [0, 0, 1, 1], [], []>} : vector<16x32xbf16>, vector<32x64xbf16>, vector<16x64xf32> -> vector<16x64xf32>
    %c1_154 = arith.constant 1 : index
    %c4_155 = arith.constant 4 : index
    %c0_156 = arith.constant 0 : index
    %355 = vector.load %arg7[%c1_154, %c4_155, %c0_156] : memref<2x8x128xf32, #tpu.memory_space<vmem>>, vector<1x1x64xf32>
    %356 = vector.shape_cast %355 : vector<1x1x64xf32> to vector<1x64xf32>
    %357 = vector.broadcast %356 : vector<1x64xf32> to vector<16x64xf32>
    %358 = arith.addf %354, %357 : vector<16x64xf32>
    %cst_157 = arith.constant 5.000000e-01 : f32
    %359 = vector.broadcast %cst_157 : f32 to vector<16x64xf32>
    %360 = arith.mulf %359, %358 : vector<16x64xf32>
    %cst_158 = arith.constant 4.471500e-02 : f32
    %361 = vector.broadcast %cst_158 : f32 to vector<16x64xf32>
    %362 = arith.mulf %361, %358 : vector<16x64xf32>
    %363 = arith.mulf %362, %358 : vector<16x64xf32>
    %364 = arith.mulf %363, %358 : vector<16x64xf32>
    %365 = arith.addf %358, %364 : vector<16x64xf32>
    %cst_159 = arith.constant 0.797884583 : f32
    %366 = vector.broadcast %cst_159 : f32 to vector<16x64xf32>
    %367 = arith.mulf %366, %365 : vector<16x64xf32>
    %368 = math.tanh %367 : vector<16x64xf32>
    %cst_160 = arith.constant 1.000000e+00 : f32
    %369 = vector.broadcast %cst_160 : f32 to vector<16x64xf32>
    %370 = arith.addf %369, %368 : vector<16x64xf32>
    %371 = arith.mulf %360, %370 : vector<16x64xf32>
    %372 = arith.truncf %371 : vector<16x64xf32> to vector<16x64xbf16>
    %c1_161 = arith.constant 1 : index
    %c0_162 = arith.constant 0 : index
    %c0_163 = arith.constant 0 : index
    %373 = vector.load %arg6[%c1_161, %c0_162, %c0_163] : memref<2x64x32xbf16, #tpu.memory_space<vmem>>, vector<1x64x32xbf16>
    %374 = vector.shape_cast %373 : vector<1x64x32xbf16> to vector<64x32xbf16>
    %cst_164 = arith.constant dense<0.000000e+00> : vector<16x32xf32>
    %375 = tpu.matmul %372, %374, %cst_164 {dimension_numbers = #tpu.dot_dimension_numbers<[1], [0], [0], [1], [0, 0, 1, 1], [], []>} : vector<16x64xbf16>, vector<64x32xbf16>, vector<16x32xf32> -> vector<16x32xf32>
    %c1_165 = arith.constant 1 : index
    %c5_166 = arith.constant 5 : index
    %c0_167 = arith.constant 0 : index
    %376 = vector.load %arg7[%c1_165, %c5_166, %c0_167] : memref<2x8x128xf32, #tpu.memory_space<vmem>>, vector<1x1x32xf32>
    %377 = vector.shape_cast %376 : vector<1x1x32xf32> to vector<1x32xf32>
    %378 = vector.broadcast %377 : vector<1x32xf32> to vector<16x32xf32>
    %379 = arith.addf %375, %378 : vector<16x32xf32>
    %380 = arith.addf %379, %350 : vector<16x32xf32>
    %c1_168 = arith.constant 1 : index
    %c6_169 = arith.constant 6 : index
    %c0_170 = arith.constant 0 : index
    %381 = vector.load %arg7[%c1_168, %c6_169, %c0_170] : memref<2x8x128xf32, #tpu.memory_space<vmem>>, vector<1x1x32xf32>
    %382 = vector.shape_cast %381 : vector<1x1x32xf32> to vector<1x32xf32>
    %c1_171 = arith.constant 1 : index
    %c7_172 = arith.constant 7 : index
    %c0_173 = arith.constant 0 : index
    %383 = vector.load %arg7[%c1_171, %c7_172, %c0_173] : memref<2x8x128xf32, #tpu.memory_space<vmem>>, vector<1x1x32xf32>
    %384 = vector.shape_cast %383 : vector<1x1x32xf32> to vector<1x32xf32>
    %cst_174 = arith.constant dense<0.000000e+00> : vector<16xf32>
    %385 = vector.multi_reduction <add>, %380, %cst_174 [1] : vector<16x32xf32> to vector<16xf32>
    %386 = vector.shape_cast %385 : vector<16xf32> to vector<16x1xf32>
    %cst_175 = arith.constant 3.200000e+01 : f32
    %387 = vector.broadcast %cst_175 : f32 to vector<16x1xf32>
    %388 = arith.divf %386, %387 : vector<16x1xf32>
    %389 = vector.broadcast %388 : vector<16x1xf32> to vector<16x32xf32>
    %390 = arith.subf %380, %389 : vector<16x32xf32>
    %391 = arith.mulf %390, %390 : vector<16x32xf32>
    %cst_176 = arith.constant dense<0.000000e+00> : vector<16xf32>
    %392 = vector.multi_reduction <add>, %391, %cst_176 [1] : vector<16x32xf32> to vector<16xf32>
    %393 = vector.shape_cast %392 : vector<16xf32> to vector<16x1xf32>
    %cst_177 = arith.constant 3.200000e+01 : f32
    %394 = vector.broadcast %cst_177 : f32 to vector<16x1xf32>
    %395 = arith.divf %393, %394 : vector<16x1xf32>
    %396 = vector.broadcast %388 : vector<16x1xf32> to vector<16x32xf32>
    %397 = arith.subf %380, %396 : vector<16x32xf32>
    %cst_178 = arith.constant 9.99999996E-13 : f32
    %398 = vector.broadcast %cst_178 : f32 to vector<16x1xf32>
    %399 = arith.addf %395, %398 : vector<16x1xf32>
    %400 = math.rsqrt %399 : vector<16x1xf32>
    %401 = vector.broadcast %400 : vector<16x1xf32> to vector<16x32xf32>
    %402 = arith.mulf %397, %401 : vector<16x32xf32>
    %403 = vector.broadcast %382 : vector<1x32xf32> to vector<16x32xf32>
    %404 = arith.mulf %402, %403 : vector<16x32xf32>
    %405 = vector.broadcast %384 : vector<1x32xf32> to vector<16x32xf32>
    %406 = arith.addf %404, %405 : vector<16x32xf32>
    %c0_179 = arith.constant 0 : index
    %c0_180 = arith.constant 0 : index
    %407 = vector.load %arg8[%c0_179, %c0_180] : memref<32x5xf32, #tpu.memory_space<vmem>>, vector<32x5xf32>
    %cst_181 = arith.constant dense<0.000000e+00> : vector<16x5xf32>
    %408 = tpu.matmul %406, %407, %cst_181 {dimension_numbers = #tpu.dot_dimension_numbers<[1], [0], [0], [1], [0, 0, 1, 1], [], []>} : vector<16x32xf32>, vector<32x5xf32>, vector<16x5xf32> -> vector<16x5xf32>
    %c2_182 = arith.constant 2 : index
    %c0_183 = arith.constant 0 : index
    %409 = vector.load %arg2[%c2_182, %c0_183] : memref<8x128xf32, #tpu.memory_space<vmem>>, vector<1x5xf32>
    %410 = vector.broadcast %409 : vector<1x5xf32> to vector<16x5xf32>
    %411 = arith.addf %408, %410 : vector<16x5xf32>
    %412 = vector.shape_cast %411 : vector<16x5xf32> to vector<2x8x5xf32>
    %c0_184 = arith.constant 0 : index
    %c0_185 = arith.constant 0 : index
    %413 = vector.load %arg9[%c0_184, %c0_185] : memref<5x5xf32, #tpu.memory_space<vmem>>, vector<5x5xf32>
    %414 = tpu.iota {dimensions = array<i32: 1>} : vector<2x5xi32>
    %415 = tpu.iota {dimensions = array<i32: 2>} : vector<2x5x5xi32>
    %416 = vector.extract_strided_slice %412 {offsets = [0, 0, 0], sizes = [2, 1, 5], strides = [1, 1, 1]} : vector<2x8x5xf32> to vector<2x1x5xf32>
    %417 = vector.shape_cast %416 : vector<2x1x5xf32> to vector<2x5xf32>
    %418 = vector.shape_cast %417 : vector<2x5xf32> to vector<2x1x5xf32>
    %419 = vector.shape_cast %413 : vector<5x5xf32> to vector<1x5x5xf32>
    %420 = vector.broadcast %418 : vector<2x1x5xf32> to vector<2x5x5xf32>
    %421 = vector.broadcast %419 : vector<1x5x5xf32> to vector<2x5x5xf32>
    %422 = arith.addf %420, %421 : vector<2x5x5xf32>
    %cst_186 = arith.constant dense<0xFF800000> : vector<2x5xf32>
    %423 = vector.multi_reduction <maximumf>, %422, %cst_186 [2] : vector<2x5x5xf32> to vector<2x5xf32>
    %424 = vector.shape_cast %423 : vector<2x5xf32> to vector<2x5x1xf32>
    %425 = vector.broadcast %424 : vector<2x5x1xf32> to vector<2x5x5xf32>
    %426 = arith.cmpf oeq, %422, %425 : vector<2x5x5xf32>
    %c5_i32 = arith.constant 5 : i32
    %427 = vector.broadcast %c5_i32 : i32 to vector<2x5x5xi32>
    %428 = arith.select %426, %415, %427 : vector<2x5x5xi1>, vector<2x5x5xi32>
    %cst_187 = arith.constant dense<2147483647> : vector<2x5xi32>
    %429 = vector.multi_reduction <minsi>, %428, %cst_187 [2] : vector<2x5x5xi32> to vector<2x5xi32>
    %cst_188 = arith.constant 1.000000e+00 : f32
    %430 = vector.broadcast %cst_188 : f32 to vector<2x1xf32>
    %431 = arith.cmpf ogt, %32, %430 : vector<2x1xf32>
    %432 = vector.extract_strided_slice %412 {offsets = [0, 1, 0], sizes = [2, 1, 5], strides = [1, 1, 1]} : vector<2x8x5xf32> to vector<2x1x5xf32>
    %433 = vector.shape_cast %432 : vector<2x1x5xf32> to vector<2x5xf32>
    %434 = arith.addf %423, %433 : vector<2x5xf32>
    %435 = vector.shape_cast %431 : vector<2x1xi1> to vector<2x1xi1>
    %436 = vector.broadcast %435 : vector<2x1xi1> to vector<2x5xi1>
    %437 = arith.select %436, %434, %417 : vector<2x5xi1>, vector<2x5xf32>
    %438 = vector.shape_cast %431 : vector<2x1xi1> to vector<2x1xi1>
    %439 = vector.broadcast %438 : vector<2x1xi1> to vector<2x5xi1>
    %440 = arith.select %439, %429, %414 : vector<2x5xi1>, vector<2x5xi32>
    %441 = vector.shape_cast %437 : vector<2x5xf32> to vector<2x1x5xf32>
    %442 = vector.shape_cast %413 : vector<5x5xf32> to vector<1x5x5xf32>
    %443 = vector.broadcast %441 : vector<2x1x5xf32> to vector<2x5x5xf32>
    %444 = vector.broadcast %442 : vector<1x5x5xf32> to vector<2x5x5xf32>
    %445 = arith.addf %443, %444 : vector<2x5x5xf32>
    %cst_189 = arith.constant dense<0xFF800000> : vector<2x5xf32>
    %446 = vector.multi_reduction <maximumf>, %445, %cst_189 [2] : vector<2x5x5xf32> to vector<2x5xf32>
    %447 = vector.shape_cast %446 : vector<2x5xf32> to vector<2x5x1xf32>
    %448 = vector.broadcast %447 : vector<2x5x1xf32> to vector<2x5x5xf32>
    %449 = arith.cmpf oeq, %445, %448 : vector<2x5x5xf32>
    %c5_i32_190 = arith.constant 5 : i32
    %450 = vector.broadcast %c5_i32_190 : i32 to vector<2x5x5xi32>
    %451 = arith.select %449, %415, %450 : vector<2x5x5xi1>, vector<2x5x5xi32>
    %cst_191 = arith.constant dense<2147483647> : vector<2x5xi32>
    %452 = vector.multi_reduction <minsi>, %451, %cst_191 [2] : vector<2x5x5xi32> to vector<2x5xi32>
    %cst_192 = arith.constant 2.000000e+00 : f32
    %453 = vector.broadcast %cst_192 : f32 to vector<2x1xf32>
    %454 = arith.cmpf ogt, %32, %453 : vector<2x1xf32>
    %455 = vector.extract_strided_slice %412 {offsets = [0, 2, 0], sizes = [2, 1, 5], strides = [1, 1, 1]} : vector<2x8x5xf32> to vector<2x1x5xf32>
    %456 = vector.shape_cast %455 : vector<2x1x5xf32> to vector<2x5xf32>
    %457 = arith.addf %446, %456 : vector<2x5xf32>
    %458 = vector.shape_cast %454 : vector<2x1xi1> to vector<2x1xi1>
    %459 = vector.broadcast %458 : vector<2x1xi1> to vector<2x5xi1>
    %460 = arith.select %459, %457, %437 : vector<2x5xi1>, vector<2x5xf32>
    %461 = vector.shape_cast %454 : vector<2x1xi1> to vector<2x1xi1>
    %462 = vector.broadcast %461 : vector<2x1xi1> to vector<2x5xi1>
    %463 = arith.select %462, %452, %414 : vector<2x5xi1>, vector<2x5xi32>
    %464 = vector.shape_cast %460 : vector<2x5xf32> to vector<2x1x5xf32>
    %465 = vector.shape_cast %413 : vector<5x5xf32> to vector<1x5x5xf32>
    %466 = vector.broadcast %464 : vector<2x1x5xf32> to vector<2x5x5xf32>
    %467 = vector.broadcast %465 : vector<1x5x5xf32> to vector<2x5x5xf32>
    %468 = arith.addf %466, %467 : vector<2x5x5xf32>
    %cst_193 = arith.constant dense<0xFF800000> : vector<2x5xf32>
    %469 = vector.multi_reduction <maximumf>, %468, %cst_193 [2] : vector<2x5x5xf32> to vector<2x5xf32>
    %470 = vector.shape_cast %469 : vector<2x5xf32> to vector<2x5x1xf32>
    %471 = vector.broadcast %470 : vector<2x5x1xf32> to vector<2x5x5xf32>
    %472 = arith.cmpf oeq, %468, %471 : vector<2x5x5xf32>
    %c5_i32_194 = arith.constant 5 : i32
    %473 = vector.broadcast %c5_i32_194 : i32 to vector<2x5x5xi32>
    %474 = arith.select %472, %415, %473 : vector<2x5x5xi1>, vector<2x5x5xi32>
    %cst_195 = arith.constant dense<2147483647> : vector<2x5xi32>
    %475 = vector.multi_reduction <minsi>, %474, %cst_195 [2] : vector<2x5x5xi32> to vector<2x5xi32>
    %cst_196 = arith.constant 3.000000e+00 : f32
    %476 = vector.broadcast %cst_196 : f32 to vector<2x1xf32>
    %477 = arith.cmpf ogt, %32, %476 : vector<2x1xf32>
    %478 = vector.extract_strided_slice %412 {offsets = [0, 3, 0], sizes = [2, 1, 5], strides = [1, 1, 1]} : vector<2x8x5xf32> to vector<2x1x5xf32>
    %479 = vector.shape_cast %478 : vector<2x1x5xf32> to vector<2x5xf32>
    %480 = arith.addf %469, %479 : vector<2x5xf32>
    %481 = vector.shape_cast %477 : vector<2x1xi1> to vector<2x1xi1>
    %482 = vector.broadcast %481 : vector<2x1xi1> to vector<2x5xi1>
    %483 = arith.select %482, %480, %460 : vector<2x5xi1>, vector<2x5xf32>
    %484 = vector.shape_cast %477 : vector<2x1xi1> to vector<2x1xi1>
    %485 = vector.broadcast %484 : vector<2x1xi1> to vector<2x5xi1>
    %486 = arith.select %485, %475, %414 : vector<2x5xi1>, vector<2x5xi32>
    %487 = vector.shape_cast %483 : vector<2x5xf32> to vector<2x1x5xf32>
    %488 = vector.shape_cast %413 : vector<5x5xf32> to vector<1x5x5xf32>
    %489 = vector.broadcast %487 : vector<2x1x5xf32> to vector<2x5x5xf32>
    %490 = vector.broadcast %488 : vector<1x5x5xf32> to vector<2x5x5xf32>
    %491 = arith.addf %489, %490 : vector<2x5x5xf32>
    %cst_197 = arith.constant dense<0xFF800000> : vector<2x5xf32>
    %492 = vector.multi_reduction <maximumf>, %491, %cst_197 [2] : vector<2x5x5xf32> to vector<2x5xf32>
    %493 = vector.shape_cast %492 : vector<2x5xf32> to vector<2x5x1xf32>
    %494 = vector.broadcast %493 : vector<2x5x1xf32> to vector<2x5x5xf32>
    %495 = arith.cmpf oeq, %491, %494 : vector<2x5x5xf32>
    %c5_i32_198 = arith.constant 5 : i32
    %496 = vector.broadcast %c5_i32_198 : i32 to vector<2x5x5xi32>
    %497 = arith.select %495, %415, %496 : vector<2x5x5xi1>, vector<2x5x5xi32>
    %cst_199 = arith.constant dense<2147483647> : vector<2x5xi32>
    %498 = vector.multi_reduction <minsi>, %497, %cst_199 [2] : vector<2x5x5xi32> to vector<2x5xi32>
    %cst_200 = arith.constant 4.000000e+00 : f32
    %499 = vector.broadcast %cst_200 : f32 to vector<2x1xf32>
    %500 = arith.cmpf ogt, %32, %499 : vector<2x1xf32>
    %501 = vector.extract_strided_slice %412 {offsets = [0, 4, 0], sizes = [2, 1, 5], strides = [1, 1, 1]} : vector<2x8x5xf32> to vector<2x1x5xf32>
    %502 = vector.shape_cast %501 : vector<2x1x5xf32> to vector<2x5xf32>
    %503 = arith.addf %492, %502 : vector<2x5xf32>
    %504 = vector.shape_cast %500 : vector<2x1xi1> to vector<2x1xi1>
    %505 = vector.broadcast %504 : vector<2x1xi1> to vector<2x5xi1>
    %506 = arith.select %505, %503, %483 : vector<2x5xi1>, vector<2x5xf32>
    %507 = vector.shape_cast %500 : vector<2x1xi1> to vector<2x1xi1>
    %508 = vector.broadcast %507 : vector<2x1xi1> to vector<2x5xi1>
    %509 = arith.select %508, %498, %414 : vector<2x5xi1>, vector<2x5xi32>
    %510 = vector.shape_cast %506 : vector<2x5xf32> to vector<2x1x5xf32>
    %511 = vector.shape_cast %413 : vector<5x5xf32> to vector<1x5x5xf32>
    %512 = vector.broadcast %510 : vector<2x1x5xf32> to vector<2x5x5xf32>
    %513 = vector.broadcast %511 : vector<1x5x5xf32> to vector<2x5x5xf32>
    %514 = arith.addf %512, %513 : vector<2x5x5xf32>
    %cst_201 = arith.constant dense<0xFF800000> : vector<2x5xf32>
    %515 = vector.multi_reduction <maximumf>, %514, %cst_201 [2] : vector<2x5x5xf32> to vector<2x5xf32>
    %516 = vector.shape_cast %515 : vector<2x5xf32> to vector<2x5x1xf32>
    %517 = vector.broadcast %516 : vector<2x5x1xf32> to vector<2x5x5xf32>
    %518 = arith.cmpf oeq, %514, %517 : vector<2x5x5xf32>
    %c5_i32_202 = arith.constant 5 : i32
    %519 = vector.broadcast %c5_i32_202 : i32 to vector<2x5x5xi32>
    %520 = arith.select %518, %415, %519 : vector<2x5x5xi1>, vector<2x5x5xi32>
    %cst_203 = arith.constant dense<2147483647> : vector<2x5xi32>
    %521 = vector.multi_reduction <minsi>, %520, %cst_203 [2] : vector<2x5x5xi32> to vector<2x5xi32>
    %cst_204 = arith.constant 5.000000e+00 : f32
    %522 = vector.broadcast %cst_204 : f32 to vector<2x1xf32>
    %523 = arith.cmpf ogt, %32, %522 : vector<2x1xf32>
    %524 = vector.extract_strided_slice %412 {offsets = [0, 5, 0], sizes = [2, 1, 5], strides = [1, 1, 1]} : vector<2x8x5xf32> to vector<2x1x5xf32>
    %525 = vector.shape_cast %524 : vector<2x1x5xf32> to vector<2x5xf32>
    %526 = arith.addf %515, %525 : vector<2x5xf32>
    %527 = vector.shape_cast %523 : vector<2x1xi1> to vector<2x1xi1>
    %528 = vector.broadcast %527 : vector<2x1xi1> to vector<2x5xi1>
    %529 = arith.select %528, %526, %506 : vector<2x5xi1>, vector<2x5xf32>
    %530 = vector.shape_cast %523 : vector<2x1xi1> to vector<2x1xi1>
    %531 = vector.broadcast %530 : vector<2x1xi1> to vector<2x5xi1>
    %532 = arith.select %531, %521, %414 : vector<2x5xi1>, vector<2x5xi32>
    %533 = vector.shape_cast %529 : vector<2x5xf32> to vector<2x1x5xf32>
    %534 = vector.shape_cast %413 : vector<5x5xf32> to vector<1x5x5xf32>
    %535 = vector.broadcast %533 : vector<2x1x5xf32> to vector<2x5x5xf32>
    %536 = vector.broadcast %534 : vector<1x5x5xf32> to vector<2x5x5xf32>
    %537 = arith.addf %535, %536 : vector<2x5x5xf32>
    %cst_205 = arith.constant dense<0xFF800000> : vector<2x5xf32>
    %538 = vector.multi_reduction <maximumf>, %537, %cst_205 [2] : vector<2x5x5xf32> to vector<2x5xf32>
    %539 = vector.shape_cast %538 : vector<2x5xf32> to vector<2x5x1xf32>
    %540 = vector.broadcast %539 : vector<2x5x1xf32> to vector<2x5x5xf32>
    %541 = arith.cmpf oeq, %537, %540 : vector<2x5x5xf32>
    %c5_i32_206 = arith.constant 5 : i32
    %542 = vector.broadcast %c5_i32_206 : i32 to vector<2x5x5xi32>
    %543 = arith.select %541, %415, %542 : vector<2x5x5xi1>, vector<2x5x5xi32>
    %cst_207 = arith.constant dense<2147483647> : vector<2x5xi32>
    %544 = vector.multi_reduction <minsi>, %543, %cst_207 [2] : vector<2x5x5xi32> to vector<2x5xi32>
    %cst_208 = arith.constant 6.000000e+00 : f32
    %545 = vector.broadcast %cst_208 : f32 to vector<2x1xf32>
    %546 = arith.cmpf ogt, %32, %545 : vector<2x1xf32>
    %547 = vector.extract_strided_slice %412 {offsets = [0, 6, 0], sizes = [2, 1, 5], strides = [1, 1, 1]} : vector<2x8x5xf32> to vector<2x1x5xf32>
    %548 = vector.shape_cast %547 : vector<2x1x5xf32> to vector<2x5xf32>
    %549 = arith.addf %538, %548 : vector<2x5xf32>
    %550 = vector.shape_cast %546 : vector<2x1xi1> to vector<2x1xi1>
    %551 = vector.broadcast %550 : vector<2x1xi1> to vector<2x5xi1>
    %552 = arith.select %551, %549, %529 : vector<2x5xi1>, vector<2x5xf32>
    %553 = vector.shape_cast %546 : vector<2x1xi1> to vector<2x1xi1>
    %554 = vector.broadcast %553 : vector<2x1xi1> to vector<2x5xi1>
    %555 = arith.select %554, %544, %414 : vector<2x5xi1>, vector<2x5xi32>
    %556 = vector.shape_cast %552 : vector<2x5xf32> to vector<2x1x5xf32>
    %557 = vector.shape_cast %413 : vector<5x5xf32> to vector<1x5x5xf32>
    %558 = vector.broadcast %556 : vector<2x1x5xf32> to vector<2x5x5xf32>
    %559 = vector.broadcast %557 : vector<1x5x5xf32> to vector<2x5x5xf32>
    %560 = arith.addf %558, %559 : vector<2x5x5xf32>
    %cst_209 = arith.constant dense<0xFF800000> : vector<2x5xf32>
    %561 = vector.multi_reduction <maximumf>, %560, %cst_209 [2] : vector<2x5x5xf32> to vector<2x5xf32>
    %562 = vector.shape_cast %561 : vector<2x5xf32> to vector<2x5x1xf32>
    %563 = vector.broadcast %562 : vector<2x5x1xf32> to vector<2x5x5xf32>
    %564 = arith.cmpf oeq, %560, %563 : vector<2x5x5xf32>
    %c5_i32_210 = arith.constant 5 : i32
    %565 = vector.broadcast %c5_i32_210 : i32 to vector<2x5x5xi32>
    %566 = arith.select %564, %415, %565 : vector<2x5x5xi1>, vector<2x5x5xi32>
    %cst_211 = arith.constant dense<2147483647> : vector<2x5xi32>
    %567 = vector.multi_reduction <minsi>, %566, %cst_211 [2] : vector<2x5x5xi32> to vector<2x5xi32>
    %cst_212 = arith.constant 7.000000e+00 : f32
    %568 = vector.broadcast %cst_212 : f32 to vector<2x1xf32>
    %569 = arith.cmpf ogt, %32, %568 : vector<2x1xf32>
    %570 = vector.extract_strided_slice %412 {offsets = [0, 7, 0], sizes = [2, 1, 5], strides = [1, 1, 1]} : vector<2x8x5xf32> to vector<2x1x5xf32>
    %571 = vector.shape_cast %570 : vector<2x1x5xf32> to vector<2x5xf32>
    %572 = arith.addf %561, %571 : vector<2x5xf32>
    %573 = vector.shape_cast %569 : vector<2x1xi1> to vector<2x1xi1>
    %574 = vector.broadcast %573 : vector<2x1xi1> to vector<2x5xi1>
    %575 = arith.select %574, %572, %552 : vector<2x5xi1>, vector<2x5xf32>
    %576 = vector.shape_cast %569 : vector<2x1xi1> to vector<2x1xi1>
    %577 = vector.broadcast %576 : vector<2x1xi1> to vector<2x5xi1>
    %578 = arith.select %577, %567, %414 : vector<2x5xi1>, vector<2x5xi32>
    %cst_213 = arith.constant dense<0xFF800000> : vector<2xf32>
    %579 = vector.multi_reduction <maximumf>, %575, %cst_213 [1] : vector<2x5xf32> to vector<2xf32>
    %580 = vector.shape_cast %579 : vector<2xf32> to vector<2x1xf32>
    %581 = vector.broadcast %580 : vector<2x1xf32> to vector<2x5xf32>
    %582 = arith.cmpf oeq, %575, %581 : vector<2x5xf32>
    %c5_i32_214 = arith.constant 5 : i32
    %583 = vector.broadcast %c5_i32_214 : i32 to vector<2x5xi32>
    %584 = arith.select %582, %414, %583 : vector<2x5xi1>, vector<2x5xi32>
    %cst_215 = arith.constant dense<2147483647> : vector<2xi32>
    %585 = vector.multi_reduction <minsi>, %584, %cst_215 [1] : vector<2x5xi32> to vector<2xi32>
    %586 = vector.shape_cast %585 : vector<2xi32> to vector<2x1xi32>
    %587 = vector.broadcast %586 : vector<2x1xi32> to vector<2x5xi32>
    %588 = arith.cmpi eq, %414, %587 : vector<2x5xi32>
    %c0_i32 = arith.constant 0 : i32
    %589 = vector.broadcast %c0_i32 : i32 to vector<2x5xi32>
    %590 = arith.select %588, %578, %589 : vector<2x5xi1>, vector<2x5xi32>
    %cst_216 = arith.constant dense<0> : vector<2xi32>
    %591 = vector.multi_reduction <add>, %590, %cst_216 [1] : vector<2x5xi32> to vector<2xi32>
    %592 = vector.shape_cast %591 : vector<2xi32> to vector<2x1xi32>
    %593 = vector.broadcast %592 : vector<2x1xi32> to vector<2x5xi32>
    %594 = arith.cmpi eq, %414, %593 : vector<2x5xi32>
    %c0_i32_217 = arith.constant 0 : i32
    %595 = vector.broadcast %c0_i32_217 : i32 to vector<2x5xi32>
    %596 = arith.select %594, %555, %595 : vector<2x5xi1>, vector<2x5xi32>
    %cst_218 = arith.constant dense<0> : vector<2xi32>
    %597 = vector.multi_reduction <add>, %596, %cst_218 [1] : vector<2x5xi32> to vector<2xi32>
    %598 = vector.shape_cast %597 : vector<2xi32> to vector<2x1xi32>
    %599 = vector.broadcast %598 : vector<2x1xi32> to vector<2x5xi32>
    %600 = arith.cmpi eq, %414, %599 : vector<2x5xi32>
    %c0_i32_219 = arith.constant 0 : i32
    %601 = vector.broadcast %c0_i32_219 : i32 to vector<2x5xi32>
    %602 = arith.select %600, %532, %601 : vector<2x5xi1>, vector<2x5xi32>
    %cst_220 = arith.constant dense<0> : vector<2xi32>
    %603 = vector.multi_reduction <add>, %602, %cst_220 [1] : vector<2x5xi32> to vector<2xi32>
    %604 = vector.shape_cast %603 : vector<2xi32> to vector<2x1xi32>
    %605 = vector.broadcast %604 : vector<2x1xi32> to vector<2x5xi32>
    %606 = arith.cmpi eq, %414, %605 : vector<2x5xi32>
    %c0_i32_221 = arith.constant 0 : i32
    %607 = vector.broadcast %c0_i32_221 : i32 to vector<2x5xi32>
    %608 = arith.select %606, %509, %607 : vector<2x5xi1>, vector<2x5xi32>
    %cst_222 = arith.constant dense<0> : vector<2xi32>
    %609 = vector.multi_reduction <add>, %608, %cst_222 [1] : vector<2x5xi32> to vector<2xi32>
    %610 = vector.shape_cast %609 : vector<2xi32> to vector<2x1xi32>
    %611 = vector.broadcast %610 : vector<2x1xi32> to vector<2x5xi32>
    %612 = arith.cmpi eq, %414, %611 : vector<2x5xi32>
    %c0_i32_223 = arith.constant 0 : i32
    %613 = vector.broadcast %c0_i32_223 : i32 to vector<2x5xi32>
    %614 = arith.select %612, %486, %613 : vector<2x5xi1>, vector<2x5xi32>
    %cst_224 = arith.constant dense<0> : vector<2xi32>
    %615 = vector.multi_reduction <add>, %614, %cst_224 [1] : vector<2x5xi32> to vector<2xi32>
    %616 = vector.shape_cast %615 : vector<2xi32> to vector<2x1xi32>
    %617 = vector.broadcast %616 : vector<2x1xi32> to vector<2x5xi32>
    %618 = arith.cmpi eq, %414, %617 : vector<2x5xi32>
    %c0_i32_225 = arith.constant 0 : i32
    %619 = vector.broadcast %c0_i32_225 : i32 to vector<2x5xi32>
    %620 = arith.select %618, %463, %619 : vector<2x5xi1>, vector<2x5xi32>
    %cst_226 = arith.constant dense<0> : vector<2xi32>
    %621 = vector.multi_reduction <add>, %620, %cst_226 [1] : vector<2x5xi32> to vector<2xi32>
    %622 = vector.shape_cast %621 : vector<2xi32> to vector<2x1xi32>
    %623 = vector.broadcast %622 : vector<2x1xi32> to vector<2x5xi32>
    %624 = arith.cmpi eq, %414, %623 : vector<2x5xi32>
    %c0_i32_227 = arith.constant 0 : i32
    %625 = vector.broadcast %c0_i32_227 : i32 to vector<2x5xi32>
    %626 = arith.select %624, %440, %625 : vector<2x5xi1>, vector<2x5xi32>
    %cst_228 = arith.constant dense<0> : vector<2xi32>
    %627 = vector.multi_reduction <add>, %626, %cst_228 [1] : vector<2x5xi32> to vector<2xi32>
    %628 = vector.shape_cast %627 : vector<2xi32> to vector<2x1xi32>
    %629 = tpu.iota {dimensions = array<i32: 1>} : vector<2x8xi32>
    %c0_i32_229 = arith.constant 0 : i32
    %630 = vector.broadcast %c0_i32_229 : i32 to vector<2x8xi32>
    %c0_i32_230 = arith.constant 0 : i32
    %631 = vector.broadcast %c0_i32_230 : i32 to vector<2x8xi32>
    %632 = arith.cmpi eq, %629, %631 : vector<2x8xi32>
    %633 = vector.shape_cast %628 : vector<2x1xi32> to vector<2x1xi32>
    %634 = vector.broadcast %633 : vector<2x1xi32> to vector<2x8xi32>
    %635 = arith.select %632, %634, %630 : vector<2x8xi1>, vector<2x8xi32>
    %c1_i32 = arith.constant 1 : i32
    %636 = vector.broadcast %c1_i32 : i32 to vector<2x8xi32>
    %637 = arith.cmpi eq, %629, %636 : vector<2x8xi32>
    %638 = vector.shape_cast %622 : vector<2x1xi32> to vector<2x1xi32>
    %639 = vector.broadcast %638 : vector<2x1xi32> to vector<2x8xi32>
    %640 = arith.select %637, %639, %635 : vector<2x8xi1>, vector<2x8xi32>
    %c2_i32 = arith.constant 2 : i32
    %641 = vector.broadcast %c2_i32 : i32 to vector<2x8xi32>
    %642 = arith.cmpi eq, %629, %641 : vector<2x8xi32>
    %643 = vector.shape_cast %616 : vector<2x1xi32> to vector<2x1xi32>
    %644 = vector.broadcast %643 : vector<2x1xi32> to vector<2x8xi32>
    %645 = arith.select %642, %644, %640 : vector<2x8xi1>, vector<2x8xi32>
    %c3_i32 = arith.constant 3 : i32
    %646 = vector.broadcast %c3_i32 : i32 to vector<2x8xi32>
    %647 = arith.cmpi eq, %629, %646 : vector<2x8xi32>
    %648 = vector.shape_cast %610 : vector<2x1xi32> to vector<2x1xi32>
    %649 = vector.broadcast %648 : vector<2x1xi32> to vector<2x8xi32>
    %650 = arith.select %647, %649, %645 : vector<2x8xi1>, vector<2x8xi32>
    %c4_i32 = arith.constant 4 : i32
    %651 = vector.broadcast %c4_i32 : i32 to vector<2x8xi32>
    %652 = arith.cmpi eq, %629, %651 : vector<2x8xi32>
    %653 = vector.shape_cast %604 : vector<2x1xi32> to vector<2x1xi32>
    %654 = vector.broadcast %653 : vector<2x1xi32> to vector<2x8xi32>
    %655 = arith.select %652, %654, %650 : vector<2x8xi1>, vector<2x8xi32>
    %c5_i32_231 = arith.constant 5 : i32
    %656 = vector.broadcast %c5_i32_231 : i32 to vector<2x8xi32>
    %657 = arith.cmpi eq, %629, %656 : vector<2x8xi32>
    %658 = vector.shape_cast %598 : vector<2x1xi32> to vector<2x1xi32>
    %659 = vector.broadcast %658 : vector<2x1xi32> to vector<2x8xi32>
    %660 = arith.select %657, %659, %655 : vector<2x8xi1>, vector<2x8xi32>
    %c6_i32 = arith.constant 6 : i32
    %661 = vector.broadcast %c6_i32 : i32 to vector<2x8xi32>
    %662 = arith.cmpi eq, %629, %661 : vector<2x8xi32>
    %663 = vector.shape_cast %592 : vector<2x1xi32> to vector<2x1xi32>
    %664 = vector.broadcast %663 : vector<2x1xi32> to vector<2x8xi32>
    %665 = arith.select %662, %664, %660 : vector<2x8xi1>, vector<2x8xi32>
    %c7_i32 = arith.constant 7 : i32
    %666 = vector.broadcast %c7_i32 : i32 to vector<2x8xi32>
    %667 = arith.cmpi eq, %629, %666 : vector<2x8xi32>
    %668 = vector.shape_cast %586 : vector<2x1xi32> to vector<2x1xi32>
    %669 = vector.broadcast %668 : vector<2x1xi32> to vector<2x8xi32>
    %670 = arith.select %667, %669, %665 : vector<2x8xi1>, vector<2x8xi32>
    %c0_232 = arith.constant 0 : index
    %c0_233 = arith.constant 0 : index
    %671 = vector.load %arg10[%c0_232, %c0_233] : memref<2x8xi32, #tpu.memory_space<vmem>>, vector<2x8xi32>
    tpu.vector_store %arg10[%c0_232, %c0_233], %670 {strides = array<i32>} : memref<2x8xi32, #tpu.memory_space<vmem>>, vector<2x8xi32>,
    return
  }
}

</mosaic_0001>

<bundles_post_ra>
// kernel: bert_crf_forward.1
= control target key start
LH: loop header
LB: loop body
LE: loop exit
PB: predicated region body
PF: predicated region fallthrough
CT: control target
= control target key end

     0   :  { %vm41_vm0 = vcmask 261120   ;;  %s3971_s0 = inlined_call_operand.vmem [shape: f32[16,32], index: 0, kind: input, shape index: {}]   ;;  %s3972_s1 = inlined_call_operand.vmem [shape: f32[2,8], index: 1, kind: input, shape index: {}]   ;;  %s3973_s2 = inlined_call_operand.vmem [shape: f32[8,128], index: 2, kind: input, shape index: {}]   ;;  %s3974_s3 = inlined_call_operand.vmem [shape: bf16[2,32,64], index: 3, kind: input, shape index: {}]   ;;  %s3975_s4 = inlined_call_operand.vmem [shape: bf16[2,4,32,32], index: 4, kind: input, shape index: {}]   ;;  %s3976_s5 = inlined_call_operand.vmem [shape: bf16[2,32,64], index: 5, kind: input, shape index: {}]   ;;  %s3977_s6 = inlined_call_operand.vmem [shape: bf16[2,64,32], index: 6, kind: input, shape index: {}]   ;;  %s3978_s7 = inlined_call_operand.vmem [shape: f32[2,8,128], index: 7, kind: input, shape index: {}]   ;;  %s3979_s8 = inlined_call_operand.vmem [shape: f32[32,5], index: 8, kind: input, shape index: {}]   ;;  %s3980_s9 = inlined_call_operand.vmem [shape: f32[5,5], index: 9, kind: input, shape index: {}]   ;;  %s3981_s10 = inlined_call_operand.hbm [shape: s32[2,8], index: 10, kind: output, shape index: {}]  }
   0x1   :  { %v37_v0 = vld [vmem:[%s3971_s0] sm:$0xff]  ;;  %v38_v2 = vld [vmem:[%s3971_s0 + $0x8] sm:$0xff] }
   0x2   :  { %v42_v1 = vsel %vm41_vm0, %v37_v0, 0.0  ;;  %v45_v3 = vsel %vm41_vm0, %v38_v2, 0.0 }
   0x3   :  { %43 = vadd.xlane.f32.xlu0 %v42_v1 }
   0x4   :  { %15 = vsyncpa [#allocation3], 0  ;;  %v3116_v4 = vmov 32.0   ;;  %v2916_v21 = vld [vmem:[%s3974_s3 + $0x8] sm:$0xff]  ;;  %v2915_v25 = vld [vmem:[%s3974_s3] sm:$0xff]  ;;  %s3117_s30 = smov 88  }
   0x5   :  { %2995 = vrcp.f32 %v3116_v4  ;;  %v2918_v22 = vld [vmem:[%s3975_s4 + $0x8] sm:$0xff]  ;;  %136 = vmatpush.bf16.msra.mxu0 %v2916_v21  ;;  %v2917_v26 = vld [vmem:[%s3975_s4] sm:$0xff]  ;;  %s3118_s11 = smov 120   ;;  %s3119_s12 = smov 96   ;;  %vm151_vm8 = vcmask 64512   ;;  %v2920_v62 = vld [vmem:[%s3975_s4 + $0x18] sm:$0xff] }
   0x6   :  { %247 = vmatpush.bf16.msra.mxu3 %v2918_v22  ;;  %v2976_v43 = vld [vmem:[%s3973_s2] ss:$0 sm:$0xff]  ;;  %v2977_v49 = vld [vmem:[%s3973_s2 + $0x1] ss:$0 sm:$0xff]  ;;  %s3120_s13 = smov 80   ;;  %s3121_s14 = smov 112  }
   0x7   :  { %v2978_v54 = vld [vmem:[%s3978_s7] ss:$0 sm:$0xff]  ;;  %v2919_v1 = vld [vmem:[%s3975_s4 + $0x10] sm:$0xff]  ;;  %s3122_s24 = smov 104   ;;  %s3123_s25 = smov 72   ;;  %vm917_vm15 = vcmask 523264  }
   0x8   :  { %s2662_s23 = sshll.u32 %s3981_s10, 4  ;;  %s2663_s23 = int_to_ptr.hbm [resolvable:$true] %s2662_s23 }
   0x9   :  { %137 = vmatpush.bf16.msra.mxu0 %v2915_v25 }
   0xa   :  { %248 = vmatpush.bf16.msra.mxu3 %v2917_v26 }
   0xb   :  { %46 = vadd.xlane.f32.xlu0 %v45_v3  ;;  %v2996_v5 = vpop.eup %2995  ;;  %v2921_v3 = vld [vmem:[%s3975_s4 + $0x20] sm:$0xff] }
   0xc   :  { %v49_v6 = vmul.f32 32.0, %v2996_v5  ;;  %vm53_vm1 = vweird.f32 %v2996_v5 }
   0xe   :  { %v50_v7 = vsub.f32 1.0, %v49_v6  ;;  %v99_v6 = vld [vmem:[%s3972_s1] sm:$0x3] }
  0x10   :  { %v51_v8 = vmul.f32 %v2996_v5, %v50_v7  ;;  %v100_v7 = vsub.f32 1.0, %v99_v6 }
  0x12   :  { %v52_v9 = vadd.f32 %v2996_v5, %v51_v8 }
  0x14   :  { %v3189_v10 = vsel %vm53_vm1, %v2996_v5, %v52_v9  ;;  %v101_v9 = vmul.f32 -10000.0, %v100_v7 }
  0x76   :  { %v44_v11 = vpop.xlane.xlu0 %43 }
  0x77   :  { %v55_v12 = vmul.f32 %v3189_v10, %v44_v11 }
  0x79   :  { %v57_v13 = vsub.f32 %v37_v0, %v55_v12  ;;  %v103_v12 = vrot.slane %v101_v9, 1 }
  0x7b   :  { %v59_v14 = vmul.f32 %v57_v13, %v57_v13 }
  0x7d   :  { %v61_v15 = vsel %vm41_vm0, %v59_v14, 0.0 }
  0x7e   :  { %62 = vadd.xlane.f32.xlu1 %v61_v15  ;;  %v47_v16 = vpop.xlane.xlu0 %46 }
  0x7f   :  { %v56_v17 = vmul.f32 %v3189_v10, %v47_v16 }
  0x81   :  { %v58_v18 = vsub.f32 %v38_v2, %v56_v17  ;;  %v2922_v2 = vld [vmem:[%s3975_s4 + $0x28] sm:$0xff] }
  0x83   :  { %v60_v19 = vmul.f32 %v58_v18, %v58_v18 }
  0x85   :  { %v64_v20 = vsel %vm41_vm0, %v60_v19, 0.0 }
  0x86   :  { %65 = vadd.xlane.f32.xlu1 %v64_v20 }
  0xf1   :  { %v63_v23 = vpop.xlane.xlu1 %62 }
  0xf2   :  { %v67_v24 = vmul.f32 %v63_v23, %v3189_v10 }
  0xf4   :  { %v69_v27 = vadd.f32 1e-12, %v67_v24 }
  0xf6   :  { %2997 = vrsqrt.f32 %v69_v27  ;;  %vm77_vm3 = vweird.f32 %v69_v27 }
  0xf9   :  { %v66_v28 = vpop.xlane.xlu1 %65 }
  0xfa   :  { %v68_v29 = vmul.f32 %v66_v28, %v3189_v10 }
  0xfc   :  { %v2998_v30 = vpop.eup %2997  ;;  %v70_v31 = vadd.f32 1e-12, %v68_v29 }
  0xfd   :  { %v72_v32 = vmul.f32 %v2998_v30, %v69_v27  ;;  %vm78_vm2 = vweird.f32 %v2998_v30 }
  0xfe   :  { %2999 = vrsqrt.f32 %v70_v31  ;;  %vm79_vm4 = vmor %vm77_vm3, %vm78_vm2  ;;  %vm87_vm6 = vweird.f32 %v70_v31 }
  0xff   :  { %v73_v33 = vmul.f32 %v2998_v30, %v72_v32 }
 0x101   :  { %v74_v34 = vmul.f32 0.5, %v73_v33 }
 0x103   :  { %v75_v35 = vsub.f32 1.5, %v74_v34 }
 0x104   :  { %v3000_v36 = vpop.eup %2999 }
 0x105   :  { %v76_v37 = vmul.f32 %v2998_v30, %v75_v35  ;;  %v82_v38 = vmul.f32 %v3000_v36, %v70_v31  ;;  %vm88_vm5 = vweird.f32 %v3000_v36 }
 0x106   :  { %vm89_vm7 = vmor %vm87_vm6, %vm88_vm5 }
 0x107   :  { %v83_v39 = vmul.f32 %v3000_v36, %v82_v38  ;;  %v80_v40 = vsel %vm79_vm4, %v2998_v30, %v76_v37 }
 0x108   :  { %v91_v44 = vmul.f32 %v80_v40, %v57_v13  ;;  %v3279_v13 = vperm.slane %v101_v9, 0 }
 0x109   :  { %v84_v41 = vmul.f32 0.5, %v83_v39 }
 0x10a   :  { %v94_v47 = vmul.f32 %v2976_v43, %v91_v44 }
 0x10b   :  { %v85_v42 = vsub.f32 1.5, %v84_v41 }
 0x10c   :  { %v3215_v51 = vadd.f32 %v2977_v49, %v94_v47 }
 0x10d   :  { %v86_v45 = vmul.f32 %v3000_v36, %v85_v42 }
 0x10f   :  { %v90_v46 = vsel %vm89_vm7, %v3000_v36, %v86_v45 }
 0x110   :  { %v92_v48 = vmul.f32 %v90_v46, %v58_v18  ;;  %v3282_v18 = vperm.slane %v103_v12, 0 }
 0x112   :  { %v95_v50 = vmul.f32 %v2976_v43, %v92_v48 }
 0x114   :  { %v3217_v52 = vadd.f32 %v2977_v49, %v95_v50 }
 0x116   :  { %v3221_v53 = vpack.c.bf16 %v3217_v52, %v3215_v51 }
 0x118   :  { %2679 = vmatmul.msk.bf16.vlgmr.msra.gmra.mxu0 %vm41_vm0, %v3221_v53  ;;  %2692 = vmatmul.msk.bf16.vlgmr.msra.gmra.mxu3 %vm41_vm0, %v3221_v53 }
 0x195   :  { %v139_v55 = vpop.f32.mrf.mxu0 }
 0x196   :  { %v3230_v56 = vadd.f32 %v2978_v54, %v139_v55 }
 0x198   :  { %257 = vrot.lane.b32.xlu1 %v3230_v56, %s3117_s30 }
 0x19b   :  { %v250_v57 = vpop.f32.mrf.mxu3 }
 0x19c   :  { %428 = vmatpush.msrb.mxu3 %v250_v57 }
 0x19d   :  { %v141_v58 = vpop.f32.mrf.mxu0 }
 0x19e   :  { %v3234_v59 = vadd.f32 %v2978_v54, %v141_v58 }
 0x1a0   :  { %283 = vrot.lane.b32.xlu0 %v3234_v59, %s3118_s11  ;;  %177 = vrot.lane.b32.xlu2 %v3234_v59, %s3119_s12 }
 0x1a1   :  { %458 = vrot.lane.b32.xlu1 %v3230_v56, %s3120_s13 }
 0x1a3   :  { %v252_v16 = vpop.f32.mrf.mxu3 }
 0x1a8   :  { %285 = vrot.lane.b32.xlu2 %v3234_v59, %s3117_s30 }
 0x1a9   :  { %456 = vrot.lane.b32.xlu1 %v3230_v56, %s3121_s14 }
 0x1b0   :  { %255 = vrot.lane.b32.xlu2 %v3230_v56, %s3118_s11 }
 0x1b8   :  { %149 = vrot.lane.b32.xlu2 %v3230_v56, %s3119_s12 }
 0x1fa   :  { %v178_v60 = vpop.permute.xlu2 %177 }
 0x1fb   :  { %2682 = vmatpush.xpose.msk.msra.mxu2 %vm151_vm8, %v178_v60 }
 0x1fe   :  { %2683 = vmatmul.msk.f32.vlgmr.msra.gmra.mxu2 %vm151_vm8, %v3234_v59 }
 0x202   :  { %v286_v61 = vpop.permute.xlu2 %285 }
 0x203   :  { %2695 = vmatpush.xpose.msk.msrb.mxu2 %vm151_vm8, %v286_v61 }
 0x20a   :  { %v256_v63 = vpop.permute.xlu2 %255  ;;  %v258_v0 = vpop.permute.xlu1 %257 }
 0x20b   :  { %2693 = vmatpush.xpose.msk.msra.mxu1 %vm151_vm8, %v258_v0 }
 0x20e   :  { %2694 = vmatmul.msk.f32.vlgmr.msra.gmra.mxu1 %vm151_vm8, %v256_v63 }
 0x20f   :  { %356 = vmatpush.bf16.msrb.mxu1 %v2920_v62 }
 0x212   :  { %v284_v4 = vpop.permute.xlu0 %283  ;;  %v150_v5 = vpop.permute.xlu2 %149 }
 0x213   :  { %357 = vmatpush.bf16.msrb.mxu1 %v2919_v1  ;;  %2680 = vmatpush.xpose.msk.msrb.mxu0 %vm151_vm8, %v150_v5  ;;  %v459_v25 = vpop.permute.xlu1 %458 }
 0x214   :  { %2696 = vmatmul.msk.f32.vlgmr.msrb.gmra.mxu2 %vm151_vm8, %v284_v4 }
 0x216   :  { %2681 = vmatmul.msk.f32.vlgmr.msrb.gmra.mxu0 %vm151_vm8, %v3230_v56  ;;  %2709 = vmatmul.msk.bf16.vlgmr.msrb.gmra.mxu1 %vm41_vm0, %v3221_v53 }
 0x217   :  { %557 = vmatpush.bf16.msra.mxu1 %v2922_v2 }
 0x21b   :  { %558 = vmatpush.bf16.msra.mxu1 %v2921_v3  ;;  %v457_v27 = vpop.permute.xlu1 %456 }
 0x226   :  { %2730 = vmatmul.msk.bf16.vlgmr.msra.gmra.mxu1 %vm41_vm0, %v3221_v53 }
 0x281   :  { %v200_v11 = vpop.f32.mrf.mxu2 }
 0x282   :  { %v201_v23 = vadd.f32 %v200_v11, %v3282_v18 }
 0x284   :  { %v206_v26 = vsel %vm151_vm8, %v201_v23, -inf }
 0x28b   :  { %v280_v8 = vpop.f32.mrf.mxu1 }
 0x28c   :  { %v281_v38 = vadd.f32 %v280_v8, %v3279_v13 }
 0x28e   :  { %v311_v39 = vsel %vm151_vm8, %v281_v38, -inf }
 0x293   :  { %v173_v14 = vpop.f32.mrf.mxu0  ;;  %v359_v15 = vpop.f32.mrf.mxu1 }
 0x294   :  { %v174_v17 = vadd.f32 %v173_v14, %v3279_v13  ;;  %382 = vmatpush.msra.mxu2 %v359_v15 }
 0x296   :  { %451 = vmatpush.msrb.mxu2 %v252_v16  ;;  %v203_v20 = vsel %vm151_vm8, %v174_v17, -inf }
 0x297   :  { %v308_v19 = vpop.f32.mrf.mxu2  ;;  %204 = vmax.xlane.f32.xlu1 %v203_v20 }
 0x298   :  { %v309_v21 = vadd.f32 %v308_v19, %v3282_v18 }
 0x29a   :  { %v314_v22 = vsel %vm151_vm8, %v309_v21, -inf }
 0x29b   :  { %315 = vmax.xlane.f32.xlu2 %v314_v22  ;;  %v361_v24 = vpop.f32.mrf.mxu1 }
 0x29c   :  { %405 = vmatpush.msra.mxu0 %v361_v24 }
 0x29e   :  { %2714 = vmatpush.xpose.msk.msrb.mxu0 %vm151_vm8, %v459_v25 }
 0x29f   :  { %207 = vmax.xlane.f32.xlu1 %v206_v26 }
 0x2a3   :  { %v560_v41 = vpop.f32.mrf.mxu1 }
 0x2ab   :  { %v562_v47 = vpop.f32.mrf.mxu1 }
 0x30a   :  { %v205_v28 = vpop.xlane.xlu1 %204 }
 0x30b   :  { %v209_v29 = vsub.f32 %v174_v17, %v205_v28 }
 0x30d   :  { %v211_v30 = vmul.f32 1.442695, %v209_v29 }
 0x30e   :  { %v316_v31 = vpop.xlane.xlu2 %315 }
 0x30f   :  { %v318_v32 = vsub.f32 %v309_v21, %v316_v31  ;;  %3001 = vpow2.f32 %v211_v30 }
 0x311   :  { %v321_v33 = vmul.f32 1.442695, %v318_v32 }
 0x312   :  { %v208_v50 = vpop.xlane.xlu1 %207 }
 0x313   :  { %3003 = vpow2.f32 %v321_v33  ;;  %v210_v57 = vsub.f32 %v201_v23, %v208_v50 }
 0x315   :  { %v3002_v34 = vpop.eup %3001  ;;  %v213_v60 = vmul.f32 1.442695, %v210_v57 }
 0x316   :  { %v215_v35 = vsel %vm151_vm8, %v3002_v34, 0.0 }
 0x317   :  { %216 = vadd.xlane.f32.xlu2 %v215_v35 }
 0x319   :  { %v3004_v36 = vpop.eup %3003 }
 0x31a   :  { %v326_v37 = vsel %vm151_vm8, %v3004_v36, 0.0 }
 0x31b   :  { %327 = vadd.xlane.f32.xlu0 %v326_v37  ;;  %v2923_v37 = vld [vmem:[%s3975_s4 + $0x30] sm:$0xff] }
 0x32f   :  { %486 = vrot.lane.b32.xlu0 %v3234_v59, %s3120_s13  ;;  %484 = vrot.lane.b32.xlu2 %v3234_v59, %s3121_s14 }
 0x359   :  { %312 = vmax.xlane.f32.xlu0 %v311_v39 }
 0x36d   :  { %613 = vrot.lane.b32.xlu0 %v3230_v56, %s3122_s24 }
 0x38a   :  { %v217_v40 = vpop.xlane.xlu2 %216 }
 0x38b   :  { %3005 = vrcp.f32 %v217_v40 }
 0x38e   :  { %v328_v42 = vpop.xlane.xlu0 %327 }
 0x38f   :  { %3007 = vrcp.f32 %v328_v42 }
 0x391   :  { %v3006_v43 = vpop.eup %3005 }
 0x392   :  { %v223_v44 = vmul.f32 %v3006_v43, %v3002_v34  ;;  %v485_v49 = vpop.permute.xlu2 %484 }
 0x394   :  { %2712 = vmatmul.msk.f32.vlgmr.msrb.gmra.mxu3 %vm151_vm8, %v223_v44 }
 0x395   :  { %v3008_v45 = vpop.eup %3007 }
 0x396   :  { %v332_v46 = vmul.f32 %v3008_v45, %v3004_v36  ;;  %v2924_v36 = vld [vmem:[%s3975_s4 + $0x38] sm:$0xff] }
 0x398   :  { %2711 = vmatmul.msk.f32.vlgmr.msra.gmra.mxu0 %vm151_vm8, %v332_v46 }
 0x399   :  { %606 = vmatpush.msra.mxu0 %v562_v47 }
 0x3a0   :  { %2715 = vmatmul.msk.f32.vlgmr.msrb.gmra.mxu0 %vm151_vm8, %v457_v27 }
 0x3a1   :  { %v487_v48 = vpop.permute.xlu0 %486  ;;  %714 = vmatpush.bf16.msrb.mxu0 %v2924_v36 }
 0x3a2   :  { %2716 = vmatpush.xpose.msk.msra.mxu3 %vm151_vm8, %v487_v48 }
 0x3a5   :  { %2717 = vmatmul.msk.f32.vlgmr.msra.gmra.mxu3 %vm151_vm8, %v485_v49  ;;  %715 = vmatpush.bf16.msrb.mxu0 %v2923_v37 }
 0x3cc   :  { %v313_v54 = vpop.xlane.xlu0 %312 }
 0x3cd   :  { %v317_v55 = vsub.f32 %v281_v38, %v313_v54 }
 0x3cf   :  { %v319_v58 = vmul.f32 1.442695, %v317_v55 }
 0x3d1   :  { %3009 = vpow2.f32 %v319_v58 }
 0x3d2   :  { %3011 = vpow2.f32 %v213_v60 }
 0x3d7   :  { %v3010_v61 = vpop.eup %3009 }
 0x3d8   :  { %v323_v62 = vsel %vm151_vm8, %v3010_v61, 0.0  ;;  %v3012_v63 = vpop.eup %3011 }
 0x3d9   :  { %324 = vadd.xlane.f32.xlu1 %v323_v62  ;;  %v218_v0 = vsel %vm151_vm8, %v3012_v63, 0.0 }
 0x3df   :  { %v614_v17 = vpop.permute.xlu0 %613 }
 0x3e1   :  { %219 = vadd.xlane.f32.xlu1 %v218_v0 }
 0x3fa   :  { %615 = vrot.lane.b32.xlu1 %v3230_v56, %s3123_s25 }
 0x415   :  { %v3309_v1 = vpop.f32.mrf.mxu0 }
 0x417   :  { %v3312_v4 = vpop.f32.mrf.mxu3 }
 0x41d   :  { %v481_v2 = vpop.f32.mrf.mxu0 }
 0x41e   :  { %v482_v3 = vadd.f32 %v481_v2, %v3279_v13 }
 0x420   :  { %v512_v5 = vsel %vm151_vm8, %v482_v3, -inf }
 0x421   :  { %513 = vmax.xlane.f32.xlu2 %v512_v5 }
 0x428   :  { %v509_v6 = vpop.f32.mrf.mxu3 }
 0x429   :  { %v510_v7 = vadd.f32 %v509_v6, %v3282_v18  ;;  %v2979_v6 = vld [vmem:[%s3978_s7 + $0x1] ss:$0 sm:$0xff] }
 0x42b   :  { %v515_v8 = vsel %vm151_vm8, %v510_v7, -inf }
 0x42c   :  { %516 = vmax.xlane.f32.xlu0 %v515_v8 }
 0x439   :  { %643 = vrot.lane.b32.xlu2 %v3234_v59, %s3123_s25 }
 0x44c   :  { %v325_v56 = vpop.xlane.xlu1 %324 }
 0x44d   :  { %3013 = vrcp.f32 %v325_v56 }
 0x453   :  { %v3014_v9 = vpop.eup %3013 }
 0x454   :  { %v331_v11 = vmul.f32 %v3014_v9, %v3010_v61  ;;  %v220_v12 = vpop.xlane.xlu1 %219 }
 0x455   :  { %3015 = vrcp.f32 %v220_v12 }
 0x456   :  { %2710 = vmatmul.msk.f32.vlgmr.msra.gmra.mxu2 %vm151_vm8, %v331_v11 }
 0x457   :  { %583 = vmatpush.msra.mxu2 %v560_v41 }
 0x45b   :  { %v3016_v14 = vpop.eup %3015 }
 0x45c   :  { %v224_v15 = vmul.f32 %v3016_v14, %v3012_v63 }
 0x45e   :  { %2713 = vmatmul.msk.f32.vlgmr.msrb.gmra.mxu2 %vm151_vm8, %v224_v15 }
 0x46c   :  { %v616_v16 = vpop.permute.xlu1 %615 }
 0x46d   :  { %2733 = vmatpush.xpose.msk.msrb.mxu3 %vm151_vm8, %v616_v16 }
 0x470   :  { %2734 = vmatmul.msk.f32.vlgmr.msrb.gmra.mxu3 %vm151_vm8, %v614_v17 }
 0x494   :  { %v514_v19 = vpop.xlane.xlu2 %513 }
 0x495   :  { %v518_v20 = vsub.f32 %v482_v3, %v514_v19 }
 0x497   :  { %v520_v21 = vmul.f32 1.442695, %v518_v20 }
 0x499   :  { %3017 = vpow2.f32 %v520_v21 }
 0x49c   :  { %v644_v22 = vpop.permute.xlu2 %643 }
 0x49d   :  { %2735 = vmatpush.xpose.msk.msrb.mxu2 %vm151_vm8, %v644_v22 }
 0x49f   :  { %v3018_v23 = vpop.eup %3017  ;;  %v517_v25 = vpop.xlane.xlu0 %516 }
 0x4a0   :  { %v524_v24 = vsel %vm151_vm8, %v3018_v23, 0.0  ;;  %v519_v26 = vsub.f32 %v510_v7, %v517_v25 }
 0x4a1   :  { %525 = vadd.xlane.f32.xlu1 %v524_v24 }
 0x4a2   :  { %v522_v27 = vmul.f32 1.442695, %v519_v26 }
 0x4a4   :  { %3019 = vpow2.f32 %v522_v27 }
 0x4aa   :  { %v3020_v28 = vpop.eup %3019 }
 0x4ab   :  { %v527_v29 = vsel %vm151_vm8, %v3020_v28, 0.0 }
 0x4ba   :  { %641 = vrot.lane.b32.xlu1 %v3234_v59, %s3122_s24 }
 0x4d9   :  { %v384_v46 = vpop.f32.mrf.mxu2 }
 0x4da   :  { %v431_v48 = vadd.f32 %v3312_v4, %v384_v46 }
 0x4e1   :  { %v453_v47 = vpop.f32.mrf.mxu2 }
 0x4e2   :  { %v454_v22 = vadd.f32 %v453_v47, %v3309_v1 }
 0x4e4   :  { %528 = vadd.xlane.f32.xlu1 %v527_v29 }
 0x4f3   :  { %v638_v30 = vpop.f32.mrf.mxu3 }
 0x4f4   :  { %v639_v31 = vadd.f32 %v638_v30, %v3279_v13 }
 0x4f6   :  { %v669_v32 = vsel %vm151_vm8, %v639_v31, -inf }
 0x4f7   :  { %670 = vmax.xlane.f32.xlu2 %v669_v32 }
 0x514   :  { %v526_v33 = vpop.xlane.xlu1 %525 }
 0x515   :  { %3021 = vrcp.f32 %v526_v33 }
 0x51b   :  { %v3022_v34 = vpop.eup %3021 }
 0x51c   :  { %v532_v35 = vmul.f32 %v3022_v34, %v3018_v23 }
 0x51e   :  { %2731 = vmatmul.msk.f32.vlgmr.msra.gmra.mxu2 %vm151_vm8, %v532_v35 }
 0x52c   :  { %v642_v59 = vpop.permute.xlu1 %641 }
 0x52d   :  { %2736 = vmatmul.msk.f32.vlgmr.msrb.gmra.mxu2 %vm151_vm8, %v642_v59  ;;  %v2925_v59 = vld [vmem:[%s3976_s5] sm:$0xff] }
 0x557   :  { %v529_v38 = vpop.xlane.xlu1 %528 }
 0x558   :  { %3023 = vrcp.f32 %v529_v38 }
 0x55e   :  { %v3024_v39 = vpop.eup %3023 }
 0x55f   :  { %v533_v40 = vmul.f32 %v3024_v39, %v3020_v28 }
 0x561   :  { %2732 = vmatmul.msk.f32.vlgmr.msra.gmra.mxu0 %vm151_vm8, %v533_v40 }
 0x569   :  { %2749 = vmatmul.msk.bf16.vlgmr.msrb.gmra.mxu0 %vm41_vm0, %v3221_v53 }
 0x56a   :  { %v671_v41 = vpop.xlane.xlu2 %670 }
 0x56b   :  { %v675_v42 = vsub.f32 %v639_v31, %v671_v41 }
 0x56d   :  { %v677_v43 = vmul.f32 1.442695, %v675_v42 }
 0x56f   :  { %3025 = vpow2.f32 %v677_v43 }
 0x575   :  { %v3026_v44 = vpop.eup %3025 }
 0x576   :  { %v681_v45 = vsel %vm151_vm8, %v3026_v44, 0.0 }
 0x577   :  { %682 = vadd.xlane.f32.xlu1 %v681_v45 }
 0x5a1   :  { %v585_v49 = vpop.f32.mrf.mxu2 }
 0x5a2   :  { %v611_v50 = vadd.f32 %v585_v49, %v431_v48 }
 0x5b0   :  { %v666_v54 = vpop.f32.mrf.mxu2 }
 0x5b1   :  { %v667_v55 = vadd.f32 %v666_v54, %v3282_v18 }
 0x5b3   :  { %v672_v57 = vsel %vm151_vm8, %v667_v55, -inf }
 0x5b4   :  { %673 = vmax.xlane.f32.xlu0 %v672_v57 }
 0x5de   :  { %v608_v53 = vpop.f32.mrf.mxu0 }
 0x5e6   :  { %v717_v58 = vpop.f32.mrf.mxu0 }
 0x5e7   :  { %740 = vmatpush.msra.mxu3 %v717_v58 }
 0x5ea   :  { %v683_v60 = vpop.xlane.xlu1 %682 }
 0x5eb   :  { %3027 = vrcp.f32 %v683_v60 }
 0x5ee   :  { %v719_v61 = vpop.f32.mrf.mxu0 }
 0x5ef   :  { %763 = vmatpush.msrb.mxu1 %v719_v61 }
 0x5f1   :  { %v3028_v62 = vpop.eup %3027 }
 0x5f2   :  { %v689_v63 = vmul.f32 %v3028_v62, %v3026_v44 }
 0x5f4   :  { %2750 = vmatmul.msk.f32.vlgmr.msra.gmra.mxu3 %vm151_vm8, %v689_v63 }
 0x627   :  { %v674_v0 = vpop.xlane.xlu0 %673 }
 0x628   :  { %v676_v2 = vsub.f32 %v667_v55, %v674_v0 }
 0x62a   :  { %v679_v3 = vmul.f32 1.442695, %v676_v2  ;;  %v2930_v2 = vld [vmem:[%s3977_s6 + $0x18] sm:$0xff] }
 0x62b   :  { %925 = vmatpush.bf16.msra.mxu0 %v2930_v2 }
 0x62c   :  { %3029 = vpow2.f32 %v679_v3  ;;  %v2929_v3 = vld [vmem:[%s3977_s6 + $0x10] sm:$0xff] }
 0x62f   :  { %926 = vmatpush.bf16.msra.mxu0 %v2929_v3 }
 0x632   :  { %v3030_v4 = vpop.eup %3029 }
 0x633   :  { %v684_v5 = vsel %vm151_vm8, %v3030_v4, 0.0 }
 0x634   :  { %685 = vadd.xlane.f32.xlu0 %v684_v5  ;;  %v2927_v5 = vld [vmem:[%s3977_s6] sm:$0xff] }
 0x677   :  { %v742_v7 = vpop.f32.mrf.mxu3 }
 0x678   :  { %v768_v8 = vadd.f32 %v742_v7, %v611_v50  ;;  %v2980_v50 = vld [vmem:[%s3978_s7 + $0x2] ss:$0 sm:$0xff] }
 0x67a   :  { %v772_v56 = vadd.f32 %v2979_v6, %v768_v8 }
 0x67c   :  { %v774_v9 = vadd.f32 %v772_v56, %v3215_v51  ;;  %v612_v51 = vadd.f32 %v608_v53, %v454_v22  ;;  %v2981_v53 = vld [vmem:[%s3978_s7 + $0x3] ss:$0 sm:$0xff] }
 0x67e   :  { %v778_v11 = vsel %vm41_vm0, %v774_v9, 0.0 }
 0x67f   :  { %779 = vadd.xlane.f32.xlu2 %v778_v11 }
 0x6a7   :  { %v686_v12 = vpop.xlane.xlu0 %685 }
 0x6a8   :  { %3031 = vrcp.f32 %v686_v12 }
 0x6ae   :  { %v3032_v14 = vpop.eup %3031 }
 0x6af   :  { %v690_v15 = vmul.f32 %v3032_v14, %v3030_v4  ;;  %v2928_v4 = vld [vmem:[%s3977_s6 + $0x8] sm:$0xff] }
 0x6b0   :  { %927 = vmatpush.bf16.msra.mxu0 %v2928_v4 }
 0x6b1   :  { %2751 = vmatmul.msk.f32.vlgmr.msrb.gmra.mxu1 %vm151_vm8, %v690_v15 }
 0x6b4   :  { %928 = vmatpush.bf16.msra.mxu0 %v2927_v5 }
 0x6f2   :  { %v780_v16 = vpop.xlane.xlu2 %779 }
 0x6f3   :  { %v784_v17 = vmul.f32 %v780_v16, %v3189_v10 }
 0x6f5   :  { %v786_v19 = vsub.f32 %v774_v9, %v784_v17 }
 0x6f7   :  { %v788_v20 = vmul.f32 %v786_v19, %v786_v19 }
 0x6f9   :  { %v790_v21 = vsel %vm41_vm0, %v788_v20, 0.0 }
 0x6fa   :  { %791 = vadd.xlane.f32.xlu0 %v790_v21 }
 0x72e   :  { %v765_v23 = vpop.f32.mrf.mxu1 }
 0x72f   :  { %v769_v24 = vadd.f32 %v765_v23, %v612_v51 }
 0x731   :  { %v773_v25 = vadd.f32 %v2979_v6, %v769_v24  ;;  %v2982_v6 = vld [vmem:[%s3978_s7 + $0x4] ss:$0 sm:$0xff] }
 0x733   :  { %v775_v26 = vadd.f32 %v773_v25, %v3217_v52  ;;  %v2926_v52 = vld [vmem:[%s3976_s5 + $0x8] sm:$0xff] }
 0x734   :  { %856 = vmatpush.bf16.msra.mxu2 %v2926_v52 }
 0x735   :  { %v781_v27 = vsel %vm41_vm0, %v775_v26, 0.0 }
 0x736   :  { %782 = vadd.xlane.f32.xlu1 %v781_v27 }
 0x738   :  { %857 = vmatpush.bf16.msra.mxu2 %v2925_v59 }
 0x76d   :  { %v792_v33 = vpop.xlane.xlu0 %791 }
 0x76e   :  { %v796_v1 = vmul.f32 %v792_v33, %v3189_v10 }
 0x770   :  { %v798_v34 = vadd.f32 1e-12, %v796_v1 }
 0x772   :  { %3033 = vrsqrt.f32 %v798_v34  ;;  %vm806_vm10 = vweird.f32 %v798_v34 }
 0x778   :  { %v3034_v35 = vpop.eup %3033 }
 0x779   :  { %v801_v36 = vmul.f32 %v3034_v35, %v798_v34  ;;  %vm807_vm9 = vweird.f32 %v3034_v35 }
 0x77a   :  { %vm808_vm11 = vmor %vm806_vm10, %vm807_vm9 }
 0x77b   :  { %v802_v37 = vmul.f32 %v3034_v35, %v801_v36 }
 0x77d   :  { %v803_v41 = vmul.f32 0.5, %v802_v37 }
 0x77f   :  { %v804_v42 = vsub.f32 1.5, %v803_v41 }
 0x781   :  { %v805_v44 = vmul.f32 %v3034_v35, %v804_v42 }
 0x783   :  { %v809_v47 = vsel %vm808_vm11, %v3034_v35, %v805_v44 }
 0x784   :  { %v820_v54 = vmul.f32 %v809_v47, %v786_v19  ;;  %v2932_v47 = vld [vmem:[%s3974_s3 + $0x18] sm:$0xff] }
 0x785   :  { %1019 = vmatpush.bf16.msrb.mxu3 %v2932_v47 }
 0x786   :  { %v823_v58 = vmul.f32 %v2980_v50, %v820_v54 }
 0x788   :  { %v826_v62 = vadd.f32 %v2981_v53, %v823_v58  ;;  %v2935_v58 = vld [vmem:[%s3975_s4 + $0x50] sm:$0xff] }
 0x7a9   :  { %v783_v28 = vpop.xlane.xlu1 %782 }
 0x7aa   :  { %v785_v29 = vmul.f32 %v783_v28, %v3189_v10 }
 0x7ac   :  { %v787_v30 = vsub.f32 %v775_v26, %v785_v29 }
 0x7ae   :  { %v789_v31 = vmul.f32 %v787_v30, %v787_v30 }
 0x7b0   :  { %v793_v32 = vsel %vm41_vm0, %v789_v31, 0.0  ;;  %v2983_v31 = vld [vmem:[%s3978_s7 + $0x5] ss:$0 sm:$0xff] }
 0x7b1   :  { %794 = vadd.xlane.f32.xlu2 %v793_v32 }
 0x824   :  { %v795_v38 = vpop.xlane.xlu2 %794 }
 0x825   :  { %v797_v39 = vmul.f32 %v795_v38, %v3189_v10 }
 0x827   :  { %v799_v40 = vadd.f32 1e-12, %v797_v39 }
 0x829   :  { %3035 = vrsqrt.f32 %v799_v40  ;;  %vm816_vm13 = vweird.f32 %v799_v40 }
 0x82f   :  { %v3036_v43 = vpop.eup %3035 }
 0x830   :  { %v811_v45 = vmul.f32 %v3036_v43, %v799_v40  ;;  %vm817_vm12 = vweird.f32 %v3036_v43 }
 0x831   :  { %vm818_vm14 = vmor %vm816_vm13, %vm817_vm12 }
 0x832   :  { %v812_v46 = vmul.f32 %v3036_v43, %v811_v45 }
 0x834   :  { %v813_v48 = vmul.f32 0.5, %v812_v46 }
 0x836   :  { %v814_v49 = vsub.f32 1.5, %v813_v48  ;;  %v2934_v48 = vld [vmem:[%s3975_s4 + $0x48] sm:$0xff] }
 0x837   :  { %1126 = vmatpush.bf16.msrb.mxu2 %v2934_v48 }
 0x838   :  { %v815_v55 = vmul.f32 %v3036_v43, %v814_v49  ;;  %v2936_v49 = vld [vmem:[%s3975_s4 + $0x58] sm:$0xff] }
 0x839   :  { %1235 = vmatpush.bf16.msrb.mxu0 %v2936_v49 }
 0x83a   :  { %v819_v57 = vsel %vm818_vm14, %v3036_v43, %v815_v55 }
 0x83b   :  { %v821_v60 = vmul.f32 %v819_v57, %v787_v30  ;;  %v2931_v57 = vld [vmem:[%s3974_s3 + $0x10] sm:$0xff] }
 0x83c   :  { %1020 = vmatpush.bf16.msrb.mxu3 %v2931_v57 }
 0x83d   :  { %v824_v61 = vmul.f32 %v2980_v50, %v821_v60  ;;  %1236 = vmatpush.bf16.msrb.mxu0 %v2935_v58 }
 0x83f   :  { %v827_v63 = vadd.f32 %v2981_v53, %v824_v61  ;;  %v2933_v53 = vld [vmem:[%s3975_s4 + $0x40] sm:$0xff]  ;;  %v2938_v61 = vld [vmem:[%s3975_s4 + $0x68] sm:$0xff] }
 0x840   :  { %1127 = vmatpush.bf16.msrb.mxu2 %v2933_v53 }
 0x841   :  { %v828_v0 = vpack.c.bf16 %v827_v63, %v826_v62 }
 0x843   :  { %2760 = vmatmul.msk.bf16.vlgmr.msra.gmra.mxu2 %vm41_vm0, %v828_v0 }
 0x8c6   :  { %v859_v7 = vpop.f32.mrf.mxu2 }
 0x8c7   :  { %v860_v8 = vadd.f32 %v2982_v6, %v859_v7 }
 0x8c9   :  { %v866_v56 = vmul.f32 0.044715, %v860_v8  ;;  %v864_v25 = vmul.f32 0.5, %v860_v8 }
 0x8cb   :  { %v868_v9 = vmul.f32 %v866_v56, %v860_v8 }
 0x8cd   :  { %v870_v11 = vmul.f32 %v868_v9, %v860_v8 }
 0x8ce   :  { %v861_v12 = vpop.f32.mrf.mxu2 }
 0x8cf   :  { %v872_v14 = vadd.f32 %v870_v11, %v860_v8  ;;  %v862_v15 = vadd.f32 %v2982_v6, %v861_v12 }
 0x8d1   :  { %v867_v16 = vmul.f32 0.044715, %v862_v15  ;;  %v874_v17 = vmul.f32 0.7978846, %v872_v14  ;;  %v865_v26 = vmul.f32 0.5, %v862_v15 }
 0x8d3   :  { %v869_v19 = vmul.f32 %v867_v16, %v862_v15  ;;  %3037 = vtanh.f32 %v874_v17 }
 0x8d5   :  { %v871_v20 = vmul.f32 %v869_v19, %v862_v15 }
 0x8d7   :  { %v873_v21 = vadd.f32 %v871_v20, %v862_v15  ;;  %v2984_v15 = vld [vmem:[%s3978_s7 + $0x6] ss:$0 sm:$0xff]  ;;  %v2985_v20 = vld [vmem:[%s3978_s7 + $0x7] ss:$0 sm:$0xff] }
 0x8d9   :  { %v875_v22 = vmul.f32 0.7978846, %v873_v21  ;;  %v3038_v51 = vpop.eup %3037 }
 0x8da   :  { %v878_v23 = vadd.f32 1.0, %v3038_v51 }
 0x8db   :  { %3039 = vtanh.f32 %v875_v22 }
 0x8dc   :  { %v880_v28 = vmul.f32 %v878_v23, %v864_v25 }
 0x8e1   :  { %v3040_v24 = vpop.eup %3039 }
 0x8e2   :  { %v879_v27 = vadd.f32 1.0, %v3040_v24 }
 0x8e4   :  { %v881_v29 = vmul.f32 %v879_v27, %v865_v26  ;;  %v2986_v26 = vld [vmem:[%s3978_s7 + $0x8] ss:$0 sm:$0xff] }
 0x8e6   :  { %v882_v30 = vpack.c.bf16 %v881_v29, %v880_v28 }
 0x8e8   :  { %2777 = vmatmul.msk.bf16.vlgmr.msra.gmra.mxu0 %vm917_vm15, %v882_v30 }
 0x8e9   :  { %1436 = vmatpush.bf16.msra.mxu0 %v2938_v61 }
 0x965   :  { %v930_v32 = vpop.f32.mrf.mxu0 }
 0x966   :  { %v931_v33 = vadd.f32 %v2983_v31, %v930_v32 }
 0x968   :  { %v935_v1 = vadd.f32 %v931_v33, %v826_v62 }
 0x96a   :  { %v939_v34 = vsel %vm41_vm0, %v935_v1, 0.0 }
 0x96b   :  { %940 = vadd.xlane.f32.xlu1 %v939_v34 }
 0x96d   :  { %v932_v52 = vpop.f32.mrf.mxu0 }
 0x96e   :  { %v933_v35 = vadd.f32 %v2983_v31, %v932_v52 }
 0x970   :  { %v936_v59 = vadd.f32 %v933_v35, %v827_v63  ;;  %v2937_v63 = vld [vmem:[%s3975_s4 + $0x60] sm:$0xff] }
 0x971   :  { %1437 = vmatpush.bf16.msra.mxu0 %v2937_v63 }
 0x972   :  { %v942_v36 = vsel %vm41_vm0, %v936_v59, 0.0 }
 0x973   :  { %943 = vadd.xlane.f32.xlu0 %v942_v36 }
 0x9de   :  { %v941_v37 = vpop.xlane.xlu1 %940 }
 0x9df   :  { %v945_v38 = vmul.f32 %v941_v37, %v3189_v10 }
 0x9e1   :  { %v947_v39 = vsub.f32 %v935_v1, %v945_v38 }
 0x9e3   :  { %v949_v40 = vmul.f32 %v947_v39, %v947_v39 }
 0x9e5   :  { %v951_v41 = vsel %vm41_vm0, %v949_v40, 0.0 }
 0x9e6   :  { %v944_v42 = vpop.xlane.xlu0 %943  ;;  %952 = vadd.xlane.f32.xlu2 %v951_v41 }
 0x9e7   :  { %v946_v43 = vmul.f32 %v944_v42, %v3189_v10 }
 0x9e9   :  { %v948_v44 = vsub.f32 %v936_v59, %v946_v43 }
 0x9eb   :  { %v950_v45 = vmul.f32 %v948_v44, %v948_v44 }
 0x9ed   :  { %v954_v46 = vsel %vm41_vm0, %v950_v45, 0.0 }
 0x9ee   :  { %955 = vadd.xlane.f32.xlu1 %v954_v46 }
 0xa59   :  { %v953_v50 = vpop.xlane.xlu2 %952 }
 0xa5a   :  { %v957_v54 = vmul.f32 %v953_v50, %v3189_v10 }
 0xa5c   :  { %v959_v55 = vadd.f32 1e-12, %v957_v54 }
 0xa5e   :  { %3041 = vrsqrt.f32 %v959_v55  ;;  %vm967_vm2 = vweird.f32 %v959_v55 }
 0xa61   :  { %v956_v60 = vpop.xlane.xlu1 %955 }
 0xa62   :  { %v958_v62 = vmul.f32 %v956_v60, %v3189_v10 }
 0xa64   :  { %v3042_v0 = vpop.eup %3041  ;;  %v960_v2 = vadd.f32 1e-12, %v958_v62 }
 0xa65   :  { %v962_v3 = vmul.f32 %v3042_v0, %v959_v55  ;;  %vm968_vm1 = vweird.f32 %v3042_v0 }
 0xa66   :  { %3043 = vrsqrt.f32 %v960_v2  ;;  %vm969_vm3 = vmor %vm967_vm2, %vm968_vm1  ;;  %vm977_vm5 = vweird.f32 %v960_v2 }
 0xa67   :  { %v963_v4 = vmul.f32 %v3042_v0, %v962_v3 }
 0xa69   :  { %v964_v5 = vmul.f32 0.5, %v963_v4 }
 0xa6b   :  { %v965_v6 = vsub.f32 1.5, %v964_v5 }
 0xa6c   :  { %v3044_v7 = vpop.eup %3043 }
 0xa6d   :  { %v966_v8 = vmul.f32 %v3042_v0, %v965_v6  ;;  %v972_v56 = vmul.f32 %v3044_v7, %v960_v2  ;;  %vm978_vm4 = vweird.f32 %v3044_v7 }
 0xa6e   :  { %vm979_vm6 = vmor %vm977_vm5, %vm978_vm4  ;;  %vm1911_vm4 = vcmask 36864   ;;  %vm104_vm5 = vcmask 58368  }
 0xa6f   :  { %v973_v9 = vmul.f32 %v3044_v7, %v972_v56  ;;  %v970_v11 = vsel %vm969_vm3, %v3042_v0, %v966_v8 }
 0xa70   :  { %v981_v16 = vmul.f32 %v970_v11, %v947_v39 }
 0xa71   :  { %v974_v12 = vmul.f32 0.5, %v973_v9 }
 0xa72   :  { %v984_v21 = vmul.f32 %v2984_v15, %v981_v16 }
 0xa73   :  { %v975_v14 = vsub.f32 1.5, %v974_v12 }
 0xa74   :  { %v3432_v23 = vadd.f32 %v2985_v20, %v984_v21 }
 0xa75   :  { %v976_v17 = vmul.f32 %v3044_v7, %v975_v14 }
 0xa77   :  { %v980_v19 = vsel %vm979_vm6, %v3044_v7, %v976_v17 }
 0xa78   :  { %v982_v22 = vmul.f32 %v980_v19, %v948_v44 }
 0xa7a   :  { %v985_v51 = vmul.f32 %v2984_v15, %v982_v22 }
 0xa7c   :  { %v3434_v24 = vadd.f32 %v2985_v20, %v985_v51 }
 0xa7e   :  { %v3438_v25 = vpack.c.bf16 %v3434_v24, %v3432_v23 }
 0xa80   :  { %2791 = vmatmul.msk.bf16.vlgmr.msrb.gmra.mxu3 %vm41_vm0, %v3438_v25  ;;  %2808 = vmatmul.msk.bf16.vlgmr.msrb.gmra.mxu2 %vm41_vm0, %v3438_v25 }
 0xa81   :  { %2825 = vmatmul.msk.bf16.vlgmr.msrb.gmra.mxu0 %vm41_vm0, %v3438_v25 }
 0xa91   :  { %2846 = vmatmul.msk.bf16.vlgmr.msra.gmra.mxu0 %vm41_vm0, %v3438_v25 }
 0xafe   :  { %v1238_v1 = vpop.f32.mrf.mxu0 }
 0xb03   :  { %v1022_v27 = vpop.f32.mrf.mxu3  ;;  %v1129_v28 = vpop.f32.mrf.mxu2 }
 0xb04   :  { %v3451_v29 = vadd.f32 %v2986_v26, %v1022_v27  ;;  %1307 = vmatpush.msra.mxu2 %v1129_v28 }
 0xb06   :  { %1028 = vrot.lane.b32.xlu0 %v3451_v29, %s3119_s12  ;;  %v1240_v35 = vpop.f32.mrf.mxu0 }
 0xb0b   :  { %v1024_v30 = vpop.f32.mrf.mxu3  ;;  %v1131_v37 = vpop.f32.mrf.mxu2 }
 0xb0c   :  { %v3455_v31 = vadd.f32 %v2986_v26, %v1024_v30 }
 0xb0e   :  { %1164 = vrot.lane.b32.xlu1 %v3455_v31, %s3117_s30  ;;  %1055 = vrot.lane.b32.xlu2 %v3455_v31, %s3119_s12  ;;  %v1439_v12 = vpop.f32.mrf.mxu0 }
 0xb0f   :  { %1162 = vrot.lane.b32.xlu0 %v3455_v31, %s3118_s11 }
 0xb16   :  { %1134 = vrot.lane.b32.xlu1 %v3451_v29, %s3118_s11  ;;  %v1441_v19 = vpop.f32.mrf.mxu0 }
 0xb17   :  { %1136 = vrot.lane.b32.xlu0 %v3451_v29, %s3117_s30 }
 0xb1e   :  { %1337 = vrot.lane.b32.xlu1 %v3451_v29, %s3120_s13 }
 0xb26   :  { %1335 = vrot.lane.b32.xlu1 %v3451_v29, %s3121_s14 }
 0xb68   :  { %v1056_v33 = vpop.permute.xlu2 %1055 }
 0xb78   :  { %v1029_v32 = vpop.permute.xlu0 %1028 }
 0xb79   :  { %2792 = vmatpush.xpose.msk.msra.mxu1 %vm151_vm8, %v1029_v32 }
 0xb7c   :  { %2793 = vmatmul.msk.f32.vlgmr.msra.gmra.mxu1 %vm151_vm8, %v3451_v29 }
 0xb7d   :  { %2794 = vmatpush.xpose.msk.msrb.mxu1 %vm151_vm8, %v1056_v33 }
 0xb80   :  { %v1165_v34 = vpop.permute.xlu1 %1164 }
 0xb81   :  { %v1163_v52 = vpop.permute.xlu0 %1162  ;;  %2811 = vmatpush.xpose.msk.msra.mxu1 %vm151_vm8, %v1165_v34 }
 0xb84   :  { %2795 = vmatmul.msk.f32.vlgmr.msrb.gmra.mxu1 %vm151_vm8, %v3455_v31 }
 0xb85   :  { %1284 = vmatpush.msrb.mxu1 %v1240_v35 }
 0xb88   :  { %v1135_v59 = vpop.permute.xlu1 %1134 }
 0xb89   :  { %v1137_v36 = vpop.permute.xlu0 %1136 }
 0xb8a   :  { %2809 = vmatpush.xpose.msk.msra.mxu3 %vm151_vm8, %v1137_v36 }
 0xb8c   :  { %2812 = vmatmul.msk.f32.vlgmr.msra.gmra.mxu1 %vm151_vm8, %v1163_v52 }
 0xb8d   :  { %2810 = vmatmul.msk.f32.vlgmr.msra.gmra.mxu3 %vm151_vm8, %v1135_v59 }
 0xb8e   :  { %1261 = vmatpush.msrb.mxu3 %v1238_v1 }
 0xb90   :  { %1330 = vmatpush.msra.mxu3 %v1131_v37  ;;  %v1338_v38 = vpop.permute.xlu1 %1337 }
 0xb91   :  { %2830 = vmatpush.xpose.msk.msra.mxu1 %vm151_vm8, %v1338_v38 }
 0xb98   :  { %v1336_v49 = vpop.permute.xlu1 %1335 }
 0xbf9   :  { %v1051_v39 = vpop.f32.mrf.mxu1 }
 0xbfa   :  { %v1052_v40 = vadd.f32 %v1051_v39, %v3279_v13 }
 0xbfc   :  { %v1081_v41 = vsel %vm151_vm8, %v1052_v40, -inf }
 0xbfd   :  { %1082 = vmax.xlane.f32.xlu1 %v1081_v41 }
 0xc01   :  { %v1078_v42 = vpop.f32.mrf.mxu1 }
 0xc02   :  { %v1079_v6 = vadd.f32 %v1078_v42, %v3282_v18 }
 0xc04   :  { %v1084_v7 = vsel %vm151_vm8, %v1079_v6, -inf }
 0xc09   :  { %v1187_v43 = vpop.f32.mrf.mxu1 }
 0xc0a   :  { %v1188_v44 = vadd.f32 %v1187_v43, %v3282_v18 }
 0xc0c   :  { %v1193_v45 = vsel %vm151_vm8, %v1188_v44, -inf }
 0xc0d   :  { %1194 = vmax.xlane.f32.xlu2 %v1193_v45 }
 0xc10   :  { %v1159_v46 = vpop.f32.mrf.mxu3 }
 0xc11   :  { %v1160_v47 = vadd.f32 %v1159_v46, %v3279_v13 }
 0xc13   :  { %v1190_v48 = vsel %vm151_vm8, %v1160_v47, -inf }
 0xc14   :  { %1191 = vmax.xlane.f32.xlu1 %v1190_v48 }
 0xc70   :  { %v1083_v50 = vpop.xlane.xlu1 %1082 }
 0xc71   :  { %v1087_v54 = vsub.f32 %v1052_v40, %v1083_v50 }
 0xc73   :  { %v1089_v55 = vmul.f32 1.442695, %v1087_v54 }
 0xc75   :  { %3045 = vpow2.f32 %v1089_v55 }
 0xc7b   :  { %v3046_v57 = vpop.eup %3045 }
 0xc7c   :  { %v1093_v53 = vsel %vm151_vm8, %v3046_v57, 0.0 }
 0xc7d   :  { %1094 = vadd.xlane.f32.xlu2 %v1093_v53 }
 0xc80   :  { %v1195_v58 = vpop.xlane.xlu2 %1194 }
 0xc81   :  { %v1197_v60 = vsub.f32 %v1188_v44, %v1195_v58 }
 0xc83   :  { %v1200_v61 = vmul.f32 1.442695, %v1197_v60 }
 0xc85   :  { %3047 = vpow2.f32 %v1200_v61 }
 0xc87   :  { %v1192_v62 = vpop.xlane.xlu1 %1191 }
 0xc88   :  { %v1196_v63 = vsub.f32 %v1160_v47, %v1192_v62  ;;  %v2940_v62 = vld [vmem:[%s3975_s4 + $0x78] sm:$0xff] }
 0xc8a   :  { %v1198_v0 = vmul.f32 1.442695, %v1196_v63  ;;  %v2939_v63 = vld [vmem:[%s3975_s4 + $0x70] sm:$0xff] }
 0xc8b   :  { %v3048_v2 = vpop.eup %3047 }
 0xc8c   :  { %3049 = vpow2.f32 %v1198_v0  ;;  %v1205_v3 = vsel %vm151_vm8, %v3048_v2, 0.0 }
 0xc8d   :  { %1206 = vadd.xlane.f32.xlu0 %v1205_v3 }
 0xc92   :  { %v3050_v4 = vpop.eup %3049 }
 0xc93   :  { %v1202_v5 = vsel %vm151_vm8, %v3050_v4, 0.0 }
 0xc94   :  { %1203 = vadd.xlane.f32.xlu1 %v1202_v5 }
 0xc95   :  { %1365 = vrot.lane.b32.xlu2 %v3455_v31, %s3120_s13 }
 0xca1   :  { %1363 = vrot.lane.b32.xlu0 %v3455_v31, %s3121_s14 }
 0xccb   :  { %1085 = vmax.xlane.f32.xlu0 %v1084_v7 }
 0xcdf   :  { %1522 = vrot.lane.b32.xlu0 %v3455_v31, %s3123_s25 }
 0xcf0   :  { %v1095_v8 = vpop.xlane.xlu2 %1094 }
 0xcf1   :  { %3051 = vrcp.f32 %v1095_v8 }
 0xcf7   :  { %v3052_v56 = vpop.eup %3051 }
 0xcf8   :  { %v1101_v9 = vmul.f32 %v3052_v56, %v3046_v57  ;;  %v1366_v11 = vpop.permute.xlu2 %1365 }
 0xcf9   :  { %2832 = vmatpush.xpose.msk.msrb.mxu2 %vm151_vm8, %v1366_v11 }
 0xcfa   :  { %2828 = vmatmul.msk.f32.vlgmr.msra.gmra.mxu2 %vm151_vm8, %v1101_v9 }
 0xd00   :  { %v1207_v14 = vpop.xlane.xlu0 %1206 }
 0xd01   :  { %3053 = vrcp.f32 %v1207_v14 }
 0xd07   :  { %v3054_v15 = vpop.eup %3053  ;;  %v1204_v16 = vpop.xlane.xlu1 %1203 }
 0xd08   :  { %v1211_v17 = vmul.f32 %v3054_v15, %v3048_v2  ;;  %3055 = vrcp.f32 %v1204_v16 }
 0xd0a   :  { %2827 = vmatmul.msk.f32.vlgmr.msrb.gmra.mxu1 %vm151_vm8, %v1211_v17 }
 0xd0b   :  { %1485 = vmatpush.msrb.mxu1 %v1441_v19 }
 0xd0e   :  { %v3056_v20 = vpop.eup %3055 }
 0xd0f   :  { %v1210_v21 = vmul.f32 %v3056_v20, %v3050_v4 }
 0xd11   :  { %2826 = vmatmul.msk.f32.vlgmr.msrb.gmra.mxu3 %vm151_vm8, %v1210_v21 }
 0xd12   :  { %1462 = vmatpush.msrb.mxu3 %v1439_v12  ;;  %2831 = vmatmul.msk.f32.vlgmr.msra.gmra.mxu1 %vm151_vm8, %v1336_v49 }
 0xd13   :  { %v1364_v22 = vpop.permute.xlu0 %1363  ;;  %1593 = vmatpush.bf16.msra.mxu1 %v2940_v62 }
 0xd14   :  { %2833 = vmatmul.msk.f32.vlgmr.msrb.gmra.mxu2 %vm151_vm8, %v1364_v22 }
 0xd17   :  { %1594 = vmatpush.bf16.msra.mxu1 %v2939_v63 }
 0xd3e   :  { %v1086_v51 = vpop.xlane.xlu0 %1085 }
 0xd3f   :  { %v1088_v26 = vsub.f32 %v1079_v6, %v1086_v51 }
 0xd41   :  { %v1091_v27 = vmul.f32 1.442695, %v1088_v26 }
 0xd43   :  { %3057 = vpow2.f32 %v1091_v27 }
 0xd49   :  { %v3058_v28 = vpop.eup %3057 }
 0xd4a   :  { %v1096_v30 = vsel %vm151_vm8, %v3058_v28, 0.0 }
 0xd4b   :  { %1097 = vadd.xlane.f32.xlu1 %v1096_v30  ;;  %v2987_v30 = vld [vmem:[%s3978_s7 + $0x9] ss:$0 sm:$0xff] }
 0xd51   :  { %v1523_v40 = vpop.permute.xlu0 %1522 }
 0xd64   :  { %1494 = vrot.lane.b32.xlu1 %v3451_v29, %s3123_s25 }
 0xd7d   :  { %v3510_v33 = vpop.f32.mrf.mxu2 }
 0xd87   :  { %v3508_v32 = vpop.f32.mrf.mxu1 }
 0xd8f   :  { %v1360_v1 = vpop.f32.mrf.mxu1 }
 0xd90   :  { %v1361_v34 = vadd.f32 %v1360_v1, %v3279_v13 }
 0xd92   :  { %v1391_v52 = vsel %vm151_vm8, %v1361_v34, -inf }
 0xd93   :  { %1392 = vmax.xlane.f32.xlu2 %v1391_v52 }
 0xd94   :  { %v1263_v3 = vpop.f32.mrf.mxu3 }
 0xd95   :  { %v1310_v8 = vadd.f32 %v3510_v33, %v1263_v3 }
 0xd97   :  { %v1388_v35 = vpop.f32.mrf.mxu2 }
 0xd98   :  { %v1389_v59 = vadd.f32 %v1388_v35, %v3282_v18 }
 0xd9a   :  { %v1394_v36 = vsel %vm151_vm8, %v1389_v59, -inf }
 0xd9b   :  { %1395 = vmax.xlane.f32.xlu0 %v1394_v36 }
 0xdab   :  { %1492 = vrot.lane.b32.xlu2 %v3451_v29, %s3122_s24 }
 0xdbe   :  { %v1098_v37 = vpop.xlane.xlu1 %1097 }
 0xdbf   :  { %3059 = vrcp.f32 %v1098_v37 }
 0xdc5   :  { %v3060_v38 = vpop.eup %3059 }
 0xdc6   :  { %v1102_v39 = vmul.f32 %v3060_v38, %v3058_v28 }
 0xdc8   :  { %2829 = vmatmul.msk.f32.vlgmr.msra.gmra.mxu3 %vm151_vm8, %v1102_v39 }
 0xdc9   :  { %2851 = vmatpush.xpose.msk.msra.mxu3 %vm151_vm8, %v1523_v40 }
 0xdd6   :  { %v1495_v41 = vpop.permute.xlu1 %1494 }
 0xdd7   :  { %2849 = vmatpush.xpose.msk.msra.mxu2 %vm151_vm8, %v1495_v41 }
 0xe06   :  { %v1393_v42 = vpop.xlane.xlu2 %1392 }
 0xe07   :  { %v1397_v43 = vsub.f32 %v1361_v34, %v1393_v42 }
 0xe09   :  { %v1399_v44 = vmul.f32 1.442695, %v1397_v43 }
 0xe0b   :  { %3061 = vpow2.f32 %v1399_v44 }
 0xe0e   :  { %v1493_v45 = vpop.permute.xlu2 %1492  ;;  %v1396_v47 = vpop.xlane.xlu0 %1395 }
 0xe0f   :  { %2850 = vmatmul.msk.f32.vlgmr.msra.gmra.mxu2 %vm151_vm8, %v1493_v45  ;;  %v1398_v48 = vsub.f32 %v1389_v59, %v1396_v47 }
 0xe11   :  { %v3062_v29 = vpop.eup %3061  ;;  %v1401_v49 = vmul.f32 1.442695, %v1398_v48 }
 0xe12   :  { %v1403_v46 = vsel %vm151_vm8, %v3062_v29, 0.0 }
 0xe13   :  { %1404 = vadd.xlane.f32.xlu1 %v1403_v46  ;;  %3063 = vpow2.f32 %v1401_v49 }
 0xe19   :  { %v3064_v50 = vpop.eup %3063 }
 0xe1a   :  { %v1406_v54 = vsel %vm151_vm8, %v3064_v50, 0.0 }
 0xe2c   :  { %1520 = vrot.lane.b32.xlu1 %v3455_v31, %s3122_s24 }
 0xe4b   :  { %v1332_v6 = vpop.f32.mrf.mxu3 }
 0xe4c   :  { %v1333_v43 = vadd.f32 %v1332_v6, %v3508_v32 }
 0xe56   :  { %1407 = vadd.xlane.f32.xlu1 %v1406_v54 }
 0xe86   :  { %v1405_v55 = vpop.xlane.xlu1 %1404 }
 0xe87   :  { %3065 = vrcp.f32 %v1405_v55 }
 0xe8d   :  { %v3066_v57 = vpop.eup %3065 }
 0xe8e   :  { %v1411_v53 = vmul.f32 %v3066_v57, %v3062_v29 }
 0xe90   :  { %2847 = vmatmul.msk.f32.vlgmr.msrb.gmra.mxu3 %vm151_vm8, %v1411_v53 }
 0xe92   :  { %v1517_v58 = vpop.f32.mrf.mxu2 }
 0xe93   :  { %v1518_v60 = vadd.f32 %v1517_v58, %v3279_v13 }
 0xe95   :  { %v1548_v61 = vsel %vm151_vm8, %v1518_v60, -inf }
 0xe96   :  { %1549 = vmax.xlane.f32.xlu2 %v1548_v61 }
 0xe9e   :  { %v1521_v31 = vpop.permute.xlu1 %1520 }
 0xe9f   :  { %2852 = vmatmul.msk.f32.vlgmr.msra.gmra.mxu3 %vm151_vm8, %v1521_v31 }
 0xec9   :  { %v1408_v0 = vpop.xlane.xlu1 %1407 }
 0xeca   :  { %3067 = vrcp.f32 %v1408_v0 }
 0xed0   :  { %v3068_v2 = vpop.eup %3067 }
 0xed1   :  { %v1412_v13 = vmul.f32 %v3068_v2, %v3064_v50 }
 0xed3   :  { %2848 = vmatmul.msk.f32.vlgmr.msrb.gmra.mxu1 %vm151_vm8, %v1412_v13 }
 0xedb   :  { %2865 = vmatmul.msk.bf16.vlgmr.msra.gmra.mxu1 %vm41_vm0, %v3438_v25 }
 0xf09   :  { %v1550_v4 = vpop.xlane.xlu2 %1549 }
 0xf0a   :  { %v1554_v5 = vsub.f32 %v1518_v60, %v1550_v4  ;;  %v2941_v60 = vld [vmem:[%s3976_s5 + $0x10] sm:$0xff] }
 0xf0c   :  { %v1556_v7 = vmul.f32 1.442695, %v1554_v5 }
 0xf0e   :  { %3069 = vpow2.f32 %v1556_v7 }
 0xf13   :  { %v1464_v56 = vpop.f32.mrf.mxu3 }
 0xf14   :  { %v3070_v9 = vpop.eup %3069  ;;  %v1490_v11 = vadd.f32 %v1464_v56, %v1310_v8 }
 0xf15   :  { %v1560_v12 = vsel %vm151_vm8, %v3070_v9, 0.0 }
 0xf16   :  { %1561 = vadd.xlane.f32.xlu1 %v1560_v12 }
 0xf22   :  { %v1545_v14 = vpop.f32.mrf.mxu3 }
 0xf23   :  { %v1546_v15 = vadd.f32 %v1545_v14, %v3282_v18 }
 0xf25   :  { %v1551_v16 = vsel %vm151_vm8, %v1546_v15, -inf }
 0xf26   :  { %1552 = vmax.xlane.f32.xlu0 %v1551_v16 }
 0xf50   :  { %v1487_v25 = vpop.f32.mrf.mxu1 }
 0xf51   :  { %v1491_v44 = vadd.f32 %v1487_v25, %v1333_v43 }
 0xf58   :  { %v1596_v17 = vpop.f32.mrf.mxu1 }
 0xf59   :  { %1619 = vmatpush.msrb.mxu2 %v1596_v17 }
 0xf60   :  { %v1598_v19 = vpop.f32.mrf.mxu1 }
 0xf61   :  { %1642 = vmatpush.msrb.mxu0 %v1598_v19 }
 0xf89   :  { %v1562_v20 = vpop.xlane.xlu1 %1561 }
 0xf8a   :  { %3071 = vrcp.f32 %v1562_v20 }
 0xf90   :  { %v3072_v21 = vpop.eup %3071 }
 0xf91   :  { %v1568_v22 = vmul.f32 %v3072_v21, %v3070_v9  ;;  %v2988_v9 = vld [vmem:[%s3978_s7 + $0xa] ss:$0 sm:$0xff] }
 0xf93   :  { %2866 = vmatmul.msk.f32.vlgmr.msrb.gmra.mxu2 %vm151_vm8, %v1568_v22  ;;  %v2946_v22 = vld [vmem:[%s3977_s6 + $0x38] sm:$0xff] }
 0xf94   :  { %1805 = vmatpush.bf16.msrb.mxu1 %v2946_v22 }
 0xf99   :  { %v1553_v51 = vpop.xlane.xlu0 %1552 }
 0xf9a   :  { %v1555_v26 = vsub.f32 %v1546_v15, %v1553_v51  ;;  %v2989_v15 = vld [vmem:[%s3978_s7 + $0xb] ss:$0 sm:$0xff]  ;;  %v2945_v51 = vld [vmem:[%s3977_s6 + $0x30] sm:$0xff] }
 0xf9b   :  { %1806 = vmatpush.bf16.msrb.mxu1 %v2945_v51 }
 0xf9c   :  { %v1558_v27 = vmul.f32 1.442695, %v1555_v26  ;;  %v2944_v26 = vld [vmem:[%s3977_s6 + $0x28] sm:$0xff] }
 0xf9e   :  { %3073 = vpow2.f32 %v1558_v27  ;;  %v2990_v27 = vld [vmem:[%s3978_s7 + $0xc] ss:$0 sm:$0xff] }
 0xf9f   :  { %1807 = vmatpush.bf16.msrb.mxu1 %v2944_v26 }
 0xfa4   :  { %v3074_v28 = vpop.eup %3073 }
 0xfa5   :  { %v1563_v18 = vsel %vm151_vm8, %v3074_v28, 0.0 }
 0xfa6   :  { %1564 = vadd.xlane.f32.xlu2 %v1563_v18 }
0x1016   :  { %v1621_v33 = vpop.f32.mrf.mxu2 }
0x1017   :  { %v1647_v1 = vadd.f32 %v1621_v33, %v1490_v11 }
0x1019   :  { %v1651_v34 = vadd.f32 %v2987_v30, %v1647_v1  ;;  %v1565_v52 = vpop.xlane.xlu2 %1564 }
0x101a   :  { %3075 = vrcp.f32 %v1565_v52 }
0x101b   :  { %v1653_v35 = vadd.f32 %v1651_v34, %v3432_v23 }
0x101d   :  { %v1657_v59 = vsel %vm41_vm0, %v1653_v35, 0.0 }
0x101e   :  { %1658 = vadd.xlane.f32.xlu0 %v1657_v59 }
0x1020   :  { %v3076_v36 = vpop.eup %3075 }
0x1021   :  { %v1569_v37 = vmul.f32 %v3076_v36, %v3074_v28  ;;  %v2943_v28 = vld [vmem:[%s3977_s6 + $0x20] sm:$0xff] }
0x1022   :  { %1808 = vmatpush.bf16.msrb.mxu1 %v2943_v28 }
0x1023   :  { %2867 = vmatmul.msk.f32.vlgmr.msrb.gmra.mxu0 %vm151_vm8, %v1569_v37 }
0x1091   :  { %v1659_v38 = vpop.xlane.xlu0 %1658 }
0x1092   :  { %v1663_v39 = vmul.f32 %v1659_v38, %v3189_v10 }
0x1094   :  { %v1665_v40 = vsub.f32 %v1653_v35, %v1663_v39 }
0x1096   :  { %v1667_v41 = vmul.f32 %v1665_v40, %v1665_v40 }
0x1098   :  { %v1669_v42 = vsel %vm41_vm0, %v1667_v41, 0.0 }
0x1099   :  { %1670 = vadd.xlane.f32.xlu2 %v1669_v42 }
0x10a0   :  { %v1644_v45 = vpop.f32.mrf.mxu0 }
0x10a1   :  { %v1648_v23 = vadd.f32 %v1644_v45, %v1491_v44 }
0x10a3   :  { %v1652_v29 = vadd.f32 %v2987_v30, %v1648_v23 }
0x10a5   :  { %v1654_v46 = vadd.f32 %v1652_v29, %v3434_v24  ;;  %v2942_v24 = vld [vmem:[%s3976_s5 + $0x18] sm:$0xff] }
0x10a6   :  { %1736 = vmatpush.bf16.msrb.mxu3 %v2942_v24 }
0x10a7   :  { %v1660_v47 = vsel %vm41_vm0, %v1654_v46, 0.0 }
0x10a8   :  { %1661 = vadd.xlane.f32.xlu1 %v1660_v47 }
0x10aa   :  { %1737 = vmatpush.bf16.msrb.mxu3 %v2941_v60 }
0x110c   :  { %v1671_v57 = vpop.xlane.xlu2 %1670 }
0x110d   :  { %v1675_v32 = vmul.f32 %v1671_v57, %v3189_v10 }
0x110f   :  { %v1677_v53 = vadd.f32 1e-12, %v1675_v32 }
0x1111   :  { %3077 = vrsqrt.f32 %v1677_v53  ;;  %vm1685_vm8 = vweird.f32 %v1677_v53 }
0x1117   :  { %v3078_v58 = vpop.eup %3077 }
0x1118   :  { %v1680_v61 = vmul.f32 %v3078_v58, %v1677_v53  ;;  %vm1686_vm7 = vweird.f32 %v3078_v58 }
0x1119   :  { %vm1687_vm9 = vmor %vm1685_vm8, %vm1686_vm7 }
0x111a   :  { %v1681_v31 = vmul.f32 %v3078_v58, %v1680_v61 }
0x111b   :  { %v1662_v48 = vpop.xlane.xlu1 %1661 }
0x111c   :  { %v1664_v49 = vmul.f32 %v1662_v48, %v3189_v10  ;;  %v1682_v2 = vmul.f32 0.5, %v1681_v31 }
0x111e   :  { %v1666_v50 = vsub.f32 %v1654_v46, %v1664_v49  ;;  %v1683_v13 = vsub.f32 1.5, %v1682_v2  ;;  %v2991_v49 = vld [vmem:[%s3978_s7 + $0xd] ss:$0 sm:$0xff] }
0x1120   :  { %v1668_v54 = vmul.f32 %v1666_v50, %v1666_v50  ;;  %v1684_v4 = vmul.f32 %v3078_v58, %v1683_v13 }
0x1122   :  { %v1672_v55 = vsel %vm41_vm0, %v1668_v54, 0.0  ;;  %v1688_v7 = vsel %vm1687_vm9, %v3078_v58, %v1684_v4 }
0x1123   :  { %1673 = vadd.xlane.f32.xlu0 %v1672_v55  ;;  %v1699_v11 = vmul.f32 %v1688_v7, %v1665_v40  ;;  %v1870_v7 = vld [vmem:[%s3979_s8 + $0x8] sm:$0xff] }
0x1125   :  { %v1702_v16 = vmul.f32 %v2988_v9, %v1699_v11 }
0x1127   :  { %v1705_v19 = vadd.f32 %v2989_v15, %v1702_v16 }
0x1196   :  { %v1674_v62 = vpop.xlane.xlu0 %1673 }
0x1197   :  { %v1676_v63 = vmul.f32 %v1674_v62, %v3189_v10 }
0x1199   :  { %v1678_v0 = vadd.f32 1e-12, %v1676_v63 }
0x119b   :  { %3079 = vrsqrt.f32 %v1678_v0  ;;  %vm1695_vm11 = vweird.f32 %v1678_v0 }
0x11a1   :  { %v3080_v3 = vpop.eup %3079 }
0x11a2   :  { %v1690_v5 = vmul.f32 %v3080_v3, %v1678_v0  ;;  %vm1696_vm10 = vweird.f32 %v3080_v3 }
0x11a3   :  { %vm1697_vm12 = vmor %vm1695_vm11, %vm1696_vm10 }
0x11a4   :  { %v1691_v6 = vmul.f32 %v3080_v3, %v1690_v5  ;;  %v1872_v5 = vld [vmem:[%s3979_s8 + $0x18] sm:$0xff] }
0x11a5   :  { %1893 = vmatpush.msra.mxu2 %v1872_v5 }
0x11a6   :  { %v1692_v8 = vmul.f32 0.5, %v1691_v6  ;;  %v1871_v6 = vld [vmem:[%s3979_s8 + $0x10] sm:$0xff] }
0x11a7   :  { %1894 = vmatpush.msra.mxu2 %v1871_v6 }
0x11a8   :  { %v1693_v56 = vsub.f32 1.5, %v1692_v8  ;;  %v1869_v8 = vld [vmem:[%s3979_s8] sm:$0xff] }
0x11a9   :  { %1895 = vmatpush.msra.mxu2 %v1870_v7 }
0x11aa   :  { %v1694_v12 = vmul.f32 %v3080_v3, %v1693_v56 }
0x11ab   :  { %1896 = vmatpush.msra.mxu2 %v1869_v8 }
0x11ac   :  { %v1698_v14 = vsel %vm1697_vm12, %v3080_v3, %v1694_v12  ;;  %v1905_v12 = vlaneseq }
0x11ad   :  { %v1700_v25 = vmul.f32 %v1698_v14, %v1666_v50 }
0x11ae   :  { %v3612_v14 = vshrl.u32 %v1905_v12, 7 }
0x11af   :  { %v1703_v17 = vmul.f32 %v2988_v9, %v1700_v25 }
0x11b0   :  { %2957 = vset.pattern.permute.xlu1 %v3612_v14  ;;  %2958 = vset.pattern.permute.xlu2 %v3612_v14 }
0x11b1   :  { %v1706_v20 = vadd.f32 %v2989_v15, %v1703_v17 }
0x11b3   :  { %v1707_v21 = vpack.c.bf16 %v1706_v20, %v1705_v19 }
0x11b5   :  { %2884 = vmatmul.msk.bf16.vlgmr.msrb.gmra.mxu3 %vm41_vm0, %v1707_v21 }
0x1238   :  { %v1739_v18 = vpop.f32.mrf.mxu3 }
0x1239   :  { %v1740_v30 = vadd.f32 %v2990_v27, %v1739_v18 }
0x123b   :  { %v1746_v33 = vmul.f32 0.044715, %v1740_v30  ;;  %v1744_v45 = vmul.f32 0.5, %v1740_v30 }
0x123d   :  { %v1748_v1 = vmul.f32 %v1746_v33, %v1740_v30  ;;  %v2993_v33 = vld [vmem:[%s3978_s7 + $0xf] ss:$0 sm:$0xff] }
0x123f   :  { %v1750_v34 = vmul.f32 %v1748_v1, %v1740_v30 }
0x1240   :  { %v1741_v52 = vpop.f32.mrf.mxu3 }
0x1241   :  { %v1752_v35 = vadd.f32 %v1750_v34, %v1740_v30  ;;  %v1742_v59 = vadd.f32 %v2990_v27, %v1741_v52 }
0x1243   :  { %v1747_v36 = vmul.f32 0.044715, %v1742_v59  ;;  %v1754_v37 = vmul.f32 0.7978846, %v1752_v35  ;;  %v1745_v23 = vmul.f32 0.5, %v1742_v59 }
0x1245   :  { %v1749_v38 = vmul.f32 %v1747_v36, %v1742_v59  ;;  %3081 = vtanh.f32 %v1754_v37 }
0x1247   :  { %v1751_v39 = vmul.f32 %v1749_v38, %v1742_v59 }
0x1249   :  { %v1753_v40 = vadd.f32 %v1751_v39, %v1742_v59 }
0x124b   :  { %v1755_v41 = vmul.f32 0.7978846, %v1753_v40  ;;  %v3082_v42 = vpop.eup %3081  ;;  %v2994_v40 = vld [vmem:[%s3973_s2 + $0x2] ss:$0 sm:$0xff] }
0x124c   :  { %v1758_v43 = vadd.f32 1.0, %v3082_v42 }
0x124d   :  { %3083 = vtanh.f32 %v1755_v41 }
0x124e   :  { %v1760_v46 = vmul.f32 %v1758_v43, %v1744_v45  ;;  %v3633_v43 = vld [vmem:[%s3980_s9] sm:$0x1f] }
0x1253   :  { %v3084_v44 = vpop.eup %3083 }
0x1254   :  { %v1759_v29 = vadd.f32 1.0, %v3084_v44 }
0x1256   :  { %v1761_v47 = vmul.f32 %v1759_v29, %v1745_v23 }
0x1258   :  { %v1762_v48 = vpack.c.bf16 %v1761_v47, %v1760_v46 }
0x125a   :  { %2910 = vmatmul.msk.bf16.vlgmr.msrb.gmra.mxu1 %vm917_vm15, %v1762_v48 }
0x12d7   :  { %v1810_v50 = vpop.f32.mrf.mxu1 }
0x12d8   :  { %v1811_v54 = vadd.f32 %v2991_v49, %v1810_v50 }
0x12da   :  { %v1815_v55 = vadd.f32 %v1811_v54, %v1705_v19 }
0x12dc   :  { %v1819_v57 = vsel %vm41_vm0, %v1815_v55, 0.0 }
0x12dd   :  { %1820 = vadd.xlane.f32.xlu1 %v1819_v57 }
0x12df   :  { %v1812_v32 = vpop.f32.mrf.mxu1 }
0x12e0   :  { %v1813_v53 = vadd.f32 %v2991_v49, %v1812_v32  ;;  %v3089_v32 = vld [vmem:[%s3972_s1] sm:$0x3]  ;;  %s3125_s1 = smov [#allocation2]  }
0x12e1   :  { %s2660_s21 = sshll.u32 %s3125_s1, 4  ;;  %s2661_s21 = int_to_ptr.vmem [resolvable:$true] %s2660_s21 }
0x12e2   :  { %v1816_v24 = vadd.f32 %v1813_v53, %v1706_v20  ;;  %v105_v53 = vsel %vm104_vm5, %v3089_v32, 0.0 }
0x12e4   :  { %v1822_v58 = vsel %vm41_vm0, %v1816_v24, 0.0 }
0x12e5   :  { %1823 = vadd.xlane.f32.xlu2 %v1822_v58  ;;  %v3124_v58 = vmov 0  }
0x12e6   :  { %2959 = vset.pattern.permute.xlu0 %v3124_v58 }
0x1350   :  { %v1821_v60 = vpop.xlane.xlu1 %1820 }
0x1351   :  { %v1825_v61 = vmul.f32 %v1821_v60, %v3189_v10 }
0x1353   :  { %v1827_v31 = vsub.f32 %v1815_v55, %v1825_v61 }
0x1355   :  { %v1829_v62 = vmul.f32 %v1827_v31, %v1827_v31 }
0x1357   :  { %v1831_v63 = vsel %vm41_vm0, %v1829_v62, 0.0 }
0x1358   :  { %v1824_v0 = vpop.xlane.xlu2 %1823  ;;  %1832 = vadd.xlane.f32.xlu0 %v1831_v63 }
0x1359   :  { %v1826_v2 = vmul.f32 %v1824_v0, %v3189_v10 }
0x135b   :  { %v1828_v13 = vsub.f32 %v1816_v24, %v1826_v2 }
0x135d   :  { %v1830_v3 = vmul.f32 %v1828_v13, %v1828_v13 }
0x135f   :  { %v1834_v4 = vsel %vm41_vm0, %v1830_v3, 0.0 }
0x1360   :  { %1835 = vadd.xlane.f32.xlu1 %v1834_v4 }
0x13cb   :  { %v1833_v56 = vpop.xlane.xlu0 %1832 }
0x13cc   :  { %v1837_v9 = vmul.f32 %v1833_v56, %v3189_v10 }
0x13ce   :  { %v1839_v11 = vadd.f32 1e-12, %v1837_v9 }
0x13d0   :  { %3085 = vrsqrt.f32 %v1839_v11  ;;  %vm1847_vm14 = vweird.f32 %v1839_v11 }
0x13d3   :  { %v1836_v15 = vpop.xlane.xlu1 %1835 }
0x13d4   :  { %v1838_v16 = vmul.f32 %v1836_v15, %v3189_v10  ;;  %v2992_v10 = vld [vmem:[%s3978_s7 + $0xe] ss:$0 sm:$0xff] }
0x13d6   :  { %v3086_v25 = vpop.eup %3085  ;;  %v1840_v17 = vadd.f32 1e-12, %v1838_v16 }
0x13d7   :  { %v1842_v19 = vmul.f32 %v3086_v25, %v1839_v11  ;;  %vm1848_vm13 = vweird.f32 %v3086_v25 }
0x13d8   :  { %3087 = vrsqrt.f32 %v1840_v17  ;;  %vm1849_vm15 = vmor %vm1847_vm14, %vm1848_vm13  ;;  %vm1857_vm2 = vweird.f32 %v1840_v17 }
0x13d9   :  { %v1843_v20 = vmul.f32 %v3086_v25, %v1842_v19 }
0x13db   :  { %v1844_v21 = vmul.f32 0.5, %v1843_v20 }
0x13dd   :  { %v1845_v22 = vsub.f32 1.5, %v1844_v21 }
0x13de   :  { %v3088_v51 = vpop.eup %3087 }
0x13df   :  { %v1846_v26 = vmul.f32 %v3086_v25, %v1845_v22  ;;  %v1852_v27 = vmul.f32 %v3088_v51, %v1840_v17  ;;  %vm1858_vm1 = vweird.f32 %v3088_v51 }
0x13e0   :  { %vm1859_vm3 = vmor %vm1857_vm2, %vm1858_vm1 }
0x13e1   :  { %v1850_v28 = vsel %vm1849_vm15, %v3086_v25, %v1846_v26  ;;  %v1853_v18 = vmul.f32 %v3088_v51, %v1852_v27  ;;  %vm2512_vm15 = vcmask 33792  }
0x13e2   :  { %v1861_v30 = vmul.f32 %v1850_v28, %v1827_v31 }
0x13e3   :  { %v1854_v1 = vmul.f32 0.5, %v1853_v18 }
0x13e4   :  { %v1864_v34 = vmul.f32 %v2992_v10, %v1861_v30 }
0x13e5   :  { %v1855_v52 = vsub.f32 1.5, %v1854_v1 }
0x13e6   :  { %v1867_v35 = vadd.f32 %v2993_v33, %v1864_v34 }
0x13e7   :  { %v1856_v59 = vmul.f32 %v3088_v51, %v1855_v52 }
0x13e8   :  { %2913 = vmatmul.msk.f32.vlgmr.msra.gmra.mxu2 %vm41_vm0, %v1867_v35 }
0x13e9   :  { %v1860_v36 = vsel %vm1859_vm3, %v3088_v51, %v1856_v59 }
0x13ea   :  { %v1862_v37 = vmul.f32 %v1860_v36, %v1828_v13  ;;  %v3670_v13 = vand.u32 127, %v1905_v12 }
0x13ec   :  { %v1865_v38 = vmul.f32 %v2992_v10, %v1862_v37 }
0x13ee   :  { %v1868_v39 = vadd.f32 %v2993_v33, %v1865_v38 }
0x13f0   :  { %2914 = vmatmul.msk.f32.gmra.mxu2 %vm41_vm0, %v1868_v39  ;;  %vm1985_vm0 = vcmask 1041409  }
0x146b   :  { %v1898_v41 = vpop.f32.mrf.mxu2 }
0x146c   :  { %v3628_v42 = vadd.f32 %v2994_v40, %v1898_v41 }
0x146e   :  { %v1955_v44 = vperm.slane %v3628_v42, 1  ;;  %v1907_v45 = vperm.slane %v3628_v42, 0  ;;  %v2045_v24 = vperm.slane %v3628_v42, 2  ;;  %v2131_v22 = vperm.slane %v3628_v42, 3 }
0x1470   :  { %1960 = vperm.xlu1 %2957, %v1955_v44   ;;  %v3638_v23 = vadd.f32 %v1907_v45, %v3633_v43 }
0x1472   :  { %v1912_v29 = vsel %vm1911_vm4, %v3638_v23, -inf }
0x1473   :  { %1913 = vmax.xlane.f32.xlu2 %v1912_v29  ;;  %v1901_v46 = vpop.f32.mrf.mxu2 }
0x1474   :  { %v3642_v47 = vadd.f32 %v2994_v40, %v1901_v46 }
0x1476   :  { %v1908_v48 = vperm.slane %v3642_v47, 0  ;;  %v1988_v49 = vrot.slane %v3642_v47, 7  ;;  %v1962_v57 = vperm.slane %v3642_v47, 1  ;;  %v2052_v17 = vperm.slane %v3642_v47, 2 }
0x1477   :  { %v2138_v10 = vperm.slane %v3642_v47, 3 }
0x1478   :  { %v3647_v50 = vadd.f32 %v1908_v48, %v3633_v43  ;;  %v1989_v54 = vsel %vm1985_vm0, %v1988_v49, %v3628_v42  ;;  %2960 = vset.pattern.permute.xlu1 %v3124_v58  ;;  %v2224_v48 = vperm.slane %v3642_v47, 4 }
0x147a   :  { %v1915_v55 = vsel %vm1911_vm4, %v3647_v50, -inf }
0x147b   :  { %1916 = vmax.xlane.f32.xlu0 %v1915_v55 }
0x148b   :  { %1967 = vperm.xlu2 %2958, %v1962_v57  }
0x14b4   :  { %106 = vadd.xlane.f32.xlu2 %v105_v53 }
0x14cc   :  { %2050 = vperm.xlu2 %2958, %v2045_v24  }
0x14d4   :  { %2962 = vset.pattern.permute.xlu2 %v3124_v58 }
0x14e2   :  { %v1961_v60 = vpop.permute.xlu1 %1960 }
0x14e6   :  { %v3662_v61 = vpop.xlane.xlu2 %1913 }
0x14e7   :  { %v1971_v31 = vadd.f32 %v1961_v60, %v3662_v61 }
0x14e9   :  { %1978 = vperm.xlu0 %2959, %v1971_v31  }
0x14ee   :  { %v1968_v62 = vpop.permute.xlu2 %1967  ;;  %v3665_v63 = vpop.xlane.xlu0 %1916 }
0x14ef   :  { %v1972_v0 = vadd.f32 %v1968_v62, %v3665_v63 }
0x14f1   :  { %1981 = vperm.xlu1 %2960, %v1972_v0  }
0x14f9   :  { %2961 = vset.pattern.permute.xlu1 %v3612_v14 }
0x1527   :  { %v3672_v3 = vpop.xlane.xlu2 %106 }
0x1528   :  { %vm1952_vm6 = vcmp.gt.f32.partialorder %v3672_v3, 1.0  ;;  %vm2044_vm7 = vcmp.gt.f32.partialorder %v3672_v3, 2.0  ;;  %vm2130_vm8 = vcmp.gt.f32.partialorder %v3672_v3, 3.0  ;;  %vm2216_vm9 = vcmp.gt.f32.partialorder %v3672_v3, 4.0 }
0x1529   :  { %vm2302_vm10 = vcmp.gt.f32.partialorder %v3672_v3, 5.0  ;;  %vm2388_vm11 = vcmp.gt.f32.partialorder %v3672_v3, 6.0  ;;  %vm2474_vm1 = vcmp.gt.f32.partialorder %v3672_v3, 7.0 }
0x152f   :  { %v2051_v19 = vpop.permute.xlu2 %2050 }
0x155b   :  { %v1979_v2 = vpop.permute.xlu0 %1978 }
0x155c   :  { %v1983_v5 = vperm.slane %v1979_v2, %v3670_v13 }
0x1563   :  { %v1982_v4 = vpop.permute.xlu1 %1981 }
0x1564   :  { %v1984_v6 = vperm.slane %v1982_v4, %v3670_v13 }
0x1566   :  { %v1986_v7 = vsel %vm1985_vm0, %v1984_v6, %v1983_v5  ;;  %v2303_v5 = vperm.slane %v3628_v42, 5  ;;  %v2217_v6 = vperm.slane %v3628_v42, 4 }
0x1567   :  { %v1991_v8 = vsel %vm1952_vm6, %v1986_v7, %v1989_v54 }
0x1568   :  { %v1998_v56 = vperm.slane %v1991_v8, 0  ;;  %v1997_v9 = vrot.slane %v1991_v8, 1 }
0x156a   :  { %v3681_v11 = vadd.f32 %v1998_v56, %v3633_v43  ;;  %v1999_v12 = vperm.slane %v1997_v9, 0 }
0x156c   :  { %v2004_v15 = vsel %vm1911_vm4, %v3681_v11, -inf  ;;  %v3686_v16 = vadd.f32 %v1999_v12, %v3633_v43 }
0x156d   :  { %2005 = vmax.xlane.f32.xlu1 %v2004_v15 }
0x156e   :  { %v2007_v25 = vsel %vm1911_vm4, %v3686_v16, -inf }
0x156f   :  { %2008 = vmax.xlane.f32.xlu0 %v2007_v25 }
0x1586   :  { %2057 = vperm.xlu1 %2961, %v2052_v17  }
0x15e0   :  { %v3691_v20 = vpop.xlane.xlu1 %2005 }
0x15e1   :  { %v2061_v21 = vadd.f32 %v2051_v19, %v3691_v20 }
0x15e2   :  { %v3696_v51 = vpop.xlane.xlu0 %2008 }
0x15e3   :  { %2068 = vperm.xlu0 %2959, %v2061_v21  }
0x15eb   :  { %2963 = vset.pattern.permute.xlu0 %v3612_v14 }
0x15f3   :  { %2136 = vperm.xlu0 %2963, %v2131_v22  }
0x15f8   :  { %v2058_v26 = vpop.permute.xlu1 %2057 }
0x15f9   :  { %v2062_v27 = vadd.f32 %v2058_v26, %v3696_v51 }
0x15fb   :  { %2143 = vperm.xlu0 %2963, %v2138_v10   ;;  %2071 = vperm.xlu2 %2962, %v2062_v27  }
0x1603   :  { %2964 = vset.pattern.permute.xlu0 %v3124_v58 }
0x1655   :  { %v2072_v28 = vpop.permute.xlu2 %2071  ;;  %v2069_v18 = vpop.permute.xlu0 %2068 }
0x1656   :  { %v2074_v30 = vperm.slane %v2072_v28, %v3670_v13  ;;  %v2073_v33 = vperm.slane %v2069_v18, %v3670_v13 }
0x1658   :  { %v2075_v1 = vsel %vm1985_vm0, %v2074_v30, %v2073_v33 }
0x1659   :  { %v2077_v34 = vsel %vm2044_vm7, %v2075_v1, %v1991_v8 }
0x165a   :  { %v2084_v52 = vperm.slane %v2077_v34, 0  ;;  %v2083_v35 = vrot.slane %v2077_v34, 1 }
0x165c   :  { %v3708_v59 = vadd.f32 %v2084_v52, %v3633_v43  ;;  %v2085_v36 = vperm.slane %v2083_v35, 0 }
0x165e   :  { %v2090_v37 = vsel %vm1911_vm4, %v3708_v59, -inf  ;;  %v3713_v38 = vadd.f32 %v2085_v36, %v3633_v43 }
0x165f   :  { %2091 = vmax.xlane.f32.xlu2 %v2090_v37 }
0x1660   :  { %v2093_v39 = vsel %vm1911_vm4, %v3713_v38, -inf }
0x1661   :  { %2094 = vmax.xlane.f32.xlu1 %v2093_v39 }
0x1665   :  { %v2137_v40 = vpop.permute.xlu0 %2136 }
0x166d   :  { %v2144_v45 = vpop.permute.xlu0 %2143 }
0x16d2   :  { %v3717_v41 = vpop.xlane.xlu2 %2091 }
0x16d3   :  { %v2147_v44 = vadd.f32 %v2137_v40, %v3717_v41 }
0x16d4   :  { %v3720_v29 = vpop.xlane.xlu1 %2094 }
0x16d5   :  { %v2148_v46 = vadd.f32 %v2144_v45, %v3720_v29  ;;  %2154 = vperm.xlu0 %2964, %v2147_v44   ;;  %v2389_v44 = vperm.slane %v3628_v42, 6  ;;  %v2396_v45 = vperm.slane %v3642_v47, 6 }
0x16d7   :  { %2157 = vperm.xlu2 %2962, %v2148_v46  }
0x16dd   :  { %2968 = vset.pattern.permute.xlu0 %v3612_v14 }
0x16df   :  { %2965 = vset.pattern.permute.xlu2 %v3612_v14 }
0x16e7   :  { %2229 = vperm.xlu2 %2965, %v2224_v48  }
0x16ef   :  { %2966 = vset.pattern.permute.xlu2 %v3124_v58 }
0x1731   :  { %v2158_v49 = vpop.permute.xlu2 %2157 }
0x1732   :  { %v2160_v55 = vperm.slane %v2158_v49, %v3670_v13 }
0x1741   :  { %v2230_v7 = vpop.permute.xlu2 %2229 }
0x1747   :  { %v2155_v54 = vpop.permute.xlu0 %2154 }
0x1748   :  { %v2159_v57 = vperm.slane %v2155_v54, %v3670_v13 }
0x174a   :  { %v2161_v32 = vsel %vm1985_vm0, %v2160_v55, %v2159_v57 }
0x174b   :  { %v2163_v53 = vsel %vm2130_vm8, %v2161_v32, %v2077_v34  ;;  %v2310_v34 = vperm.slane %v3642_v47, 5 }
0x174c   :  { %v2170_v24 = vperm.slane %v2163_v53, 0  ;;  %v2169_v60 = vrot.slane %v2163_v53, 1 }
0x174e   :  { %v3734_v31 = vadd.f32 %v2170_v24, %v3633_v43  ;;  %v2171_v62 = vperm.slane %v2169_v60, 0 }
0x1750   :  { %v2176_v0 = vsel %vm1911_vm4, %v3734_v31, -inf  ;;  %v3739_v2 = vadd.f32 %v2171_v62, %v3633_v43 }
0x1751   :  { %2177 = vmax.xlane.f32.xlu1 %v2176_v0 }
0x1752   :  { %v2179_v4 = vsel %vm1911_vm4, %v3739_v2, -inf }
0x1753   :  { %2180 = vmax.xlane.f32.xlu0 %v2179_v4  ;;  %v2475_v4 = vperm.slane %v3628_v42, 7 }
0x1767   :  { %2308 = vperm.xlu0 %2968, %v2303_v5  }
0x176a   :  { %2222 = vperm.xlu1 %2961, %v2217_v6  }
0x176f   :  { %2970 = vset.pattern.permute.xlu0 %v3124_v58 }
0x1772   :  { %2967 = vset.pattern.permute.xlu1 %v3124_v58 }
0x17c4   :  { %v3750_v9 = vpop.xlane.xlu1 %2177 }
0x17c6   :  { %v3747_v8 = vpop.xlane.xlu0 %2180 }
0x17c7   :  { %v2234_v56 = vadd.f32 %v2230_v7, %v3747_v8 }
0x17c9   :  { %2243 = vperm.xlu1 %2967, %v2234_v56  }
0x17d9   :  { %v2309_v52 = vpop.permute.xlu0 %2308 }
0x17dc   :  { %v2223_v12 = vpop.permute.xlu1 %2222 }
0x17dd   :  { %v2233_v15 = vadd.f32 %v2223_v12, %v3750_v9 }
0x17df   :  { %2240 = vperm.xlu2 %2966, %v2233_v15  }
0x17e7   :  { %2969 = vset.pattern.permute.xlu2 %v3612_v14 }
0x1839   :  { %v2241_v25 = vpop.permute.xlu2 %2240 }
0x183a   :  { %v2245_v19 = vperm.slane %v2241_v25, %v3670_v13 }
0x183b   :  { %v2244_v17 = vpop.permute.xlu1 %2243 }
0x183c   :  { %v2246_v21 = vperm.slane %v2244_v17, %v3670_v13 }
0x183e   :  { %v2247_v22 = vsel %vm1985_vm0, %v2246_v21, %v2245_v19 }
0x183f   :  { %v2249_v26 = vsel %vm2216_vm9, %v2247_v22, %v2163_v53 }
0x1840   :  { %v2256_v27 = vperm.slane %v2249_v26, 0  ;;  %v2255_v10 = vrot.slane %v2249_v26, 1 }
0x1842   :  { %v3761_v28 = vadd.f32 %v2256_v27, %v3633_v43  ;;  %v2257_v18 = vperm.slane %v2255_v10, 0 }
0x1844   :  { %v2262_v30 = vsel %vm1911_vm4, %v3761_v28, -inf  ;;  %v3766_v33 = vadd.f32 %v2257_v18, %v3633_v43 }
0x1845   :  { %2263 = vmax.xlane.f32.xlu2 %v2262_v30 }
0x1846   :  { %v2265_v1 = vsel %vm1911_vm4, %v3766_v33, -inf }
0x1847   :  { %2266 = vmax.xlane.f32.xlu1 %v2265_v1 }
0x185d   :  { %2315 = vperm.xlu2 %2969, %v2310_v34  }
0x18b8   :  { %v3771_v35 = vpop.xlane.xlu2 %2263 }
0x18b9   :  { %v2319_v36 = vadd.f32 %v2309_v52, %v3771_v35  ;;  %v2482_v52 = vperm.slane %v3642_v47, 7 }
0x18ba   :  { %v3774_v37 = vpop.xlane.xlu1 %2266 }
0x18bb   :  { %2326 = vperm.xlu1 %2967, %v2319_v36  }
0x18c0   :  { %v2316_v39 = vpop.permute.xlu2 %2315 }
0x18c1   :  { %v2320_v40 = vadd.f32 %v2316_v39, %v3774_v37 }
0x18c3   :  { %2329 = vperm.xlu0 %2970, %v2320_v40   ;;  %2971 = vset.pattern.permute.xlu1 %v3612_v14 }
0x18cb   :  { %2394 = vperm.xlu1 %2971, %v2389_v44   ;;  %2973 = vset.pattern.permute.xlu0 %v3612_v14 }
0x18d3   :  { %2401 = vperm.xlu1 %2971, %v2396_v45  }
0x18db   :  { %2972 = vset.pattern.permute.xlu1 %v3124_v58 }
0x192d   :  { %v2327_v46 = vpop.permute.xlu1 %2326 }
0x192e   :  { %v2331_v49 = vperm.slane %v2327_v46, %v3670_v13 }
0x1935   :  { %v2330_v48 = vpop.permute.xlu0 %2329 }
0x1936   :  { %v2332_v54 = vperm.slane %v2330_v48, %v3670_v13 }
0x1938   :  { %v2333_v55 = vsel %vm1985_vm0, %v2332_v54, %v2331_v49 }
0x1939   :  { %v2335_v57 = vsel %vm2302_vm10, %v2333_v55, %v2249_v26 }
0x193a   :  { %v2342_v32 = vperm.slane %v2335_v57, 0  ;;  %v2341_v14 = vrot.slane %v2335_v57, 1 }
0x193c   :  { %v3789_v53 = vadd.f32 %v2342_v32, %v3633_v43  ;;  %v2343_v24 = vperm.slane %v2341_v14, 0 }
0x193d   :  { %v2395_v5 = vpop.permute.xlu1 %2394 }
0x193e   :  { %v2348_v60 = vsel %vm1911_vm4, %v3789_v53, -inf  ;;  %v3794_v62 = vadd.f32 %v2343_v24, %v3633_v43 }
0x193f   :  { %2349 = vmax.xlane.f32.xlu2 %v2348_v60 }
0x1940   :  { %v2351_v0 = vsel %vm1911_vm4, %v3794_v62, -inf }
0x1941   :  { %2352 = vmax.xlane.f32.xlu0 %v2351_v0 }
0x1945   :  { %v2402_v12 = vpop.permute.xlu1 %2401 }
0x1955   :  { %2480 = vperm.xlu0 %2973, %v2475_v4  }
0x195d   :  { %2975 = vset.pattern.permute.xlu0 %v3124_v58 }
0x19b2   :  { %v3800_v6 = vpop.xlane.xlu2 %2349 }
0x19b3   :  { %v2405_v7 = vadd.f32 %v2395_v5, %v3800_v6  ;;  %vm2354_vm3 = vcmp.eq.f32.partialorder %v3789_v53, %v3800_v6 }
0x19b4   :  { %v3803_v56 = vpop.xlane.xlu0 %2352 }
0x19b5   :  { %2412 = vperm.xlu1 %2972, %v2405_v7   ;;  %v2406_v15 = vadd.f32 %v2402_v12, %v3803_v56 }
0x19bd   :  { %2415 = vperm.xlu1 %2972, %v2406_v15  }
0x19c7   :  { %v2481_v36 = vpop.permute.xlu0 %2480 }
0x1a27   :  { %v2413_v25 = vpop.permute.xlu1 %2412 }
0x1a28   :  { %v2417_v19 = vperm.slane %v2413_v25, %v3670_v13 }
0x1a2f   :  { %v2416_v17 = vpop.permute.xlu1 %2415 }
0x1a30   :  { %v2418_v42 = vperm.slane %v2416_v17, %v3670_v13 }
0x1a32   :  { %v2419_v21 = vsel %vm1985_vm0, %v2418_v42, %v2417_v19 }
0x1a33   :  { %v2421_v22 = vsel %vm2388_vm11, %v2419_v21, %v2335_v57 }
0x1a34   :  { %v2428_v26 = vperm.slane %v2421_v22, 0  ;;  %v2427_v27 = vrot.slane %v2421_v22, 1 }
0x1a36   :  { %v2432_v10 = vadd.f32 %v2428_v26, %v3633_v43  ;;  %v2429_v18 = vperm.slane %v2427_v27, 0 }
0x1a38   :  { %v2434_v30 = vsel %vm1911_vm4, %v2432_v10, -inf  ;;  %v2433_v1 = vadd.f32 %v2429_v18, %v3633_v43  ;;  %v2356_v18 = vsel %vm2354_vm3, %v3670_v13, 5  ;;  %vm2268_vm3 = vcmp.eq.f32.partialorder %v3761_v28, %v3771_v35 }
0x1a39   :  { %2435 = vmax.xlane.f32.xlu1 %v2434_v30 }
0x1a3a   :  { %v2437_v34 = vsel %vm1911_vm4, %v2433_v1, -inf }
0x1a3b   :  { %2438 = vmax.xlane.f32.xlu2 %v2437_v34 }
0x1a53   :  { %2487 = vperm.xlu2 %2969, %v2482_v52  }
0x1a5b   :  { %2974 = vset.pattern.permute.xlu2 %v3124_v58 }
0x1aac   :  { %v2436_v39 = vpop.xlane.xlu1 %2435 }
0x1aad   :  { %vm2440_vm12 = vcmp.eq.f32.partialorder %v2432_v10, %v2436_v39  ;;  %v2491_v40 = vadd.f32 %v2481_v36, %v2436_v39 }
0x1aae   :  { %v2442_v44 = vsel %vm2440_vm12, %v3670_v13, 5  ;;  %v2439_v45 = vpop.xlane.xlu2 %2438 }
0x1aaf   :  { %2498 = vperm.xlu2 %2974, %v2491_v40   ;;  %v2444_v46 = vsel %vm1911_vm4, %v2442_v44, 2147483647  ;;  %vm2441_vm13 = vcmp.eq.f32.partialorder %v2433_v1, %v2439_v45  ;;  %v2358_v1 = vsel %vm1911_vm4, %v2356_v18, 2147483647 }
0x1ab0   :  { %v2446_v43 = vshra.s32 %v2444_v46, 16  ;;  %v2443_v47 = vsel %vm2441_vm13, %v3670_v13, 5  ;;  %v2445_v32 = vand.u32 65535, %v2444_v46  ;;  %v2360_v34 = vshra.s32 %v2358_v1, 16 }
0x1ab1   :  { %v2459_v58 = vsel %vm1911_vm4, %v2443_v47, 2147483647  ;;  %vm2355_vm13 = vcmp.eq.f32.partialorder %v3794_v62, %v3803_v56 }
0x1ab2   :  { %v2448_v48 = vcvt.s32.f32 %v2446_v43  ;;  %v2461_v55 = vshra.s32 %v2459_v58, 16  ;;  %v2447_v24 = vcvt.s32.f32 %v2445_v32  ;;  %v2460_v10 = vand.u32 65535, %v2459_v58 }
0x1ab3   :  { %v2362_v52 = vcvt.s32.f32 %v2360_v34  ;;  %v2357_v39 = vsel %vm2355_vm13, %v3670_v13, 5 }
0x1ab4   :  { %2449 = vmin.xlane.f32.xlu0 %v2448_v48  ;;  %v2463_v57 = vcvt.s32.f32 %v2461_v55  ;;  %v2373_v44 = vsel %vm1911_vm4, %v2357_v39, 2147483647 }
0x1ab6   :  { %v2488_v49 = vpop.permute.xlu2 %2487 }
0x1ab7   :  { %v2492_v54 = vadd.f32 %v2488_v49, %v2439_v45  ;;  %v2375_v45 = vshra.s32 %v2373_v44, 16 }
0x1ab9   :  { %2501 = vperm.xlu1 %2972, %v2492_v54   ;;  %v2377_v43 = vcvt.s32.f32 %v2375_v45 }
0x1ae3   :  { %2464 = vmin.xlane.f32.xlu1 %v2463_v57 }
0x1b09   :  { %v2499_v60 = vpop.permute.xlu2 %2498 }
0x1b0a   :  { %v2503_v5 = vperm.slane %v2499_v60, %v3670_v13 }
0x1b27   :  { %v2450_v14 = vpop.xlane.xlu0 %2449 }
0x1b28   :  { %vm2451_vm14 = vcmp.eq.f32.partialorder %v2448_v48, %v2450_v14  ;;  %v2359_v48 = vand.u32 65535, %v2358_v1  ;;  %v2456_v58 = vcvt.f32.s32 %v2450_v14  ;;  %v2374_v14 = vand.u32 65535, %v2373_v44 }
0x1b29   :  { %v2452_v0 = vsel %vm2451_vm14, %v2447_v24, inf }
0x1b2a   :  { %2453 = vmin.xlane.f32.xlu0 %v2452_v0  ;;  %v2361_v54 = vcvt.s32.f32 %v2359_v48  ;;  %v2457_v24 = vshll.u32 %v2456_v58, 16  ;;  %v2376_v28 = vcvt.s32.f32 %v2374_v14 }
0x1b2b   :  { %v2502_v4 = vpop.permute.xlu1 %2501 }
0x1b2c   :  { %v2504_v7 = vperm.slane %v2502_v4, %v3670_v13 }
0x1b2e   :  { %v2505_v12 = vsel %vm1985_vm0, %v2504_v7, %v2503_v5 }
0x1b2f   :  { %v2507_v15 = vsel %vm2474_vm1, %v2505_v12, %v2421_v22  ;;  %v2462_v22 = vcvt.s32.f32 %v2460_v10 }
0x1b30   :  { %v2513_v25 = vsel %vm2512_vm15, %v2507_v15, -inf }
0x1b31   :  { %2514 = vmax.xlane.f32.xlu2 %v2513_v25 }
0x1b56   :  { %v2465_v27 = vpop.xlane.xlu1 %2464 }
0x1b57   :  { %vm2466_vm12 = vcmp.eq.f32.partialorder %v2463_v57, %v2465_v27  ;;  %v2471_v62 = vcvt.f32.s32 %v2465_v27 }
0x1b58   :  { %v2467_v30 = vsel %vm2466_vm12, %v2462_v22, inf  ;;  %vm2269_vm12 = vcmp.eq.f32.partialorder %v3766_v33, %v3774_v37 }
0x1b59   :  { %v2472_v57 = vshll.u32 %v2471_v62, 16  ;;  %v2271_v10 = vsel %vm2269_vm12, %v3670_v13, 5 }
0x1b5a   :  { %v2287_v34 = vsel %vm1911_vm4, %v2271_v10, 2147483647 }
0x1b9d   :  { %v2454_v56 = vpop.xlane.xlu0 %2453 }
0x1b9e   :  { %v2455_v32 = vcvt.f32.s32 %v2454_v56 }
0x1ba0   :  { %v2458_v0 = vadd.s32 %v2457_v24, %v2455_v32 }
0x1ba2   :  { %v2508_v7 = vperm.slane %v2458_v0, %v3670_v13  ;;  %v2288_v0 = vand.u32 65535, %v2287_v34 }
0x1ba4   :  { %v2515_v17 = vpop.xlane.xlu2 %2514 }
0x1ba5   :  { %vm2516_vm2 = vcmp.eq.f32.partialorder %v2507_v15, %v2515_v17 }
0x1ba6   :  { %v2517_v19 = vsel %vm2516_vm2, %v3670_v13, 5 }
0x1ba7   :  { %v2518_v42 = vsel %vm2512_vm15, %v2517_v19, 2147483647 }
0x1ba8   :  { %v2520_v21 = vshra.s32 %v2518_v42, 16  ;;  %v2519_v36 = vand.u32 65535, %v2518_v42 }
0x1baa   :  { %v2522_v26 = vcvt.s32.f32 %v2520_v21  ;;  %v2521_v6 = vcvt.s32.f32 %v2519_v36  ;;  %v2289_v36 = vshra.s32 %v2287_v34, 16 }
0x1bac   :  { %2523 = vmin.xlane.f32.xlu2 %v2522_v26 }
0x1bb4   :  { %2468 = vmin.xlane.f32.xlu2 %v2467_v30 }
0x1bbc   :  { %2363 = vmin.xlane.f32.xlu2 %v2362_v52 }
0x1c1f   :  { %v2524_v53 = vpop.xlane.xlu2 %2523 }
0x1c20   :  { %vm2525_vm14 = vcmp.eq.f32.partialorder %v2522_v26, %v2524_v53  ;;  %v2530_v4 = vcvt.f32.s32 %v2524_v53  ;;  %v2270_v26 = vsel %vm2268_vm3, %v3670_v13, 5  ;;  %v2291_v53 = vcvt.s32.f32 %v2289_v36 }
0x1c21   :  { %v2526_v40 = vsel %vm2525_vm14, %v2521_v6, inf  ;;  %v2272_v1 = vsel %vm1911_vm4, %v2270_v26, 2147483647 }
0x1c22   :  { %2527 = vmin.xlane.f32.xlu0 %v2526_v40  ;;  %v2531_v15 = vshll.u32 %v2530_v4, 16 }
0x1c27   :  { %v2469_v46 = vpop.xlane.xlu2 %2468 }
0x1c28   :  { %v2470_v55 = vcvt.f32.s32 %v2469_v46 }
0x1c2a   :  { %2378 = vmin.xlane.f32.xlu0 %v2377_v43  ;;  %v2473_v60 = vadd.s32 %v2472_v57, %v2470_v55  ;;  %v2273_v57 = vand.u32 65535, %v2272_v1 }
0x1c2c   :  { %v2509_v5 = vperm.slane %v2473_v60, %v3670_v13 }
0x1c2e   :  { %v2510_v17 = vsel %vm1985_vm0, %v2509_v5, %v2508_v7 }
0x1c2f   :  { %v2364_v49 = vpop.xlane.xlu2 %2363  ;;  %v2511_v42 = vsel %vm2474_vm1, %v2510_v17, %v3670_v13  ;;  %vm2182_vm1 = vcmp.eq.f32.partialorder %v3734_v31, %v3750_v9 }
0x1c30   :  { %vm2365_vm2 = vcmp.eq.f32.partialorder %v2362_v52, %v2364_v49  ;;  %v2274_v52 = vshra.s32 %v2272_v1, 16  ;;  %v2370_v40 = vcvt.f32.s32 %v2364_v49  ;;  %v2184_v5 = vsel %vm2182_vm1, %v3670_v13, 5 }
0x1c31   :  { %v2366_v47 = vsel %vm2365_vm2, %v2361_v54, inf  ;;  %vm2183_vm2 = vcmp.eq.f32.partialorder %v3739_v2, %v3747_v8  ;;  %v2186_v26 = vsel %vm1911_vm4, %v2184_v5, 2147483647  ;;  %vm2097_vm1 = vcmp.eq.f32.partialorder %v3713_v38, %v3720_v29 }
0x1c32   :  { %2367 = vmin.xlane.f32.xlu1 %v2366_v47  ;;  %v2276_v39 = vcvt.s32.f32 %v2274_v52  ;;  %v2371_v46 = vshll.u32 %v2370_v40, 16 }
0x1c95   :  { %v2528_v12 = vpop.xlane.xlu0 %2527 }
0x1c96   :  { %v2529_v25 = vcvt.f32.s32 %v2528_v12 }
0x1c98   :  { %v3842_v19 = vadd.s32 %v2531_v15, %v2529_v25  ;;  %v2275_v15 = vcvt.s32.f32 %v2273_v57  ;;  %v2290_v25 = vcvt.s32.f32 %v2288_v0 }
0x1c9a   :  { %vm2533_vm13 = vcmp.eq.s32.totalorder %v3670_v13, %v3842_v19 }
0x1c9b   :  { %v2534_v21 = vsel %vm2533_vm13, %v2511_v42, 0 }
0x1c9c   :  { %v2535_v27 = vsel %vm2512_vm15, %v2534_v21, 0  ;;  %v2185_v21 = vsel %vm2183_vm2, %v3670_v13, 5 }
0x1c9d   :  { %v2379_v18 = vpop.xlane.xlu0 %2378  ;;  %v2537_v35 = vshrl.u32 %v2535_v27, 16  ;;  %v2536_v22 = vand.u32 65535, %v2535_v27 }
0x1c9e   :  { %vm2380_vm14 = vcmp.eq.f32.partialorder %v2377_v43, %v2379_v18  ;;  %v2385_v44 = vcvt.f32.s32 %v2379_v18  ;;  %v2188_v18 = vshra.s32 %v2186_v26, 16 }
0x1c9f   :  { %v2381_v33 = vsel %vm2380_vm14, %v2376_v28, inf  ;;  %v2539_v37 = vcvt.s32.f32 %v2537_v35  ;;  %v2538_v30 = vcvt.s32.f32 %v2536_v22  ;;  %v2201_v28 = vsel %vm1911_vm4, %v2185_v21, 2147483647 }
0x1ca0   :  { %2382 = vmin.xlane.f32.xlu2 %v2381_v33  ;;  %v2386_v48 = vshll.u32 %v2385_v44, 16  ;;  %v2203_v22 = vshra.s32 %v2201_v28, 16  ;;  %v2190_v33 = vcvt.s32.f32 %v2188_v18 }
0x1ca1   :  { %2542 = vadd.xlane.f32.xlu0 %v2539_v37  ;;  %2540 = vadd.xlane.f32.xlu1 %v2538_v30 }
0x1ca2   :  { %v2205_v37 = vcvt.s32.f32 %v2203_v22 }
0x1ca5   :  { %v2368_v6 = vpop.xlane.xlu1 %2367 }
0x1ca6   :  { %v2369_v45 = vcvt.f32.s32 %v2368_v6 }
0x1ca8   :  { %2277 = vmin.xlane.f32.xlu2 %v2276_v39  ;;  %v2372_v54 = vadd.s32 %v2371_v46, %v2369_v45  ;;  %v2187_v46 = vand.u32 65535, %v2186_v26 }
0x1ca9   :  { %2292 = vmin.xlane.f32.xlu0 %v2291_v53 }
0x1caa   :  { %v2422_v60 = vperm.slane %v2372_v54, %v3670_v13  ;;  %v2189_v57 = vcvt.s32.f32 %v2187_v46 }
0x1d13   :  { %v2383_v43 = vpop.xlane.xlu2 %2382 }
0x1d14   :  { %v2384_v47 = vcvt.f32.s32 %v2383_v43  ;;  %v2541_v62 = vpop.xlane.xlu1 %2540  ;;  %v2543_v56 = vpop.xlane.xlu0 %2542 }
0x1d15   :  { %v2545_v58 = vcvt.f32.s32 %v2543_v56  ;;  %v2544_v32 = vcvt.f32.s32 %v2541_v62  ;;  %v2202_v62 = vand.u32 65535, %v2201_v28 }
0x1d16   :  { %v2387_v55 = vadd.s32 %v2386_v48, %v2384_v47 }
0x1d17   :  { %v2546_v24 = vshll.u32 %v2545_v58, 16  ;;  %v2204_v5 = vcvt.s32.f32 %v2202_v62 }
0x1d18   :  { %v2423_v49 = vperm.slane %v2387_v55, %v3670_v13 }
0x1d19   :  { %v3862_v4 = vadd.s32 %v2546_v24, %v2544_v32 }
0x1d1a   :  { %v2424_v7 = vsel %vm1985_vm0, %v2423_v49, %v2422_v60 }
0x1d1b   :  { %v2278_v12 = vpop.xlane.xlu2 %2277  ;;  %v2425_v31 = vsel %vm2388_vm11, %v2424_v7, %v3670_v13  ;;  %vm2548_vm3 = vcmp.eq.s32.totalorder %v3670_v13, %v3862_v4  ;;  %vm2096_vm11 = vcmp.eq.f32.partialorder %v3708_v59, %v3717_v41 }
0x1d1c   :  { %vm2279_vm12 = vcmp.eq.f32.partialorder %v2276_v39, %v2278_v12  ;;  %v2293_v9 = vpop.xlane.xlu0 %2292  ;;  %v2549_v17 = vsel %vm2548_vm3, %v2425_v31, 0  ;;  %v2284_v30 = vcvt.f32.s32 %v2278_v12  ;;  %v2098_v24 = vsel %vm2096_vm11, %v3670_v13, 5 }
0x1d1d   :  { %v2280_v14 = vsel %vm2279_vm12, %v2275_v15, inf  ;;  %vm2294_vm13 = vcmp.eq.f32.partialorder %v2291_v53, %v2293_v9  ;;  %v2550_v42 = vsel %vm2512_vm15, %v2549_v17, 0  ;;  %v2299_v1 = vcvt.f32.s32 %v2293_v9 }
0x1d1e   :  { %2281 = vmin.xlane.f32.xlu1 %v2280_v14  ;;  %v2295_v2 = vsel %vm2294_vm13, %v2290_v25, inf  ;;  %v2552_v8 = vshrl.u32 %v2550_v42, 16  ;;  %v2551_v10 = vand.u32 65535, %v2550_v42  ;;  %v2285_v52 = vshll.u32 %v2284_v30, 16 }
0x1d1f   :  { %2296 = vmin.xlane.f32.xlu2 %v2295_v2  ;;  %v2300_v53 = vshll.u32 %v2299_v1, 16  ;;  %v2100_v12 = vsel %vm1911_vm4, %v2098_v24, 2147483647  ;;  %v2099_v31 = vsel %vm2097_vm1, %v3670_v13, 5  ;;  %vm2011_vm13 = vcmp.eq.f32.partialorder %v3686_v16, %v3696_v51 }
0x1d20   :  { %v2554_v27 = vcvt.s32.f32 %v2552_v8  ;;  %v2553_v35 = vcvt.s32.f32 %v2551_v10  ;;  %v2102_v38 = vshra.s32 %v2100_v12, 16  ;;  %v2115_v14 = vsel %vm1911_vm4, %v2099_v31, 2147483647 }
0x1d21   :  { %v2117_v21 = vshra.s32 %v2115_v14, 16  ;;  %v2101_v30 = vand.u32 65535, %v2100_v12 }
0x1d22   :  { %2557 = vadd.xlane.f32.xlu0 %v2554_v27  ;;  %v2104_v42 = vcvt.s32.f32 %v2102_v38 }
0x1d23   :  { %v2119_v2 = vcvt.s32.f32 %v2117_v21 }
0x1d26   :  { %2555 = vadd.xlane.f32.xlu1 %v2553_v35 }
0x1d27   :  { %2191 = vmin.xlane.f32.xlu2 %v2190_v33 }
0x1d2a   :  { %2206 = vmin.xlane.f32.xlu0 %v2205_v37 }
0x1d91   :  { %v2282_v34 = vpop.xlane.xlu1 %2281 }
0x1d92   :  { %v2283_v36 = vcvt.f32.s32 %v2282_v34  ;;  %v2297_v39 = vpop.xlane.xlu2 %2296 }
0x1d93   :  { %v2298_v6 = vcvt.f32.s32 %v2297_v39 }
0x1d94   :  { %v2286_v40 = vadd.s32 %v2285_v52, %v2283_v36 }
0x1d95   :  { %v2301_v44 = vadd.s32 %v2300_v53, %v2298_v6  ;;  %v2558_v45 = vpop.xlane.xlu0 %2557 }
0x1d96   :  { %v2560_v43 = vcvt.f32.s32 %v2558_v45  ;;  %v2336_v48 = vperm.slane %v2286_v40, %v3670_v13  ;;  %v2116_v45 = vand.u32 65535, %v2115_v14 }
0x1d97   :  { %v2337_v54 = vperm.slane %v2301_v44, %v3670_v13  ;;  %v2103_v44 = vcvt.s32.f32 %v2101_v30 }
0x1d98   :  { %v2561_v56 = vshll.u32 %v2560_v43, 16 }
0x1d99   :  { %v2556_v47 = vpop.xlane.xlu1 %2555  ;;  %v2338_v32 = vsel %vm1985_vm0, %v2337_v54, %v2336_v48 }
0x1d9a   :  { %v2559_v58 = vcvt.f32.s32 %v2556_v47  ;;  %v2192_v55 = vpop.xlane.xlu2 %2191  ;;  %v2339_v59 = vsel %vm2302_vm10, %v2338_v32, %v3670_v13  ;;  %vm2010_vm10 = vcmp.eq.f32.partialorder %v3681_v11, %v3691_v20  ;;  %v2118_v47 = vcvt.s32.f32 %v2116_v45 }
0x1d9b   :  { %vm2193_vm14 = vcmp.eq.f32.partialorder %v2190_v33, %v2192_v55  ;;  %v2198_v8 = vcvt.f32.s32 %v2192_v55  ;;  %v2012_v54 = vsel %vm2010_vm10, %v3670_v13, 5  ;;  %v2013_v55 = vsel %vm2011_vm13, %v3670_v13, 5 }
0x1d9c   :  { %v3883_v60 = vadd.s32 %v2561_v56, %v2559_v58  ;;  %v2194_v49 = vsel %vm2193_vm14, %v2189_v57, inf  ;;  %v2014_v56 = vsel %vm1911_vm4, %v2012_v54, 2147483647  ;;  %vm2642_vm13 = vcmp.eq.s32.totalorder %v3670_v13, 2 }
0x1d9d   :  { %2195 = vmin.xlane.f32.xlu1 %v2194_v49  ;;  %v2207_v0 = vpop.xlane.xlu0 %2206  ;;  %v2199_v28 = vshll.u32 %v2198_v8, 16  ;;  %v2016_v49 = vshra.s32 %v2014_v56, 16  ;;  %v2015_v8 = vand.u32 65535, %v2014_v56 }
0x1d9e   :  { %vm2563_vm2 = vcmp.eq.s32.totalorder %v3670_v13, %v3883_v60  ;;  %vm2208_vm3 = vcmp.eq.f32.partialorder %v2205_v37, %v2207_v0  ;;  %v2213_v26 = vcvt.f32.s32 %v2207_v0  ;;  %v2029_v0 = vsel %vm1911_vm4, %v2013_v55, 2147483647 }
0x1d9f   :  { %v2209_v41 = vsel %vm2208_vm3, %v2204_v5, inf  ;;  %v2564_v7 = vsel %vm2563_vm2, %v2339_v59, 0  ;;  %v2031_v5 = vshra.s32 %v2029_v0, 16  ;;  %v2018_v59 = vcvt.s32.f32 %v2016_v49 }
0x1da0   :  { %2210 = vmin.xlane.f32.xlu2 %v2209_v41  ;;  %v2565_v15 = vsel %vm2512_vm15, %v2564_v7, 0  ;;  %v2214_v35 = vshll.u32 %v2213_v26, 16  ;;  %vm1919_vm2 = vcmp.eq.f32.partialorder %v3647_v50, %v3665_v63 }
0x1da1   :  { %v2567_v9 = vshrl.u32 %v2565_v15, 16  ;;  %v2566_v25 = vand.u32 65535, %v2565_v15  ;;  %v2033_v41 = vcvt.s32.f32 %v2031_v5 }
0x1da3   :  { %v2569_v29 = vcvt.s32.f32 %v2567_v9  ;;  %v2568_v17 = vcvt.s32.f32 %v2566_v25 }
0x1da5   :  { %2572 = vadd.xlane.f32.xlu0 %v2569_v29  ;;  %2570 = vadd.xlane.f32.xlu1 %v2568_v17 }
0x1da8   :  { %2105 = vmin.xlane.f32.xlu2 %v2104_v42 }
0x1dad   :  { %2120 = vmin.xlane.f32.xlu0 %v2119_v2 }
0x1e10   :  { %v2196_v27 = vpop.xlane.xlu1 %2195 }
0x1e11   :  { %v2197_v10 = vcvt.f32.s32 %v2196_v27 }
0x1e13   :  { %v2211_v18 = vpop.xlane.xlu2 %2210  ;;  %v2200_v33 = vadd.s32 %v2199_v28, %v2197_v10  ;;  %v2030_v28 = vand.u32 65535, %v2029_v0 }
0x1e14   :  { %v2212_v22 = vcvt.f32.s32 %v2211_v18 }
0x1e15   :  { %v2250_v39 = vperm.slane %v2200_v33, %v3670_v13 }
0x1e16   :  { %v2215_v37 = vadd.s32 %v2214_v35, %v2212_v22 }
0x1e18   :  { %v2251_v1 = vperm.slane %v2215_v37, %v3670_v13  ;;  %v2571_v34 = vpop.xlane.xlu1 %2570  ;;  %v2573_v52 = vpop.xlane.xlu0 %2572  ;;  %v2017_v37 = vcvt.s32.f32 %v2015_v8 }
0x1e19   :  { %v2575_v36 = vcvt.f32.s32 %v2573_v52  ;;  %v2574_v53 = vcvt.f32.s32 %v2571_v34  ;;  %v2032_v34 = vcvt.s32.f32 %v2030_v28 }
0x1e1a   :  { %v2252_v46 = vsel %vm1985_vm0, %v2251_v1, %v2250_v39 }
0x1e1b   :  { %v2576_v6 = vshll.u32 %v2575_v36, 16  ;;  %v2106_v40 = vpop.xlane.xlu2 %2105  ;;  %v2253_v11 = vsel %vm2216_vm9, %v2252_v46, %v3670_v13  ;;  %vm1918_vm9 = vcmp.eq.f32.partialorder %v3638_v23, %v3662_v61 }
0x1e1c   :  { %vm2107_vm12 = vcmp.eq.f32.partialorder %v2104_v42, %v2106_v40  ;;  %v2112_v7 = vcvt.f32.s32 %v2106_v40  ;;  %v1920_v30 = vsel %vm1918_vm9, %v3670_v13, 5  ;;  %vm2650_vm9 = vcmp.eq.s32.totalorder %v3670_v13, 6 }
0x1e1d   :  { %v3901_v43 = vadd.s32 %v2576_v6, %v2574_v53  ;;  %v2108_v48 = vsel %vm2107_vm12, %v2103_v44, inf  ;;  %v1922_v36 = vsel %vm1911_vm4, %v1920_v30, 2147483647  ;;  %v1921_v53 = vsel %vm1919_vm2, %v3670_v13, 5 }
0x1e1e   :  { %2109 = vmin.xlane.f32.xlu1 %v2108_v48  ;;  %v2113_v9 = vshll.u32 %v2112_v7, 16  ;;  %v1937_v44 = vsel %vm1911_vm4, %v1921_v53, 2147483647  ;;  %v1924_v45 = vshra.s32 %v1922_v36, 16  ;;  %v1923_v0 = vand.u32 65535, %v1922_v36 }
0x1e1f   :  { %vm2578_vm11 = vcmp.eq.s32.totalorder %v3670_v13, %v3901_v43  ;;  %v1939_v48 = vshra.s32 %v1937_v44, 16 }
0x1e20   :  { %v2121_v20 = vpop.xlane.xlu0 %2120  ;;  %v2579_v62 = vsel %vm2578_vm11, %v2253_v11, 0  ;;  %v1926_v54 = vcvt.s32.f32 %v1924_v45  ;;  %vm2646_vm11 = vcmp.eq.s32.totalorder %v3670_v13, 4 }
0x1e21   :  { %vm2122_vm14 = vcmp.eq.f32.partialorder %v2119_v2, %v2121_v20  ;;  %v2580_v58 = vsel %vm2512_vm15, %v2579_v62, 0  ;;  %v2127_v15 = vcvt.f32.s32 %v2121_v20  ;;  %v1941_v11 = vcvt.s32.f32 %v1939_v48 }
0x1e22   :  { %v2123_v57 = vsel %vm2122_vm14, %v2118_v47, inf  ;;  %v2582_v32 = vshrl.u32 %v2580_v58, 16  ;;  %v2581_v16 = vand.u32 65535, %v2580_v58  ;;  %vm2648_vm14 = vcmp.eq.s32.totalorder %v3670_v13, 5 }
0x1e23   :  { %2124 = vmin.xlane.f32.xlu2 %v2123_v57  ;;  %v2128_v38 = vshll.u32 %v2127_v15, 16 }
0x1e24   :  { %v2584_v51 = vcvt.s32.f32 %v2582_v32  ;;  %v2583_v24 = vcvt.s32.f32 %v2581_v16 }
0x1e26   :  { %2587 = vadd.xlane.f32.xlu0 %v2584_v51  ;;  %2585 = vadd.xlane.f32.xlu1 %v2583_v24 }
0x1e2b   :  { %2019 = vmin.xlane.f32.xlu2 %v2018_v59 }
0x1e2e   :  { %2034 = vmin.xlane.f32.xlu0 %v2033_v41 }
0x1e91   :  { %v2110_v12 = vpop.xlane.xlu1 %2109 }
0x1e92   :  { %v2111_v31 = vcvt.f32.s32 %v2110_v12 }
0x1e94   :  { %v2114_v29 = vadd.s32 %v2113_v9, %v2111_v31  ;;  %v1938_v31 = vand.u32 65535, %v1937_v44 }
0x1e96   :  { %v2125_v25 = vpop.xlane.xlu2 %2124  ;;  %v2164_v26 = vperm.slane %v2114_v29, %v3670_v13 }
0x1e97   :  { %v2126_v17 = vcvt.f32.s32 %v2125_v25 }
0x1e99   :  { %v2129_v14 = vadd.s32 %v2128_v38, %v2126_v17  ;;  %v2586_v42 = vpop.xlane.xlu1 %2585  ;;  %v2588_v21 = vpop.xlane.xlu0 %2587  ;;  %v1925_v38 = vcvt.s32.f32 %v1923_v0 }
0x1e9a   :  { %v2590_v2 = vcvt.f32.s32 %v2588_v21  ;;  %v2589_v10 = vcvt.f32.s32 %v2586_v42  ;;  %v1940_v21 = vcvt.s32.f32 %v1938_v31 }
0x1e9b   :  { %v2165_v27 = vperm.slane %v2129_v14, %v3670_v13 }
0x1e9c   :  { %v2591_v18 = vshll.u32 %v2590_v2, 16 }
0x1e9d   :  { %v2166_v35 = vsel %vm1985_vm0, %v2165_v27, %v2164_v26 }
0x1e9e   :  { %v3920_v22 = vadd.s32 %v2591_v18, %v2589_v10  ;;  %v2020_v33 = vpop.xlane.xlu2 %2019  ;;  %v2167_v23 = vsel %vm2130_vm8, %v2166_v35, %v3670_v13 }
0x1e9f   :  { %vm2021_vm1 = vcmp.eq.f32.partialorder %v2018_v59, %v2020_v33  ;;  %v2026_v20 = vcvt.f32.s32 %v2020_v33 }
0x1ea0   :  { %v2022_v1 = vsel %vm2021_vm1, %v2017_v37, inf  ;;  %vm2593_vm3 = vcmp.eq.s32.totalorder %v3670_v13, %v3920_v22  ;;  %vm2652_vm1 = vcmp.eq.s32.totalorder %v3670_v13, 7 }
0x1ea1   :  { %2023 = vmin.xlane.f32.xlu1 %v2022_v1  ;;  %v2035_v61 = vpop.xlane.xlu0 %2034  ;;  %v2594_v52 = vsel %vm2593_vm3, %v2167_v23, 0  ;;  %v2027_v58 = vshll.u32 %v2026_v20, 16 }
0x1ea2   :  { %vm2036_vm10 = vcmp.eq.f32.partialorder %v2033_v41, %v2035_v61  ;;  %v2595_v39 = vsel %vm2512_vm15, %v2594_v52, 0  ;;  %v2041_v47 = vcvt.f32.s32 %v2035_v61 }
0x1ea3   :  { %v2037_v50 = vsel %vm2036_vm10, %v2032_v34, inf  ;;  %v2597_v63 = vshrl.u32 %v2595_v39, 16  ;;  %v2596_v6 = vand.u32 65535, %v2595_v39 }
0x1ea4   :  { %2038 = vmin.xlane.f32.xlu2 %v2037_v50  ;;  %v2042_v57 = vshll.u32 %v2041_v47, 16 }
0x1ea5   :  { %v2599_v40 = vcvt.s32.f32 %v2597_v63  ;;  %v2598_v46 = vcvt.s32.f32 %v2596_v6 }
0x1ea7   :  { %2602 = vadd.xlane.f32.xlu0 %v2599_v40 }
0x1ea9   :  { %2600 = vadd.xlane.f32.xlu1 %v2598_v46 }
0x1eac   :  { %1927 = vmin.xlane.f32.xlu2 %v1926_v54 }
0x1eaf   :  { %1942 = vmin.xlane.f32.xlu0 %v1941_v11 }
0x1f14   :  { %v2024_v62 = vpop.xlane.xlu1 %2023 }
0x1f15   :  { %v2025_v56 = vcvt.f32.s32 %v2024_v62 }
0x1f17   :  { %v2039_v55 = vpop.xlane.xlu2 %2038  ;;  %v2028_v32 = vadd.s32 %v2027_v58, %v2025_v56 }
0x1f18   :  { %v2040_v16 = vcvt.f32.s32 %v2039_v55 }
0x1f19   :  { %v2078_v5 = vperm.slane %v2028_v32, %v3670_v13 }
0x1f1a   :  { %v2043_v51 = vadd.s32 %v2042_v57, %v2040_v16  ;;  %v2603_v24 = vpop.xlane.xlu0 %2602 }
0x1f1b   :  { %v2605_v49 = vcvt.f32.s32 %v2603_v24 }
0x1f1c   :  { %v2079_v59 = vperm.slane %v2043_v51, %v3670_v13  ;;  %v2601_v41 = vpop.xlane.xlu1 %2600 }
0x1f1d   :  { %v2606_v7 = vshll.u32 %v2605_v49, 16  ;;  %v2604_v12 = vcvt.f32.s32 %v2601_v41 }
0x1f1e   :  { %v2080_v15 = vsel %vm1985_vm0, %v2079_v59, %v2078_v5 }
0x1f1f   :  { %v3937_v9 = vadd.s32 %v2606_v7, %v2604_v12  ;;  %v1928_v25 = vpop.xlane.xlu2 %1927  ;;  %v2081_v29 = vsel %vm2044_vm7, %v2080_v15, %v3670_v13 }
0x1f20   :  { %vm1929_vm4 = vcmp.eq.f32.partialorder %v1926_v54, %v1928_v25  ;;  %v1934_v28 = vcvt.f32.s32 %v1928_v25 }
0x1f21   :  { %vm2608_vm8 = vcmp.eq.s32.totalorder %v3670_v13, %v3937_v9  ;;  %v1930_v17 = vsel %vm1929_vm4, %v1925_v38, inf }
0x1f22   :  { %v2609_v14 = vsel %vm2608_vm8, %v2081_v29, 0  ;;  %1931 = vmin.xlane.f32.xlu1 %v1930_v17  ;;  %v1943_v42 = vpop.xlane.xlu0 %1942  ;;  %v1935_v30 = vshll.u32 %v1934_v28, 16 }
0x1f23   :  { %vm1944_vm12 = vcmp.eq.f32.partialorder %v1941_v11, %v1943_v42  ;;  %v2610_v2 = vsel %vm2512_vm15, %v2609_v14, 0  ;;  %v1949_v35 = vcvt.f32.s32 %v1943_v42 }
0x1f24   :  { %v1945_v8 = vsel %vm1944_vm12, %v1940_v21, inf  ;;  %v2612_v26 = vshrl.u32 %v2610_v2, 16  ;;  %v2611_v27 = vand.u32 65535, %v2610_v2 }
0x1f25   :  { %1946 = vmin.xlane.f32.xlu2 %v1945_v8  ;;  %v1950_v23 = vshll.u32 %v1949_v35, 16 }
0x1f26   :  { %v2614_v10 = vcvt.s32.f32 %v2612_v26  ;;  %v2613_v18 = vcvt.s32.f32 %v2611_v27 }
0x1f28   :  { %2617 = vadd.xlane.f32.xlu0 %v2614_v10 }
0x1f2a   :  { %2615 = vadd.xlane.f32.xlu1 %v2613_v18 }
0x1f95   :  { %v1932_v33 = vpop.xlane.xlu1 %1931 }
0x1f96   :  { %v1933_v37 = vcvt.f32.s32 %v1932_v33 }
0x1f98   :  { %v1947_v1 = vpop.xlane.xlu2 %1946  ;;  %v1936_v61 = vadd.s32 %v1935_v30, %v1933_v37 }
0x1f99   :  { %v1948_v34 = vcvt.f32.s32 %v1947_v1 }
0x1f9a   :  { %v1992_v53 = vperm.slane %v1936_v61, %v3670_v13 }
0x1f9b   :  { %v1951_v52 = vadd.s32 %v1950_v23, %v1948_v34  ;;  %v2618_v36 = vpop.xlane.xlu0 %2617 }
0x1f9c   :  { %v2620_v39 = vcvt.f32.s32 %v2618_v36 }
0x1f9d   :  { %v1993_v50 = vperm.slane %v1951_v52, %v3670_v13  ;;  %v2616_v63 = vpop.xlane.xlu1 %2615 }
0x1f9e   :  { %v2621_v6 = vshll.u32 %v2620_v39, 16  ;;  %v2619_v40 = vcvt.f32.s32 %v2616_v63 }
0x1f9f   :  { %v1994_v44 = vsel %vm1985_vm0, %v1993_v50, %v1992_v53  ;;  %vm2638_vm0 = vcmp.eq.s32.totalorder %v3670_v13, 0 }
0x1fa0   :  { %v2622_v45 = vadd.s32 %v2621_v6, %v2619_v40  ;;  %v1995_v46 = vsel %vm1952_vm6, %v1994_v44, %v3670_v13  ;;  %vm2640_vm6 = vcmp.eq.s32.totalorder %v3670_v13, 1 }
0x1fa2   :  { %vm2623_vm7 = vcmp.eq.s32.totalorder %v3670_v13, %v2622_v45 }
0x1fa3   :  { %v2624_v48 = vsel %vm2623_vm7, %v1995_v46, 0 }
0x1fa4   :  { %v2625_v54 = vsel %vm2512_vm15, %v2624_v48, 0  ;;  %vm2644_vm15 = vcmp.eq.s32.totalorder %v3670_v13, 3 }
0x1fa5   :  { %v2627_v11 = vshrl.u32 %v2625_v54, 16  ;;  %v2626_v20 = vand.u32 65535, %v2625_v54 }
0x1fa7   :  { %v2629_v47 = vcvt.s32.f32 %v2627_v11  ;;  %v2628_v62 = vcvt.s32.f32 %v2626_v20 }
0x1fa9   :  { %2632 = vadd.xlane.f32.xlu2 %v2629_v47  ;;  %2630 = vadd.xlane.f32.xlu0 %v2628_v62 }
0x201c   :  { %v2633_v56 = vpop.xlane.xlu2 %2632  ;;  %v2631_v58 = vpop.xlane.xlu0 %2630 }
0x201d   :  { %v2635_v55 = vcvt.f32.s32 %v2633_v56  ;;  %v2634_v32 = vcvt.f32.s32 %v2631_v58 }
0x201f   :  { %v2636_v57 = vshll.u32 %v2635_v55, 16 }
0x2021   :  { %v2637_v3 = vadd.s32 %v2636_v57, %v2634_v32 }
0x2023   :  { %v2639_v16 = vsel %vm2638_vm0, %v2637_v3, 0 }
0x2024   :  { %v2641_v51 = vsel %vm2640_vm6, %v2622_v45, %v2639_v16 }
0x2025   :  { %v2643_v24 = vsel %vm2642_vm13, %v3937_v9, %v2641_v51 }
0x2026   :  { %v2645_v49 = vsel %vm2644_vm15, %v3920_v22, %v2643_v24 }
0x2027   :  { %v2647_v0 = vsel %vm2646_vm11, %v3901_v43, %v2645_v49 }
0x2028   :  { %v2649_v5 = vsel %vm2648_vm14, %v3883_v60, %v2647_v0 }
0x2029   :  { %v2651_v59 = vsel %vm2650_vm9, %v3862_v4, %v2649_v5 }
0x202a   :  { %v2653_v22 = vsel %vm2652_vm1, %v3842_v19, %v2651_v59 }
0x202b   :  { %2654 = vst.msk [vmem:[#allocation2] sm:$0x3] %vm104_vm5, %v2653_v22 }
0x202c   :  { %2665 = dma.vmem_to_hbm [thread:$0]  %s2661_s21, 32, %s2663_s23, [#allocation3]  }
0x202d   :  { %3114 = dma.done.wait [#allocation3], 32  }
0x202e   :  { %3115 = vsyncadd [#allocation3], 4294967264 }
0x202f   :  { %2670 = vsyncpa [#allocation3], 1 }

</bundles_post_ra>
